<compile_context>
chip_gen: v5e
topology: v5e:2x2
jax: 0.10.0
libtpu: 0.0.40
codegen_flags: <defaults>
</compile_context>

<pallas_src>
import functools
import math

import jax
import jax.numpy as jnp
from jax import lax
from jax.experimental import pallas as pl
from jax.experimental.pallas import tpu as pltpu


def _layernorm(x, gamma, beta, eps):
    mu = jnp.mean(x, axis=-1, keepdims=True)
    xc = x - mu
    var = jnp.mean(xc * xc, axis=-1, keepdims=True)
    return xc * lax.rsqrt(var + eps) * gamma + beta


def _gelu_tanh(x):
    # TODO(synk): PyTorch nn.GELU() default is the exact erf form; the tanh
    # approximation used here (guaranteed to lower on Mosaic via the EUP)
    # differs from it by < ~1e-3 in activation value.
    c = math.sqrt(2.0 / math.pi)
    return 0.5 * x * (1.0 + jnp.tanh(c * (x + 0.044715 * x * x * x)))


def _self_transformer_kernel(
        x_ref, bias_ref,
        wqkv_ref, bqkv_ref, wo_ref, bo_ref,
        g1_ref, be1_ref,
        w1_ref, bf1_ref, w2_ref, bf2_ref,
        g2_ref, be2_ref,
        o_ref,
        *, heads: int, ln_eps: float):
    x = x_ref[0].astype(jnp.float32)                       # (L, D)
    L, D = x.shape
    hd = D // heads
    scale = 1.0 / math.sqrt(hd)

    # ---- multi-head self-attention ---------------------------------------
    qkv = (jnp.dot(x, wqkv_ref[...], preferred_element_type=jnp.float32)
           + bqkv_ref[...])                                # (L, 3D), lane-dense
    q = qkv[:, :D] * scale
    k = qkv[:, D:2 * D]
    v = qkv[:, 2 * D:]
    kp_bias = bias_ref[0]                                  # (1, L) additive key mask

    attn = jnp.zeros((L, D), dtype=jnp.float32)
    for h in range(heads):                                 # static unroll (heads=8)
        sl = slice(h * hd, (h + 1) * hd)
        q_h, k_h, v_h = q[:, sl], k[:, sl], v[:, sl]       # (L, hd)
        # scores = q_h @ k_h.T  (contract last dims)
        s = lax.dot_general(q_h, k_h, (((1,), (1,)), ((), ())),
                            preferred_element_type=jnp.float32)   # (L, L)
        s = s + kp_bias                                    # mask key columns
        s = s - jnp.max(s, axis=-1, keepdims=True)
        p = jnp.exp(s)
        p = p / jnp.sum(p, axis=-1, keepdims=True)
        ctx = jnp.dot(p, v_h, preferred_element_type=jnp.float32)  # (L, hd)
        # out_proj folded per head: concat_h(ctx_h) @ Wo^T == sum_h ctx_h @ Wo^T[rows h]
        attn = attn + jnp.dot(ctx, wo_ref[h * hd:(h + 1) * hd, :],
                              preferred_element_type=jnp.float32)
    attn = attn + bo_ref[...]

    # ---- residual + LayerNorm 1 -------------------------------------------
    h1 = _layernorm(attn + x, g1_ref[...], be1_ref[...], ln_eps)

    # ---- FFN + residual + LayerNorm 2 ---------------------------------------
    # TODO(synk): attention-weight dropout and the two FFN nn.Dropout layers are
    # identity in eval mode; training-mode dropout via pltpu.prng_* would not
    # bit-match torch's RNG stream, so it is omitted here.
    f = jnp.dot(h1, w1_ref[...], preferred_element_type=jnp.float32) + bf1_ref[...]
    f = _gelu_tanh(f)
    f = jnp.dot(f, w2_ref[...], preferred_element_type=jnp.float32) + bf2_ref[...]
    h2 = _layernorm(f + h1, g2_ref[...], be2_ref[...], ln_eps)

    o_ref[0] = h2.astype(o_ref.dtype)


def self_transformer_forward(x, params, mask=None, *, heads=8, ln_eps=1e-5):
    """x: (B, L, D); mask: optional (B, L) bool, True = ignore that key."""
    B, L, D = x.shape
    assert D % heads == 0, "d_model must be divisible by heads"
    assert D % 128 == 0, "d_model should be a multiple of 128 for lane-dense tiles"
    f32 = jnp.float32

    wqkv_t = params["in_proj_weight"].T.astype(f32)            # (D, 3D)
    bqkv = params["in_proj_bias"].astype(f32)[None, :]         # (1, 3D)
    wo_t = params["out_proj_weight"].T.astype(f32)             # (D, D)
    bo = params["out_proj_bias"].astype(f32)[None, :]          # (1, D)
    g1 = params["norm1_weight"].astype(f32)[None, :]
    be1 = params["norm1_bias"].astype(f32)[None, :]
    w1_t = params["ffn_w1"].T.astype(f32)                      # (D, 4D)
    bf1 = params["ffn_b1"].astype(f32)[None, :]                # (1, 4D)
    w2_t = params["ffn_w2"].T.astype(f32)                      # (4D, D)
    bf2 = params["ffn_b2"].astype(f32)[None, :]                # (1, D)
    g2 = params["norm2_weight"].astype(f32)[None, :]
    be2 = params["norm2_bias"].astype(f32)[None, :]

    if mask is None:
        kp_bias = jnp.zeros((B, 1, L), f32)
    else:
        kp_bias = jnp.where(mask, -1e9, 0.0).astype(f32)[:, None, :]

    def full_spec(shape):
        n = len(shape)
        return pl.BlockSpec(shape, lambda b: (0,) * n)   # constant -> stays resident

    kern = functools.partial(_self_transformer_kernel,
                             heads=int(heads), ln_eps=float(ln_eps))
    return pl.pallas_call(
        kern,
        out_shape=jax.ShapeDtypeStruct((B, L, D), x.dtype),
        grid=(B,),
        in_specs=[
            pl.BlockSpec((1, L, D), lambda b: (b, 0, 0)),   # x: one batch row / step
            pl.BlockSpec((1, 1, L), lambda b: (b, 0, 0)),   # key-padding bias
            full_spec((D, 3 * D)), full_spec((1, 3 * D)),   # Wqkv^T, bqkv
            full_spec((D, D)), full_spec((1, D)),           # Wo^T, bo
            full_spec((1, D)), full_spec((1, D)),           # LN1 gamma, beta
            full_spec((D, 4 * D)), full_spec((1, 4 * D)),   # W1^T, b1
            full_spec((4 * D, D)), full_spec((1, D)),       # W2^T, b2
            full_spec((1, D)), full_spec((1, D)),           # LN2 gamma, beta
        ],
        out_specs=pl.BlockSpec((1, L, D), lambda b: (b, 0, 0)),
        compiler_params=pltpu.CompilerParams(
            dimension_semantics=("parallel",),              # shard batch over TCs (v7x)
            vmem_limit_bytes=32 * 1024 * 1024,
        ),
    )(x, kp_bias, wqkv_t, bqkv, wo_t, bo, g1, be1, w1_t, bf1, w2_t, bf2, g2, be2)


def _reference(x, params, mask, *, heads=8, ln_eps=1e-5):
    """Pure-JAX eval-mode reference of the same math (same GELU approximation)."""
    B, L, D = x.shape
    hd = D // heads
    hi = lax.Precision.HIGHEST
    qkv = jnp.einsum("bld,ed->ble", x, params["in_proj_weight"],
                     precision=hi) + params["in_proj_bias"]
    q, k, v = jnp.split(qkv, 3, axis=-1)

    def heads_first(t):
        return t.reshape(B, L, heads, hd).transpose(0, 2, 1, 3)

    q = heads_first(q) / math.sqrt(hd)
    k = heads_first(k)
    v = heads_first(v)
    s = jnp.einsum("bhld,bhmd->bhlm", q, k, precision=hi)
    if mask is not None:
        s = s + jnp.where(mask, -1e9, 0.0)[:, None, None, :]
    s = s - jnp.max(s, axis=-1, keepdims=True)
    p = jnp.exp(s)
    p = p / jnp.sum(p, axis=-1, keepdims=True)
    ctx = jnp.einsum("bhlm,bhmd->bhld", p, v, precision=hi)
    ctx = ctx.transpose(0, 2, 1, 3).reshape(B, L, D)
    attn = jnp.einsum("bld,ed->ble", ctx, params["out_proj_weight"],
                      precision=hi) + params["out_proj_bias"]
    h1 = _layernorm(attn + x, params["norm1_weight"], params["norm1_bias"], ln_eps)
    f = jnp.einsum("bld,ed->ble", h1, params["ffn_w1"],
                   precision=hi) + params["ffn_b1"]
    f = _gelu_tanh(f)
    f = jnp.einsum("bld,ed->ble", f, params["ffn_w2"],
                   precision=hi) + params["ffn_b2"]
    return _layernorm(f + h1, params["norm2_weight"], params["norm2_bias"], ln_eps)


if __name__ == "__main__":
    heads, dim = 8, 256      # module defaults: heads=8, dim=256
    batch, seq = 2, 8        # small example shapes

    key = jax.random.PRNGKey(0)
    ks = jax.random.split(key, 14)
    w = 0.02
    params = {
        "in_proj_weight": w * jax.random.normal(ks[0], (3 * dim, dim), jnp.float32),
        "in_proj_bias": w * jax.random.normal(ks[1], (3 * dim,), jnp.float32),
        "out_proj_weight": w * jax.random.normal(ks[2], (dim, dim), jnp.float32),
        "out_proj_bias": w * jax.random.normal(ks[3], (dim,), jnp.float32),
        "norm1_weight": 1.0 + 0.1 * jax.random.normal(ks[4], (dim,), jnp.float32),
        "norm1_bias": 0.1 * jax.random.normal(ks[5], (dim,), jnp.float32),
        "ffn_w1": w * jax.random.normal(ks[6], (4 * dim, dim), jnp.float32),
        "ffn_b1": w * jax.random.normal(ks[7], (4 * dim,), jnp.float32),
        "ffn_w2": w * jax.random.normal(ks[8], (dim, 4 * dim), jnp.float32),
        "ffn_b2": w * jax.random.normal(ks[9], (dim,), jnp.float32),
        "norm2_weight": 1.0 + 0.1 * jax.random.normal(ks[10], (dim,), jnp.float32),
        "norm2_bias": 0.1 * jax.random.normal(ks[11], (dim,), jnp.float32),
    }
    x = jax.random.normal(ks[12], (batch, seq, dim), jnp.float32)
    # key_padding_mask (PyTorch convention: True = ignore that key); pad the tail
    # of the second sequence to exercise the mask path.
    mask = jnp.zeros((batch, seq), dtype=bool).at[1, seq - 2:].set(True)

    out = self_transformer_forward(x, params, mask=mask, heads=heads)
    out = jax.block_until_ready(out)

    ref = _reference(x, params, mask, heads=heads)
    assert out.shape == (batch, seq, dim)
    assert out.dtype == x.dtype
    max_err = float(jnp.max(jnp.abs(out - ref)))
    assert jnp.allclose(out, ref, atol=2e-3, rtol=2e-3), f"mismatch, max abs err {max_err}"
    print("KERNEL_OK")
</pallas_src>

<mosaic_0001>
module attributes {stable_mosaic.version = 11 : i64} {
  func.func @_self_transformer_kernel(%arg0: i32, %arg1: memref<1x8x256xf32, #tpu.memory_space<vmem>>, %arg2: memref<1x1x8xf32, #tpu.memory_space<vmem>>, %arg3: memref<256x768xf32, #tpu.memory_space<vmem>>, %arg4: memref<1x768xf32, #tpu.memory_space<vmem>>, %arg5: memref<256x256xf32, #tpu.memory_space<vmem>>, %arg6: memref<1x256xf32, #tpu.memory_space<vmem>>, %arg7: memref<1x256xf32, #tpu.memory_space<vmem>>, %arg8: memref<1x256xf32, #tpu.memory_space<vmem>>, %arg9: memref<256x1024xf32, #tpu.memory_space<vmem>>, %arg10: memref<1x1024xf32, #tpu.memory_space<vmem>>, %arg11: memref<1024x256xf32, #tpu.memory_space<vmem>>, %arg12: memref<1x256xf32, #tpu.memory_space<vmem>>, %arg13: memref<1x256xf32, #tpu.memory_space<vmem>>, %arg14: memref<1x256xf32, #tpu.memory_space<vmem>>, %arg15: memref<1x8x256xf32, #tpu.memory_space<vmem>>) attributes {dimension_semantics = [#tpu.dimension_semantics<parallel>], iteration_bounds = array<i64: 2>, scalar_prefetch = 0 : i64, scratch_operands = 0 : i64, tpu.core_type = #tpu.core_type<tc>, window_params = [{transform_indices = @transform_0, window_bounds = array<i64: 1, 8, 256>}, {transform_indices = @transform_1, window_bounds = array<i64: 1, 1, 8>}, {pipeline_mode = #tpu.pipeline_mode<synchronous>, transform_indices = @transform_2, window_bounds = array<i64: 256, 768>}, {pipeline_mode = #tpu.pipeline_mode<synchronous>, transform_indices = @transform_3, window_bounds = array<i64: 1, 768>}, {pipeline_mode = #tpu.pipeline_mode<synchronous>, transform_indices = @transform_4, window_bounds = array<i64: 256, 256>}, {pipeline_mode = #tpu.pipeline_mode<synchronous>, transform_indices = @transform_5, window_bounds = array<i64: 1, 256>}, {pipeline_mode = #tpu.pipeline_mode<synchronous>, transform_indices = @transform_6, window_bounds = array<i64: 1, 256>}, {pipeline_mode = #tpu.pipeline_mode<synchronous>, transform_indices = @transform_7, window_bounds = array<i64: 1, 256>}, {pipeline_mode = #tpu.pipeline_mode<synchronous>, transform_indices = @transform_8, window_bounds = array<i64: 256, 1024>}, {pipeline_mode = #tpu.pipeline_mode<synchronous>, transform_indices = @transform_9, window_bounds = array<i64: 1, 1024>}, {pipeline_mode = #tpu.pipeline_mode<synchronous>, transform_indices = @transform_10, window_bounds = array<i64: 1024, 256>}, {pipeline_mode = #tpu.pipeline_mode<synchronous>, transform_indices = @transform_11, window_bounds = array<i64: 1, 256>}, {pipeline_mode = #tpu.pipeline_mode<synchronous>, transform_indices = @transform_12, window_bounds = array<i64: 1, 256>}, {pipeline_mode = #tpu.pipeline_mode<synchronous>, transform_indices = @transform_13, window_bounds = array<i64: 1, 256>}, {transform_indices = @transform_14, window_bounds = array<i64: 1, 8, 256>}]} {
    %c0 = arith.constant 0 : index
    %c0_0 = arith.constant 0 : index
    %c0_1 = arith.constant 0 : index
    %0 = vector.load %arg1[%c0, %c0_0, %c0_1] : memref<1x8x256xf32, #tpu.memory_space<vmem>>, vector<1x8x256xf32>
    %1 = vector.shape_cast %0 : vector<1x8x256xf32> to vector<8x256xf32>
    %c0_2 = arith.constant 0 : index
    %c0_3 = arith.constant 0 : index
    %2 = vector.load %arg3[%c0_2, %c0_3] : memref<256x768xf32, #tpu.memory_space<vmem>>, vector<256x768xf32>
    %cst = arith.constant dense<0.000000e+00> : vector<8x768xf32>
    %3 = tpu.matmul %1, %2, %cst {dimension_numbers = #tpu.dot_dimension_numbers<[1], [0], [0], [1], [0, 0, 1, 1], [], []>} : vector<8x256xf32>, vector<256x768xf32>, vector<8x768xf32> -> vector<8x768xf32>
    %c0_4 = arith.constant 0 : index
    %c0_5 = arith.constant 0 : index
    %4 = vector.load %arg4[%c0_4, %c0_5] : memref<1x768xf32, #tpu.memory_space<vmem>>, vector<1x768xf32>
    %5 = vector.broadcast %4 : vector<1x768xf32> to vector<8x768xf32>
    %6 = arith.addf %3, %5 : vector<8x768xf32>
    %7 = vector.extract_strided_slice %6 {offsets = [0, 0], sizes = [8, 256], strides = [1, 1]} : vector<8x768xf32> to vector<8x256xf32>
    %cst_6 = arith.constant 0.176776692 : f32
    %8 = vector.broadcast %cst_6 : f32 to vector<8x256xf32>
    %9 = arith.mulf %7, %8 : vector<8x256xf32>
    %10 = vector.extract_strided_slice %6 {offsets = [0, 256], sizes = [8, 256], strides = [1, 1]} : vector<8x768xf32> to vector<8x256xf32>
    %11 = vector.extract_strided_slice %6 {offsets = [0, 512], sizes = [8, 256], strides = [1, 1]} : vector<8x768xf32> to vector<8x256xf32>
    %c0_7 = arith.constant 0 : index
    %c0_8 = arith.constant 0 : index
    %c0_9 = arith.constant 0 : index
    %12 = vector.load %arg2[%c0_7, %c0_8, %c0_9] : memref<1x1x8xf32, #tpu.memory_space<vmem>>, vector<1x1x8xf32>
    %13 = vector.shape_cast %12 : vector<1x1x8xf32> to vector<1x8xf32>
    %cst_10 = arith.constant 0.000000e+00 : f32
    %14 = vector.broadcast %cst_10 : f32 to vector<8x256xf32>
    %15 = vector.extract_strided_slice %9 {offsets = [0, 0], sizes = [8, 32], strides = [1, 1]} : vector<8x256xf32> to vector<8x32xf32>
    %16 = vector.extract_strided_slice %10 {offsets = [0, 0], sizes = [8, 32], strides = [1, 1]} : vector<8x256xf32> to vector<8x32xf32>
    %17 = vector.extract_strided_slice %11 {offsets = [0, 0], sizes = [8, 32], strides = [1, 1]} : vector<8x256xf32> to vector<8x32xf32>
    %cst_11 = arith.constant dense<0.000000e+00> : vector<8x8xf32>
    %18 = tpu.matmul %15, %16, %cst_11 {dimension_numbers = #tpu.dot_dimension_numbers<[1], [1], [0], [0], [0, 0, 1, 0], [], []>} : vector<8x32xf32>, vector<8x32xf32>, vector<8x8xf32> -> vector<8x8xf32>
    %19 = vector.broadcast %13 : vector<1x8xf32> to vector<8x8xf32>
    %20 = arith.addf %18, %19 : vector<8x8xf32>
    %cst_12 = arith.constant dense<0xFF800000> : vector<8xf32>
    %21 = vector.multi_reduction <maximumf>, %20, %cst_12 [1] : vector<8x8xf32> to vector<8xf32>
    %22 = vector.shape_cast %21 : vector<8xf32> to vector<8x1xf32>
    %23 = vector.broadcast %22 : vector<8x1xf32> to vector<8x8xf32>
    %24 = arith.subf %20, %23 : vector<8x8xf32>
    %25 = math.exp %24 : vector<8x8xf32>
    %cst_13 = arith.constant dense<0.000000e+00> : vector<8xf32>
    %26 = vector.multi_reduction <add>, %25, %cst_13 [1] : vector<8x8xf32> to vector<8xf32>
    %27 = vector.shape_cast %26 : vector<8xf32> to vector<8x1xf32>
    %28 = vector.broadcast %27 : vector<8x1xf32> to vector<8x8xf32>
    %29 = arith.divf %25, %28 : vector<8x8xf32>
    %cst_14 = arith.constant dense<0.000000e+00> : vector<8x32xf32>
    %30 = tpu.matmul %29, %17, %cst_14 {dimension_numbers = #tpu.dot_dimension_numbers<[1], [0], [0], [1], [0, 0, 1, 1], [], []>} : vector<8x8xf32>, vector<8x32xf32>, vector<8x32xf32> -> vector<8x32xf32>
    %c0_15 = arith.constant 0 : index
    %c0_16 = arith.constant 0 : index
    %31 = vector.load %arg5[%c0_15, %c0_16] : memref<256x256xf32, #tpu.memory_space<vmem>>, vector<32x256xf32>
    %cst_17 = arith.constant dense<0.000000e+00> : vector<8x256xf32>
    %32 = tpu.matmul %30, %31, %cst_17 {dimension_numbers = #tpu.dot_dimension_numbers<[1], [0], [0], [1], [0, 0, 1, 1], [], []>} : vector<8x32xf32>, vector<32x256xf32>, vector<8x256xf32> -> vector<8x256xf32>
    %33 = arith.addf %14, %32 : vector<8x256xf32>
    %34 = vector.extract_strided_slice %9 {offsets = [0, 32], sizes = [8, 32], strides = [1, 1]} : vector<8x256xf32> to vector<8x32xf32>
    %35 = vector.extract_strided_slice %10 {offsets = [0, 32], sizes = [8, 32], strides = [1, 1]} : vector<8x256xf32> to vector<8x32xf32>
    %36 = vector.extract_strided_slice %11 {offsets = [0, 32], sizes = [8, 32], strides = [1, 1]} : vector<8x256xf32> to vector<8x32xf32>
    %cst_18 = arith.constant dense<0.000000e+00> : vector<8x8xf32>
    %37 = tpu.matmul %34, %35, %cst_18 {dimension_numbers = #tpu.dot_dimension_numbers<[1], [1], [0], [0], [0, 0, 1, 0], [], []>} : vector<8x32xf32>, vector<8x32xf32>, vector<8x8xf32> -> vector<8x8xf32>
    %38 = vector.broadcast %13 : vector<1x8xf32> to vector<8x8xf32>
    %39 = arith.addf %37, %38 : vector<8x8xf32>
    %cst_19 = arith.constant dense<0xFF800000> : vector<8xf32>
    %40 = vector.multi_reduction <maximumf>, %39, %cst_19 [1] : vector<8x8xf32> to vector<8xf32>
    %41 = vector.shape_cast %40 : vector<8xf32> to vector<8x1xf32>
    %42 = vector.broadcast %41 : vector<8x1xf32> to vector<8x8xf32>
    %43 = arith.subf %39, %42 : vector<8x8xf32>
    %44 = math.exp %43 : vector<8x8xf32>
    %cst_20 = arith.constant dense<0.000000e+00> : vector<8xf32>
    %45 = vector.multi_reduction <add>, %44, %cst_20 [1] : vector<8x8xf32> to vector<8xf32>
    %46 = vector.shape_cast %45 : vector<8xf32> to vector<8x1xf32>
    %47 = vector.broadcast %46 : vector<8x1xf32> to vector<8x8xf32>
    %48 = arith.divf %44, %47 : vector<8x8xf32>
    %cst_21 = arith.constant dense<0.000000e+00> : vector<8x32xf32>
    %49 = tpu.matmul %48, %36, %cst_21 {dimension_numbers = #tpu.dot_dimension_numbers<[1], [0], [0], [1], [0, 0, 1, 1], [], []>} : vector<8x8xf32>, vector<8x32xf32>, vector<8x32xf32> -> vector<8x32xf32>
    %c32 = arith.constant 32 : index
    %c0_22 = arith.constant 0 : index
    %50 = vector.load %arg5[%c32, %c0_22] : memref<256x256xf32, #tpu.memory_space<vmem>>, vector<32x256xf32>
    %cst_23 = arith.constant dense<0.000000e+00> : vector<8x256xf32>
    %51 = tpu.matmul %49, %50, %cst_23 {dimension_numbers = #tpu.dot_dimension_numbers<[1], [0], [0], [1], [0, 0, 1, 1], [], []>} : vector<8x32xf32>, vector<32x256xf32>, vector<8x256xf32> -> vector<8x256xf32>
    %52 = arith.addf %33, %51 : vector<8x256xf32>
    %53 = vector.extract_strided_slice %9 {offsets = [0, 64], sizes = [8, 32], strides = [1, 1]} : vector<8x256xf32> to vector<8x32xf32>
    %54 = vector.extract_strided_slice %10 {offsets = [0, 64], sizes = [8, 32], strides = [1, 1]} : vector<8x256xf32> to vector<8x32xf32>
    %55 = vector.extract_strided_slice %11 {offsets = [0, 64], sizes = [8, 32], strides = [1, 1]} : vector<8x256xf32> to vector<8x32xf32>
    %cst_24 = arith.constant dense<0.000000e+00> : vector<8x8xf32>
    %56 = tpu.matmul %53, %54, %cst_24 {dimension_numbers = #tpu.dot_dimension_numbers<[1], [1], [0], [0], [0, 0, 1, 0], [], []>} : vector<8x32xf32>, vector<8x32xf32>, vector<8x8xf32> -> vector<8x8xf32>
    %57 = vector.broadcast %13 : vector<1x8xf32> to vector<8x8xf32>
    %58 = arith.addf %56, %57 : vector<8x8xf32>
    %cst_25 = arith.constant dense<0xFF800000> : vector<8xf32>
    %59 = vector.multi_reduction <maximumf>, %58, %cst_25 [1] : vector<8x8xf32> to vector<8xf32>
    %60 = vector.shape_cast %59 : vector<8xf32> to vector<8x1xf32>
    %61 = vector.broadcast %60 : vector<8x1xf32> to vector<8x8xf32>
    %62 = arith.subf %58, %61 : vector<8x8xf32>
    %63 = math.exp %62 : vector<8x8xf32>
    %cst_26 = arith.constant dense<0.000000e+00> : vector<8xf32>
    %64 = vector.multi_reduction <add>, %63, %cst_26 [1] : vector<8x8xf32> to vector<8xf32>
    %65 = vector.shape_cast %64 : vector<8xf32> to vector<8x1xf32>
    %66 = vector.broadcast %65 : vector<8x1xf32> to vector<8x8xf32>
    %67 = arith.divf %63, %66 : vector<8x8xf32>
    %cst_27 = arith.constant dense<0.000000e+00> : vector<8x32xf32>
    %68 = tpu.matmul %67, %55, %cst_27 {dimension_numbers = #tpu.dot_dimension_numbers<[1], [0], [0], [1], [0, 0, 1, 1], [], []>} : vector<8x8xf32>, vector<8x32xf32>, vector<8x32xf32> -> vector<8x32xf32>
    %c64 = arith.constant 64 : index
    %c0_28 = arith.constant 0 : index
    %69 = vector.load %arg5[%c64, %c0_28] : memref<256x256xf32, #tpu.memory_space<vmem>>, vector<32x256xf32>
    %cst_29 = arith.constant dense<0.000000e+00> : vector<8x256xf32>
    %70 = tpu.matmul %68, %69, %cst_29 {dimension_numbers = #tpu.dot_dimension_numbers<[1], [0], [0], [1], [0, 0, 1, 1], [], []>} : vector<8x32xf32>, vector<32x256xf32>, vector<8x256xf32> -> vector<8x256xf32>
    %71 = arith.addf %52, %70 : vector<8x256xf32>
    %72 = vector.extract_strided_slice %9 {offsets = [0, 96], sizes = [8, 32], strides = [1, 1]} : vector<8x256xf32> to vector<8x32xf32>
    %73 = vector.extract_strided_slice %10 {offsets = [0, 96], sizes = [8, 32], strides = [1, 1]} : vector<8x256xf32> to vector<8x32xf32>
    %74 = vector.extract_strided_slice %11 {offsets = [0, 96], sizes = [8, 32], strides = [1, 1]} : vector<8x256xf32> to vector<8x32xf32>
    %cst_30 = arith.constant dense<0.000000e+00> : vector<8x8xf32>
    %75 = tpu.matmul %72, %73, %cst_30 {dimension_numbers = #tpu.dot_dimension_numbers<[1], [1], [0], [0], [0, 0, 1, 0], [], []>} : vector<8x32xf32>, vector<8x32xf32>, vector<8x8xf32> -> vector<8x8xf32>
    %76 = vector.broadcast %13 : vector<1x8xf32> to vector<8x8xf32>
    %77 = arith.addf %75, %76 : vector<8x8xf32>
    %cst_31 = arith.constant dense<0xFF800000> : vector<8xf32>
    %78 = vector.multi_reduction <maximumf>, %77, %cst_31 [1] : vector<8x8xf32> to vector<8xf32>
    %79 = vector.shape_cast %78 : vector<8xf32> to vector<8x1xf32>
    %80 = vector.broadcast %79 : vector<8x1xf32> to vector<8x8xf32>
    %81 = arith.subf %77, %80 : vector<8x8xf32>
    %82 = math.exp %81 : vector<8x8xf32>
    %cst_32 = arith.constant dense<0.000000e+00> : vector<8xf32>
    %83 = vector.multi_reduction <add>, %82, %cst_32 [1] : vector<8x8xf32> to vector<8xf32>
    %84 = vector.shape_cast %83 : vector<8xf32> to vector<8x1xf32>
    %85 = vector.broadcast %84 : vector<8x1xf32> to vector<8x8xf32>
    %86 = arith.divf %82, %85 : vector<8x8xf32>
    %cst_33 = arith.constant dense<0.000000e+00> : vector<8x32xf32>
    %87 = tpu.matmul %86, %74, %cst_33 {dimension_numbers = #tpu.dot_dimension_numbers<[1], [0], [0], [1], [0, 0, 1, 1], [], []>} : vector<8x8xf32>, vector<8x32xf32>, vector<8x32xf32> -> vector<8x32xf32>
    %c96 = arith.constant 96 : index
    %c0_34 = arith.constant 0 : index
    %88 = vector.load %arg5[%c96, %c0_34] : memref<256x256xf32, #tpu.memory_space<vmem>>, vector<32x256xf32>
    %cst_35 = arith.constant dense<0.000000e+00> : vector<8x256xf32>
    %89 = tpu.matmul %87, %88, %cst_35 {dimension_numbers = #tpu.dot_dimension_numbers<[1], [0], [0], [1], [0, 0, 1, 1], [], []>} : vector<8x32xf32>, vector<32x256xf32>, vector<8x256xf32> -> vector<8x256xf32>
    %90 = arith.addf %71, %89 : vector<8x256xf32>
    %91 = vector.extract_strided_slice %9 {offsets = [0, 128], sizes = [8, 32], strides = [1, 1]} : vector<8x256xf32> to vector<8x32xf32>
    %92 = vector.extract_strided_slice %10 {offsets = [0, 128], sizes = [8, 32], strides = [1, 1]} : vector<8x256xf32> to vector<8x32xf32>
    %93 = vector.extract_strided_slice %11 {offsets = [0, 128], sizes = [8, 32], strides = [1, 1]} : vector<8x256xf32> to vector<8x32xf32>
    %cst_36 = arith.constant dense<0.000000e+00> : vector<8x8xf32>
    %94 = tpu.matmul %91, %92, %cst_36 {dimension_numbers = #tpu.dot_dimension_numbers<[1], [1], [0], [0], [0, 0, 1, 0], [], []>} : vector<8x32xf32>, vector<8x32xf32>, vector<8x8xf32> -> vector<8x8xf32>
    %95 = vector.broadcast %13 : vector<1x8xf32> to vector<8x8xf32>
    %96 = arith.addf %94, %95 : vector<8x8xf32>
    %cst_37 = arith.constant dense<0xFF800000> : vector<8xf32>
    %97 = vector.multi_reduction <maximumf>, %96, %cst_37 [1] : vector<8x8xf32> to vector<8xf32>
    %98 = vector.shape_cast %97 : vector<8xf32> to vector<8x1xf32>
    %99 = vector.broadcast %98 : vector<8x1xf32> to vector<8x8xf32>
    %100 = arith.subf %96, %99 : vector<8x8xf32>
    %101 = math.exp %100 : vector<8x8xf32>
    %cst_38 = arith.constant dense<0.000000e+00> : vector<8xf32>
    %102 = vector.multi_reduction <add>, %101, %cst_38 [1] : vector<8x8xf32> to vector<8xf32>
    %103 = vector.shape_cast %102 : vector<8xf32> to vector<8x1xf32>
    %104 = vector.broadcast %103 : vector<8x1xf32> to vector<8x8xf32>
    %105 = arith.divf %101, %104 : vector<8x8xf32>
    %cst_39 = arith.constant dense<0.000000e+00> : vector<8x32xf32>
    %106 = tpu.matmul %105, %93, %cst_39 {dimension_numbers = #tpu.dot_dimension_numbers<[1], [0], [0], [1], [0, 0, 1, 1], [], []>} : vector<8x8xf32>, vector<8x32xf32>, vector<8x32xf32> -> vector<8x32xf32>
    %c128 = arith.constant 128 : index
    %c0_40 = arith.constant 0 : index
    %107 = vector.load %arg5[%c128, %c0_40] : memref<256x256xf32, #tpu.memory_space<vmem>>, vector<32x256xf32>
    %cst_41 = arith.constant dense<0.000000e+00> : vector<8x256xf32>
    %108 = tpu.matmul %106, %107, %cst_41 {dimension_numbers = #tpu.dot_dimension_numbers<[1], [0], [0], [1], [0, 0, 1, 1], [], []>} : vector<8x32xf32>, vector<32x256xf32>, vector<8x256xf32> -> vector<8x256xf32>
    %109 = arith.addf %90, %108 : vector<8x256xf32>
    %110 = vector.extract_strided_slice %9 {offsets = [0, 160], sizes = [8, 32], strides = [1, 1]} : vector<8x256xf32> to vector<8x32xf32>
    %111 = vector.extract_strided_slice %10 {offsets = [0, 160], sizes = [8, 32], strides = [1, 1]} : vector<8x256xf32> to vector<8x32xf32>
    %112 = vector.extract_strided_slice %11 {offsets = [0, 160], sizes = [8, 32], strides = [1, 1]} : vector<8x256xf32> to vector<8x32xf32>
    %cst_42 = arith.constant dense<0.000000e+00> : vector<8x8xf32>
    %113 = tpu.matmul %110, %111, %cst_42 {dimension_numbers = #tpu.dot_dimension_numbers<[1], [1], [0], [0], [0, 0, 1, 0], [], []>} : vector<8x32xf32>, vector<8x32xf32>, vector<8x8xf32> -> vector<8x8xf32>
    %114 = vector.broadcast %13 : vector<1x8xf32> to vector<8x8xf32>
    %115 = arith.addf %113, %114 : vector<8x8xf32>
    %cst_43 = arith.constant dense<0xFF800000> : vector<8xf32>
    %116 = vector.multi_reduction <maximumf>, %115, %cst_43 [1] : vector<8x8xf32> to vector<8xf32>
    %117 = vector.shape_cast %116 : vector<8xf32> to vector<8x1xf32>
    %118 = vector.broadcast %117 : vector<8x1xf32> to vector<8x8xf32>
    %119 = arith.subf %115, %118 : vector<8x8xf32>
    %120 = math.exp %119 : vector<8x8xf32>
    %cst_44 = arith.constant dense<0.000000e+00> : vector<8xf32>
    %121 = vector.multi_reduction <add>, %120, %cst_44 [1] : vector<8x8xf32> to vector<8xf32>
    %122 = vector.shape_cast %121 : vector<8xf32> to vector<8x1xf32>
    %123 = vector.broadcast %122 : vector<8x1xf32> to vector<8x8xf32>
    %124 = arith.divf %120, %123 : vector<8x8xf32>
    %cst_45 = arith.constant dense<0.000000e+00> : vector<8x32xf32>
    %125 = tpu.matmul %124, %112, %cst_45 {dimension_numbers = #tpu.dot_dimension_numbers<[1], [0], [0], [1], [0, 0, 1, 1], [], []>} : vector<8x8xf32>, vector<8x32xf32>, vector<8x32xf32> -> vector<8x32xf32>
    %c160 = arith.constant 160 : index
    %c0_46 = arith.constant 0 : index
    %126 = vector.load %arg5[%c160, %c0_46] : memref<256x256xf32, #tpu.memory_space<vmem>>, vector<32x256xf32>
    %cst_47 = arith.constant dense<0.000000e+00> : vector<8x256xf32>
    %127 = tpu.matmul %125, %126, %cst_47 {dimension_numbers = #tpu.dot_dimension_numbers<[1], [0], [0], [1], [0, 0, 1, 1], [], []>} : vector<8x32xf32>, vector<32x256xf32>, vector<8x256xf32> -> vector<8x256xf32>
    %128 = arith.addf %109, %127 : vector<8x256xf32>
    %129 = vector.extract_strided_slice %9 {offsets = [0, 192], sizes = [8, 32], strides = [1, 1]} : vector<8x256xf32> to vector<8x32xf32>
    %130 = vector.extract_strided_slice %10 {offsets = [0, 192], sizes = [8, 32], strides = [1, 1]} : vector<8x256xf32> to vector<8x32xf32>
    %131 = vector.extract_strided_slice %11 {offsets = [0, 192], sizes = [8, 32], strides = [1, 1]} : vector<8x256xf32> to vector<8x32xf32>
    %cst_48 = arith.constant dense<0.000000e+00> : vector<8x8xf32>
    %132 = tpu.matmul %129, %130, %cst_48 {dimension_numbers = #tpu.dot_dimension_numbers<[1], [1], [0], [0], [0, 0, 1, 0], [], []>} : vector<8x32xf32>, vector<8x32xf32>, vector<8x8xf32> -> vector<8x8xf32>
    %133 = vector.broadcast %13 : vector<1x8xf32> to vector<8x8xf32>
    %134 = arith.addf %132, %133 : vector<8x8xf32>
    %cst_49 = arith.constant dense<0xFF800000> : vector<8xf32>
    %135 = vector.multi_reduction <maximumf>, %134, %cst_49 [1] : vector<8x8xf32> to vector<8xf32>
    %136 = vector.shape_cast %135 : vector<8xf32> to vector<8x1xf32>
    %137 = vector.broadcast %136 : vector<8x1xf32> to vector<8x8xf32>
    %138 = arith.subf %134, %137 : vector<8x8xf32>
    %139 = math.exp %138 : vector<8x8xf32>
    %cst_50 = arith.constant dense<0.000000e+00> : vector<8xf32>
    %140 = vector.multi_reduction <add>, %139, %cst_50 [1] : vector<8x8xf32> to vector<8xf32>
    %141 = vector.shape_cast %140 : vector<8xf32> to vector<8x1xf32>
    %142 = vector.broadcast %141 : vector<8x1xf32> to vector<8x8xf32>
    %143 = arith.divf %139, %142 : vector<8x8xf32>
    %cst_51 = arith.constant dense<0.000000e+00> : vector<8x32xf32>
    %144 = tpu.matmul %143, %131, %cst_51 {dimension_numbers = #tpu.dot_dimension_numbers<[1], [0], [0], [1], [0, 0, 1, 1], [], []>} : vector<8x8xf32>, vector<8x32xf32>, vector<8x32xf32> -> vector<8x32xf32>
    %c192 = arith.constant 192 : index
    %c0_52 = arith.constant 0 : index
    %145 = vector.load %arg5[%c192, %c0_52] : memref<256x256xf32, #tpu.memory_space<vmem>>, vector<32x256xf32>
    %cst_53 = arith.constant dense<0.000000e+00> : vector<8x256xf32>
    %146 = tpu.matmul %144, %145, %cst_53 {dimension_numbers = #tpu.dot_dimension_numbers<[1], [0], [0], [1], [0, 0, 1, 1], [], []>} : vector<8x32xf32>, vector<32x256xf32>, vector<8x256xf32> -> vector<8x256xf32>
    %147 = arith.addf %128, %146 : vector<8x256xf32>
    %148 = vector.extract_strided_slice %9 {offsets = [0, 224], sizes = [8, 32], strides = [1, 1]} : vector<8x256xf32> to vector<8x32xf32>
    %149 = vector.extract_strided_slice %10 {offsets = [0, 224], sizes = [8, 32], strides = [1, 1]} : vector<8x256xf32> to vector<8x32xf32>
    %150 = vector.extract_strided_slice %11 {offsets = [0, 224], sizes = [8, 32], strides = [1, 1]} : vector<8x256xf32> to vector<8x32xf32>
    %cst_54 = arith.constant dense<0.000000e+00> : vector<8x8xf32>
    %151 = tpu.matmul %148, %149, %cst_54 {dimension_numbers = #tpu.dot_dimension_numbers<[1], [1], [0], [0], [0, 0, 1, 0], [], []>} : vector<8x32xf32>, vector<8x32xf32>, vector<8x8xf32> -> vector<8x8xf32>
    %152 = vector.broadcast %13 : vector<1x8xf32> to vector<8x8xf32>
    %153 = arith.addf %151, %152 : vector<8x8xf32>
    %cst_55 = arith.constant dense<0xFF800000> : vector<8xf32>
    %154 = vector.multi_reduction <maximumf>, %153, %cst_55 [1] : vector<8x8xf32> to vector<8xf32>
    %155 = vector.shape_cast %154 : vector<8xf32> to vector<8x1xf32>
    %156 = vector.broadcast %155 : vector<8x1xf32> to vector<8x8xf32>
    %157 = arith.subf %153, %156 : vector<8x8xf32>
    %158 = math.exp %157 : vector<8x8xf32>
    %cst_56 = arith.constant dense<0.000000e+00> : vector<8xf32>
    %159 = vector.multi_reduction <add>, %158, %cst_56 [1] : vector<8x8xf32> to vector<8xf32>
    %160 = vector.shape_cast %159 : vector<8xf32> to vector<8x1xf32>
    %161 = vector.broadcast %160 : vector<8x1xf32> to vector<8x8xf32>
    %162 = arith.divf %158, %161 : vector<8x8xf32>
    %cst_57 = arith.constant dense<0.000000e+00> : vector<8x32xf32>
    %163 = tpu.matmul %162, %150, %cst_57 {dimension_numbers = #tpu.dot_dimension_numbers<[1], [0], [0], [1], [0, 0, 1, 1], [], []>} : vector<8x8xf32>, vector<8x32xf32>, vector<8x32xf32> -> vector<8x32xf32>
    %c224 = arith.constant 224 : index
    %c0_58 = arith.constant 0 : index
    %164 = vector.load %arg5[%c224, %c0_58] : memref<256x256xf32, #tpu.memory_space<vmem>>, vector<32x256xf32>
    %cst_59 = arith.constant dense<0.000000e+00> : vector<8x256xf32>
    %165 = tpu.matmul %163, %164, %cst_59 {dimension_numbers = #tpu.dot_dimension_numbers<[1], [0], [0], [1], [0, 0, 1, 1], [], []>} : vector<8x32xf32>, vector<32x256xf32>, vector<8x256xf32> -> vector<8x256xf32>
    %166 = arith.addf %147, %165 : vector<8x256xf32>
    %c0_60 = arith.constant 0 : index
    %c0_61 = arith.constant 0 : index
    %167 = vector.load %arg6[%c0_60, %c0_61] : memref<1x256xf32, #tpu.memory_space<vmem>>, vector<1x256xf32>
    %168 = vector.broadcast %167 : vector<1x256xf32> to vector<8x256xf32>
    %169 = arith.addf %166, %168 : vector<8x256xf32>
    %170 = arith.addf %169, %1 : vector<8x256xf32>
    %c0_62 = arith.constant 0 : index
    %c0_63 = arith.constant 0 : index
    %171 = vector.load %arg7[%c0_62, %c0_63] : memref<1x256xf32, #tpu.memory_space<vmem>>, vector<1x256xf32>
    %c0_64 = arith.constant 0 : index
    %c0_65 = arith.constant 0 : index
    %172 = vector.load %arg8[%c0_64, %c0_65] : memref<1x256xf32, #tpu.memory_space<vmem>>, vector<1x256xf32>
    %cst_66 = arith.constant dense<0.000000e+00> : vector<8xf32>
    %173 = vector.multi_reduction <add>, %170, %cst_66 [1] : vector<8x256xf32> to vector<8xf32>
    %174 = vector.shape_cast %173 : vector<8xf32> to vector<8x1xf32>
    %cst_67 = arith.constant 2.560000e+02 : f32
    %175 = vector.broadcast %cst_67 : f32 to vector<8x1xf32>
    %176 = arith.divf %174, %175 : vector<8x1xf32>
    %177 = vector.broadcast %176 : vector<8x1xf32> to vector<8x256xf32>
    %178 = arith.subf %170, %177 : vector<8x256xf32>
    %179 = arith.mulf %178, %178 : vector<8x256xf32>
    %cst_68 = arith.constant dense<0.000000e+00> : vector<8xf32>
    %180 = vector.multi_reduction <add>, %179, %cst_68 [1] : vector<8x256xf32> to vector<8xf32>
    %181 = vector.shape_cast %180 : vector<8xf32> to vector<8x1xf32>
    %cst_69 = arith.constant 2.560000e+02 : f32
    %182 = vector.broadcast %cst_69 : f32 to vector<8x1xf32>
    %183 = arith.divf %181, %182 : vector<8x1xf32>
    %cst_70 = arith.constant 9.99999974E-6 : f32
    %184 = vector.broadcast %cst_70 : f32 to vector<8x1xf32>
    %185 = arith.addf %183, %184 : vector<8x1xf32>
    %186 = math.rsqrt %185 : vector<8x1xf32>
    %187 = vector.broadcast %186 : vector<8x1xf32> to vector<8x256xf32>
    %188 = arith.mulf %178, %187 : vector<8x256xf32>
    %189 = vector.broadcast %171 : vector<1x256xf32> to vector<8x256xf32>
    %190 = arith.mulf %188, %189 : vector<8x256xf32>
    %191 = vector.broadcast %172 : vector<1x256xf32> to vector<8x256xf32>
    %192 = arith.addf %190, %191 : vector<8x256xf32>
    %c0_71 = arith.constant 0 : index
    %c0_72 = arith.constant 0 : index
    %193 = vector.load %arg9[%c0_71, %c0_72] : memref<256x1024xf32, #tpu.memory_space<vmem>>, vector<256x1024xf32>
    %cst_73 = arith.constant dense<0.000000e+00> : vector<8x1024xf32>
    %194 = tpu.matmul %192, %193, %cst_73 {dimension_numbers = #tpu.dot_dimension_numbers<[1], [0], [0], [1], [0, 0, 1, 1], [], []>} : vector<8x256xf32>, vector<256x1024xf32>, vector<8x1024xf32> -> vector<8x1024xf32>
    %c0_74 = arith.constant 0 : index
    %c0_75 = arith.constant 0 : index
    %195 = vector.load %arg10[%c0_74, %c0_75] : memref<1x1024xf32, #tpu.memory_space<vmem>>, vector<1x1024xf32>
    %196 = vector.broadcast %195 : vector<1x1024xf32> to vector<8x1024xf32>
    %197 = arith.addf %194, %196 : vector<8x1024xf32>
    %cst_76 = arith.constant 5.000000e-01 : f32
    %198 = vector.broadcast %cst_76 : f32 to vector<8x1024xf32>
    %199 = arith.mulf %198, %197 : vector<8x1024xf32>
    %cst_77 = arith.constant 4.471500e-02 : f32
    %200 = vector.broadcast %cst_77 : f32 to vector<8x1024xf32>
    %201 = arith.mulf %200, %197 : vector<8x1024xf32>
    %202 = arith.mulf %201, %197 : vector<8x1024xf32>
    %203 = arith.mulf %202, %197 : vector<8x1024xf32>
    %204 = arith.addf %197, %203 : vector<8x1024xf32>
    %cst_78 = arith.constant 0.797884583 : f32
    %205 = vector.broadcast %cst_78 : f32 to vector<8x1024xf32>
    %206 = arith.mulf %205, %204 : vector<8x1024xf32>
    %207 = math.tanh %206 : vector<8x1024xf32>
    %cst_79 = arith.constant 1.000000e+00 : f32
    %208 = vector.broadcast %cst_79 : f32 to vector<8x1024xf32>
    %209 = arith.addf %208, %207 : vector<8x1024xf32>
    %210 = arith.mulf %199, %209 : vector<8x1024xf32>
    %c0_80 = arith.constant 0 : index
    %c0_81 = arith.constant 0 : index
    %211 = vector.load %arg11[%c0_80, %c0_81] : memref<1024x256xf32, #tpu.memory_space<vmem>>, vector<1024x256xf32>
    %cst_82 = arith.constant dense<0.000000e+00> : vector<8x256xf32>
    %212 = tpu.matmul %210, %211, %cst_82 {dimension_numbers = #tpu.dot_dimension_numbers<[1], [0], [0], [1], [0, 0, 1, 1], [], []>} : vector<8x1024xf32>, vector<1024x256xf32>, vector<8x256xf32> -> vector<8x256xf32>
    %c0_83 = arith.constant 0 : index
    %c0_84 = arith.constant 0 : index
    %213 = vector.load %arg12[%c0_83, %c0_84] : memref<1x256xf32, #tpu.memory_space<vmem>>, vector<1x256xf32>
    %214 = vector.broadcast %213 : vector<1x256xf32> to vector<8x256xf32>
    %215 = arith.addf %212, %214 : vector<8x256xf32>
    %216 = arith.addf %215, %192 : vector<8x256xf32>
    %c0_85 = arith.constant 0 : index
    %c0_86 = arith.constant 0 : index
    %217 = vector.load %arg13[%c0_85, %c0_86] : memref<1x256xf32, #tpu.memory_space<vmem>>, vector<1x256xf32>
    %c0_87 = arith.constant 0 : index
    %c0_88 = arith.constant 0 : index
    %218 = vector.load %arg14[%c0_87, %c0_88] : memref<1x256xf32, #tpu.memory_space<vmem>>, vector<1x256xf32>
    %cst_89 = arith.constant dense<0.000000e+00> : vector<8xf32>
    %219 = vector.multi_reduction <add>, %216, %cst_89 [1] : vector<8x256xf32> to vector<8xf32>
    %220 = vector.shape_cast %219 : vector<8xf32> to vector<8x1xf32>
    %cst_90 = arith.constant 2.560000e+02 : f32
    %221 = vector.broadcast %cst_90 : f32 to vector<8x1xf32>
    %222 = arith.divf %220, %221 : vector<8x1xf32>
    %223 = vector.broadcast %222 : vector<8x1xf32> to vector<8x256xf32>
    %224 = arith.subf %216, %223 : vector<8x256xf32>
    %225 = arith.mulf %224, %224 : vector<8x256xf32>
    %cst_91 = arith.constant dense<0.000000e+00> : vector<8xf32>
    %226 = vector.multi_reduction <add>, %225, %cst_91 [1] : vector<8x256xf32> to vector<8xf32>
    %227 = vector.shape_cast %226 : vector<8xf32> to vector<8x1xf32>
    %cst_92 = arith.constant 2.560000e+02 : f32
    %228 = vector.broadcast %cst_92 : f32 to vector<8x1xf32>
    %229 = arith.divf %227, %228 : vector<8x1xf32>
    %cst_93 = arith.constant 9.99999974E-6 : f32
    %230 = vector.broadcast %cst_93 : f32 to vector<8x1xf32>
    %231 = arith.addf %229, %230 : vector<8x1xf32>
    %232 = math.rsqrt %231 : vector<8x1xf32>
    %233 = vector.broadcast %232 : vector<8x1xf32> to vector<8x256xf32>
    %234 = arith.mulf %224, %233 : vector<8x256xf32>
    %235 = vector.broadcast %217 : vector<1x256xf32> to vector<8x256xf32>
    %236 = arith.mulf %234, %235 : vector<8x256xf32>
    %237 = vector.broadcast %218 : vector<1x256xf32> to vector<8x256xf32>
    %238 = arith.addf %236, %237 : vector<8x256xf32>
    %c0_94 = arith.constant 0 : index
    %c0_95 = arith.constant 0 : index
    %c0_96 = arith.constant 0 : index
    %239 = vector.load %arg15[%c0_94, %c0_95, %c0_96] : memref<1x8x256xf32, #tpu.memory_space<vmem>>, vector<1x8x256xf32>
    %240 = vector.shape_cast %239 : vector<1x8x256xf32> to vector<8x256xf32>
    %241 = vector.shape_cast %238 : vector<8x256xf32> to vector<1x8x256xf32>
    tpu.vector_store %arg15[%c0_94, %c0_95, %c0_96], %241 {strides = array<i32>} : memref<1x8x256xf32, #tpu.memory_space<vmem>>, vector<1x8x256xf32>,
    return
  }
  func.func @transform_0(%arg0: i32) -> (i32, i32, i32) {
    %c0_i32 = arith.constant 0 : i32
    %c0_i32_0 = arith.constant 0 : i32
    %c0_i32_1 = arith.constant 0 : i32
    return %arg0, %c0_i32, %c0_i32_0 : i32, i32, i32
  }
  func.func @transform_1(%arg0: i32) -> (i32, i32, i32) {
    %c0_i32 = arith.constant 0 : i32
    %c0_i32_0 = arith.constant 0 : i32
    %c0_i32_1 = arith.constant 0 : i32
    return %arg0, %c0_i32, %c0_i32_0 : i32, i32, i32
  }
  func.func @transform_2(%arg0: i32) -> (i32, i32) {
    %c0_i32 = arith.constant 0 : i32
    %c0_i32_0 = arith.constant 0 : i32
    %c0_i32_1 = arith.constant 0 : i32
    return %c0_i32, %c0_i32_0 : i32, i32
  }
  func.func @transform_3(%arg0: i32) -> (i32, i32) {
    %c0_i32 = arith.constant 0 : i32
    %c0_i32_0 = arith.constant 0 : i32
    %c0_i32_1 = arith.constant 0 : i32
    return %c0_i32, %c0_i32_0 : i32, i32
  }
  func.func @transform_4(%arg0: i32) -> (i32, i32) {
    %c0_i32 = arith.constant 0 : i32
    %c0_i32_0 = arith.constant 0 : i32
    %c0_i32_1 = arith.constant 0 : i32
    return %c0_i32, %c0_i32_0 : i32, i32
  }
  func.func @transform_5(%arg0: i32) -> (i32, i32) {
    %c0_i32 = arith.constant 0 : i32
    %c0_i32_0 = arith.constant 0 : i32
    %c0_i32_1 = arith.constant 0 : i32
    return %c0_i32, %c0_i32_0 : i32, i32
  }
  func.func @transform_6(%arg0: i32) -> (i32, i32) {
    %c0_i32 = arith.constant 0 : i32
    %c0_i32_0 = arith.constant 0 : i32
    %c0_i32_1 = arith.constant 0 : i32
    return %c0_i32, %c0_i32_0 : i32, i32
  }
  func.func @transform_7(%arg0: i32) -> (i32, i32) {
    %c0_i32 = arith.constant 0 : i32
    %c0_i32_0 = arith.constant 0 : i32
    %c0_i32_1 = arith.constant 0 : i32
    return %c0_i32, %c0_i32_0 : i32, i32
  }
  func.func @transform_8(%arg0: i32) -> (i32, i32) {
    %c0_i32 = arith.constant 0 : i32
    %c0_i32_0 = arith.constant 0 : i32
    %c0_i32_1 = arith.constant 0 : i32
    return %c0_i32, %c0_i32_0 : i32, i32
  }
  func.func @transform_9(%arg0: i32) -> (i32, i32) {
    %c0_i32 = arith.constant 0 : i32
    %c0_i32_0 = arith.constant 0 : i32
    %c0_i32_1 = arith.constant 0 : i32
    return %c0_i32, %c0_i32_0 : i32, i32
  }
  func.func @transform_10(%arg0: i32) -> (i32, i32) {
    %c0_i32 = arith.constant 0 : i32
    %c0_i32_0 = arith.constant 0 : i32
    %c0_i32_1 = arith.constant 0 : i32
    return %c0_i32, %c0_i32_0 : i32, i32
  }
  func.func @transform_11(%arg0: i32) -> (i32, i32) {
    %c0_i32 = arith.constant 0 : i32
    %c0_i32_0 = arith.constant 0 : i32
    %c0_i32_1 = arith.constant 0 : i32
    return %c0_i32, %c0_i32_0 : i32, i32
  }
  func.func @transform_12(%arg0: i32) -> (i32, i32) {
    %c0_i32 = arith.constant 0 : i32
    %c0_i32_0 = arith.constant 0 : i32
    %c0_i32_1 = arith.constant 0 : i32
    return %c0_i32, %c0_i32_0 : i32, i32
  }
  func.func @transform_13(%arg0: i32) -> (i32, i32) {
    %c0_i32 = arith.constant 0 : i32
    %c0_i32_0 = arith.constant 0 : i32
    %c0_i32_1 = arith.constant 0 : i32
    return %c0_i32, %c0_i32_0 : i32, i32
  }
  func.func @transform_14(%arg0: i32) -> (i32, i32, i32) {
    %c0_i32 = arith.constant 0 : i32
    %c0_i32_0 = arith.constant 0 : i32
    %c0_i32_1 = arith.constant 0 : i32
    return %arg0, %c0_i32, %c0_i32_0 : i32, i32, i32
  }
}

</mosaic_0001>

<bundles_post_ra>
// kernel: tpu_custom_call.1
= control target key start
LH: loop header
LB: loop body
LE: loop exit
PB: predicated region body
PF: predicated region fallthrough
CT: control target
= control target key end

     0   :  { %s5067_s0 = inlined_call_operand.hbm [shape: f32[2,8,256], index: 0, kind: input, shape index: {}]   ;;  %s5068_s1 = inlined_call_operand.hbm [shape: f32[2,1,8], index: 1, kind: input, shape index: {}]   ;;  %s5069_s2 = inlined_call_operand.hbm [shape: f32[256,768], index: 2, kind: input, shape index: {}]   ;;  %s5070_s3 = inlined_call_operand.hbm [shape: f32[1,768], index: 3, kind: input, shape index: {}]   ;;  %s5071_s4 = inlined_call_operand.hbm [shape: f32[256,256], index: 4, kind: input, shape index: {}]   ;;  %s5072_s5 = inlined_call_operand.hbm [shape: f32[1,256], index: 5, kind: input, shape index: {}]   ;;  %s5073_s6 = inlined_call_operand.hbm [shape: f32[1,256], index: 6, kind: input, shape index: {}]   ;;  %s5074_s7 = inlined_call_operand.hbm [shape: f32[1,256], index: 7, kind: input, shape index: {}]   ;;  %s5075_s8 = inlined_call_operand.hbm [shape: f32[256,1024], index: 8, kind: input, shape index: {}]   ;;  %s5076_s9 = inlined_call_operand.vmem [shape: f32[1,1024], index: 9, kind: input, shape index: {}]   ;;  %s5077_s10 = inlined_call_operand.hbm [shape: f32[1024,256], index: 10, kind: input, shape index: {}]   ;;  %s5078_s11 = inlined_call_operand.vmem [shape: f32[1,256], index: 11, kind: input, shape index: {}]   ;;  %s5079_s12 = inlined_call_operand.hbm [shape: f32[1,256], index: 12, kind: input, shape index: {}]   ;;  %s5080_s13 = inlined_call_operand.vmem [shape: f32[1,256], index: 13, kind: input, shape index: {}]   ;;  %s5081_s14 = inlined_call_operand.hbm [shape: f32[2,8,256], index: 14, kind: output, shape index: {}]  }
   0x1   :  { %5083 = sst [smem:[#allocation29_spill]] %s5069_s2 }
   0x2   :  { %5084 = sst [smem:[#allocation30_spill]] %s5070_s3 }
   0x3   :  { %5085 = sst [smem:[#allocation31_spill]] %s5071_s4 }
   0x4   :  { %5086 = sst [smem:[#allocation32_spill]] %s5072_s5 }
   0x5   :  { %5087 = sst [smem:[#allocation33_spill]] %s5073_s6 }
   0x6   :  { %5088 = sst [smem:[#allocation34_spill]] %s5074_s7 }
   0x7   :  { %5089 = sst [smem:[#allocation35_spill]] %s5075_s8 }
   0x8   :  { %5090 = sst [smem:[#allocation36_spill]] %s5076_s9 }
   0x9   :  { %5091 = sst [smem:[#allocation37_spill]] %s5077_s10 }
   0xa   :  { %5092 = sst [smem:[#allocation38_spill]] %s5078_s11 }
   0xb   :  { %5093 = sst [smem:[#allocation39_spill]] %s5079_s12 }
   0xc   :  { %5094 = sst [smem:[#allocation40_spill]] %s5080_s13 }
   0xd   :  { %5095 = sst [smem:[#allocation41_spill]] %s5081_s14 }
   0xe   :  { %19 = vsyncpa [#allocation3], 0 }
   0xf   :  { %21 = vsyncpa [#allocation3 + $0x1], 0 }
  0x10   :  { %22 = vsyncpa [#allocation6], 0 }
  0x11   :  { %24 = vsyncpa [#allocation6 + $0x1], 0 }
  0x12   :  { %25 = vsyncpa [#allocation9], 0 }
  0x13   :  { %26 = vsyncpa [#allocation12], 0 }
  0x14   :  { %27 = vsyncpa [#allocation15], 0 }
  0x15   :  { %28 = vsyncpa [#allocation18], 0 }
  0x16   :  { %29 = vsyncpa [#allocation4], 0 }
  0x17   :  { %31 = vsyncpa [#allocation4 + $0x1], 0  ;;  %s4492_s29 = smov 0   ;;  %s4494_s30 = smov 0  }
  0x18   :  { %s4496_s15 = smov 0   ;;  %s4498_s16 = smov 0  }
  0x19 LB: > { %s5096_s2 = sld [smem:[#allocation29_spill]]  ;;  %s4516_s20 = sadd.s32 4294967295, %s4396_s16   ;;  %s4396_s16 = sphi %s4498_s16, %s5120_s16   ;;  %s4392_s15 = sphi %s4496_s15, %s5119_s15   ;;  %s4388_s30 = sphi %s4494_s30, %s5118_s30   ;;  %s4384_s29 = sphi %s4492_s29, %s5117_s29  }
  0x1a   : > { %p3694_p0 = scmp.ge.s32.totalorder %s4396_s16, 1  ;;  %p58_p1 = scmp.eq.s32.totalorder %s4516_s20, 0 }
  0x1b   : > { %p372_p2 = scmp.lt.s32.totalorder %s4396_s16, 3  ;;  %s4398_s22 = smov [#allocation7]  }
  0x1c   : > { %s385_s23 = sshll.u32 %s4398_s22, 4  ;;  %s5098_s3 = sld [smem:[#allocation30_spill]]  ;;  %s386_s23 = int_to_ptr.vmem [resolvable:$true] %s385_s23 }
  0x1d   : > { %p4521_p3 = pnand %p3694_p0, %p372_p2  ;;  %s5100_s5 = sld [smem:[#allocation32_spill]] }
  0x1e   : > { %s4399_s22 = smov [#allocation8]   ;;  %s4400_s14 = smov 768  }
  0x1f   : > { %s383_s19 = sshll.u32 %s5096_s2, 4  ;;  %p3809_p4 = pneg %p4521_p3  ;;  %s384_s19 = int_to_ptr.hbm [resolvable:$true] %s383_s19 }
  0x20   : > { %s400_s2 = sshll.u32 %s4399_s22, 4  ;;  %s4401_s13 = smov 48   ;;  %s401_s2 = int_to_ptr.vmem [resolvable:$true] %s400_s2 }
  0x21   : > { %p4533_p6 = pnand %p3809_p4, %p58_p1  ;;  %s5101_s7 = sld [smem:[#allocation34_spill]] }
  0x22   : > { %s398_s26 = sshll.u32 %s5098_s3, 4  ;;  %s4402_s11 = smov [#allocation11]   ;;  %s399_s26 = int_to_ptr.hbm [resolvable:$true] %s398_s26 }
  0x23   : > { %s424_s18 = sshll.u32 %s5100_s5, 4  ;;  %s426_s9 = sshll.u32 %s4402_s11, 4  ;;  %s425_s18 = int_to_ptr.hbm [resolvable:$true] %s424_s18  ;;  %s427_s9 = int_to_ptr.vmem [resolvable:$true] %s426_s9 }
  0x24   : > { %3812 = dma.hbm_to_vmem [thread:$0]  (!%p4533_p6), %s384_s19, 24576, %s386_s23, [#allocation6], %s4400_s14, %s4400_s14, %s4401_s13  }
  0x25   : > { %3815 = dma.hbm_to_vmem [thread:$0]  (!%p4533_p6), %s399_s26, 96, %s401_s2, [#allocation9]  }
  0x26   : > { %3821 = dma.hbm_to_vmem [thread:$0]  (!%p4533_p6), %s425_s18, 32, %s427_s9, [#allocation12]  }
  0x27   : > { %s448_s3 = sshll.u32 %s5101_s7, 4  ;;  %s4403_s28 = smov [#allocation14]   ;;  %s449_s3 = int_to_ptr.hbm [resolvable:$true] %s448_s3 }
  0x28   : > { %s450_s17 = sshll.u32 %s4403_s28, 4  ;;  %s5102_s10 = sld [smem:[#allocation37_spill]]  ;;  %s451_s17 = int_to_ptr.vmem [resolvable:$true] %s450_s17 }
  0x29   : > { %3827 = dma.hbm_to_vmem [thread:$0]  (!%p4533_p6), %s449_s3, 32, %s451_s17, [#allocation15]  }
  0x2a   : > { %s4404_s19 = smov [#allocation17]   ;;  %s5103_s4 = sld [smem:[#allocation31_spill]] }
  0x2b   : > { %s478_s23 = sshll.u32 %s4404_s19, 4  ;;  %s4405_s9 = smov 256   ;;  %s479_s23 = int_to_ptr.vmem [resolvable:$true] %s478_s23 }
  0x2c   : > { %s4406_s18 = smov 16   ;;  %s4407_s3 = smov [#allocation10]  }
  0x2d   : > { %s411_s24 = sshll.u32 %s4407_s3, 4  ;;  %s5104_s6 = sld [smem:[#allocation33_spill]]  ;;  %s412_s24 = int_to_ptr.vmem [resolvable:$true] %s411_s24 }
  0x2e   : > { %s476_s2 = sshll.u32 %s5102_s10, 4  ;;  %s5105_s8 = sld [smem:[#allocation35_spill]]  ;;  %s477_s2 = int_to_ptr.hbm [resolvable:$true] %s476_s2 }
  0x2f   : > { %3833 = dma.hbm_to_vmem [thread:$0]  (!%p4533_p6), %s477_s2, 32768, %s479_s23, [#allocation18], %s4405_s9, %s4405_s9, %s4406_s18  }
  0x30   : > { %s409_s22 = sshll.u32 %s5103_s4, 4  ;;  %s4408_s11 = smov [#allocation13]   ;;  %s410_s22 = int_to_ptr.hbm [resolvable:$true] %s409_s22 }
  0x31   : > { %3818 = dma.hbm_to_vmem [thread:$0]  (!%p4533_p6), %s410_s22, 8192, %s412_s24, [#allocation9], %s4405_s9, %s4405_s9, %s4406_s18  }
  0x32   : > { %s438_s26 = sshll.u32 %s4408_s11, 4  ;;  %s4409_s2 = smov [#allocation16]   ;;  %s439_s26 = int_to_ptr.vmem [resolvable:$true] %s438_s26 }
  0x33   : > { %s436_s17 = sshll.u32 %s5104_s6, 4  ;;  %s461_s23 = sshll.u32 %s4409_s2, 4  ;;  %s437_s17 = int_to_ptr.hbm [resolvable:$true] %s436_s17  ;;  %s462_s23 = int_to_ptr.vmem [resolvable:$true] %s461_s23 }
  0x34   : > { %s459_s19 = sshll.u32 %s5105_s8, 4  ;;  %s4410_s22 = smov 1024   ;;  %s460_s19 = int_to_ptr.hbm [resolvable:$true] %s459_s19 }
  0x35   : > { %3824 = dma.hbm_to_vmem [thread:$0]  (!%p4533_p6), %s437_s17, 32, %s439_s26, [#allocation12]  }
  0x36   : > { %s4411_s9 = smov 64   ;;  %s5106_s12 = sld [smem:[#allocation39_spill]] }
  0x37   : > { %3830 = dma.hbm_to_vmem [thread:$0]  (!%p4533_p6), %s460_s19, 32768, %s462_s23, [#allocation15], %s4410_s22, %s4410_s22, %s4411_s9  }
  0x38   : > { %s4412_s25 = smov [#allocation19]   ;;  %s3693_s17 = sadd.s32 4294967294, %s4396_s16  }
  0x39   : > { %s496_s28 = sshll.u32 %s4412_s25, 4  ;;  %s4578_s13 = sadd.s32 1, %s4396_s16   ;;  %s497_s28 = int_to_ptr.vmem [resolvable:$true] %s496_s28 }
  0x3a   : > { %s44_s14 = sadd.s32 1, %s4392_s15  ;;  %s41_s19 = ssub.s32 %s4396_s16, %s4578_s13 }
  0x3b   : > { %p51_p7 = scmp.ne.s32.totalorder %s4392_s15, %s4388_s30  ;;  %p42_p8 = scmp.eq.s32.totalorder %s41_s19, 0 }
  0x3c   : > { %s494_s24 = sshll.u32 %s5106_s12, 4  ;;  %p52_p9 = scmp.eq.s32.totalorder %s4396_s16, 0  ;;  %s495_s24 = int_to_ptr.hbm [resolvable:$true] %s494_s24 }
  0x3d   : > { %3836 = dma.hbm_to_vmem [thread:$0]  (!%p4533_p6), %s495_s24, 32, %s497_s28, [#allocation18]  }
  0x3e   : > { %p57_p10 = scmp.ne.s32.totalorder %s4388_s30, %s4384_s29  ;;  %p359_p11 = scmp.eq.s32.totalorder %s4516_s20, 1 }
  0x3f   : > { %s4590_s11 = scalar_select %p42_p8, %s4392_s15, %s44_s14  }
  0x40   : > { %p4592_p12 = por %p52_p9, %p51_p7  ;;  %p4598_p13 = por %p58_p1, %p57_p10 }
  0x41   : > { %p4602_p0 = por %p359_p11, %p51_p7  ;;  %p365_p2 = scmp.eq.s32.totalorder %s3693_s17, 1 }
  0x42   : > { %p3857_p4 = scmp.lt.s32.totalorder %s4396_s16, 2  ;;  %s4608_s23 = sand.u32 1, %s4392_s15  }
  0x43   : > { %p4610_p6 = por %p365_p2, %p57_p10  ;;  %s3705_s9 = sshll.u32 %s4608_s23, 4 }
  0x44   : > { %s3765_s18 = sshll.u32 %s4396_s16, 4  ;;  %s514_s14 = scalar_lea.vmem [#allocation2], %s3705_s9 }
  0x45   : > { %s519_s25 = scalar_lea.hbm %s5067_s0, %s3765_s18  ;;  %s523_s19 = sshll.u32 %s514_s14, 4  ;;  %s524_s19 = int_to_ptr.vmem [resolvable:$true] %s523_s19 }
  0x46   : > { %s521_s28 = sshll.u32 %s519_s25, 4  ;;  %p4621_p7 = pnand %p3857_p4, %p4592_p12  ;;  %s522_s28 = int_to_ptr.hbm [resolvable:$true] %s521_s28 }
  0x47   : > { %s530_s4 = sand.u32 1, %s4396_s16   ;;  %s536_s7 = scalar_lea.hbm %s5068_s1, %s4396_s16 }
  0x48   : > { %s511_s8 = scalar_lea.sflag [#allocation3], %s4608_s23  ;;  %s4246_s3 = sshra.s32 %s522_s28, 4  ;;  %s4247_s3 = int_to_ptr.hbm [resolvable:$true] %s4246_s3 }
  0x49   : > { %s4248_s18 = scalar_lea.hbm %s4247_s3, 16  ;;  %p4250_p9 = pneg %p4621_p7 }
  0x4a   : > { %p4249_p8 = scmp.ne.s32.totalorder %s4247_s3, %s4248_s18  ;;  %s4253_s24 = scalar_lea.hbm %s5067_s0, 32 }
  0x4b   : > { %p4254_p12 = scmp.lt.s32.totalorder %s4247_s3, %s5067_s0  ;;  %p4255_p2 = scmp.lt.s32.totalorder %s4253_s24, %s4248_s18 }
  0x4c   : > { %p4251_p10 = pnand %p4250_p9, %p4249_p8 }
  0x4d   : > { %p4256_p4 = por %p4255_p2, %p4254_p12 }
  0x4e   : > { %p4252_p11 = pneg %p4251_p10 }
  0x50   : > { %p4257_p5 = pnand %p4256_p4, %p4252_p11 }
  0x52   : > { %4260 = shalt.err (!%p4257_p5)
}
  0x53   : > { %3840 = dma.hbm_to_vmem [thread:$0]  (!%p4621_p7), %s522_s28, 256, %s524_s19, %s511_s8  }
  0x54   : > { %s538_s5 = sshll.u32 %s536_s7, 4  ;;  %s533_s6 = scalar_lea.vmem [#allocation5], %s4608_s23  ;;  %s539_s5 = int_to_ptr.hbm [resolvable:$true] %s538_s5 }
  0x55   : > { %s540_s10 = sshll.u32 %s533_s6, 4  ;;  %s531_s26 = scalar_lea.sflag [#allocation6], %s530_s4  ;;  %s541_s10 = int_to_ptr.vmem [resolvable:$true] %s540_s10 }
  0x56   : > { %s4276_s9 = sshra.s32 %s539_s5, 4  ;;  %s4283_s24 = scalar_lea.hbm %s5068_s1, 2  ;;  %s4277_s9 = int_to_ptr.hbm [resolvable:$true] %s4276_s9 }
  0x57   : > { %s4278_s12 = scalar_lea.hbm %s4277_s9, 1  ;;  %p4284_p5 = scmp.lt.s32.totalorder %s4277_s9, %s5068_s1 }
  0x58   : > { %p4279_p8 = scmp.ne.s32.totalorder %s4277_s9, %s4278_s12  ;;  %p4285_p12 = scmp.lt.s32.totalorder %s4283_s24, %s4278_s12 }
  0x5a   : > { %p4281_p10 = pnand %p4279_p8, %p4250_p9  ;;  %p4286_p2 = por %p4285_p12, %p4284_p5 }
  0x5c   : > { %p4282_p11 = pneg %p4281_p10 }
  0x5e   : > { %p4287_p4 = pnand %p4286_p2, %p4282_p11 }
  0x60   : > { %4290 = shalt.err (!%p4287_p4)
}
  0x61   : > { %3843 = dma.hbm_to_vmem [thread:$0]  (!%p4621_p7), %s539_s5, 16, %s541_s10, %s531_s26  }
  0x62   : > { %549 = sbr.rel (%p4521_p3) target bundleno = 2622 (0xa3e), region = 76  ;;  %s4659_s4 = sand.u32 (!%p4521_p3), 1, %s4388_s30  }
  0x63   : > { %s3709_s7 = sshll.u32 (!%p4521_p3), %s4659_s4, 4  ;;  %s552_s23 = scalar_lea.sflag (!%p4521_p3), [#allocation3], %s4659_s4 }
  0x64   : > { %s4665_s12 = scalar_lea.vmem (!%p4521_p3), [#allocation2], %s3709_s7 }
  0x67   : > { %4351 = dma.done.wait (%p4598_p13), %s552_s23, 256  }
  0x68   : > { %4353 = vsyncadd (%p4598_p13), %s552_s23, 4294967040  ;;  %s561_s10 = sand.u32 1, %s4516_s20   ;;  %s564_s28 = scalar_lea.vmem [#allocation5], %s4659_s4 }
  0x69   : > { %s562_s21 = scalar_lea.sflag [#allocation6], %s561_s10 }
  0x6a   : > { %4355 = dma.done.wait (%p4598_p13), %s562_s21, 16  }
  0x6b   : > { %4357 = vsyncadd (%p4598_p13), %s562_s21, 4294967280 }
  0x6c   : > { %4359 = dma.done.wait (%p58_p1), [#allocation6], 24576  }
  0x6d   : > { %4361 = vsyncadd (%p58_p1), [#allocation6], 4294942720 }
  0x6e   : > { %4363 = dma.done.wait (%p58_p1), [#allocation9], 8288  }
  0x6f   : > { %4365 = vsyncadd (%p58_p1), [#allocation9], 4294959008 }
  0x70   : > { %4367 = dma.done.wait (%p58_p1), [#allocation12], 64  }
  0x71   : > { %4369 = vsyncadd (%p58_p1), [#allocation12], 4294967232 }
  0x72   : > { %4371 = dma.done.wait (%p58_p1), [#allocation15], 32800  }
  0x73   : > { %4373 = vsyncadd (%p58_p1), [#allocation15], 4294934496 }
  0x74   : > { %4375 = dma.done.wait (%p58_p1), [#allocation18], 32800  }
  0x75   : > { %4377 = vsyncadd (%p58_p1), [#allocation18], 4294934496  ;;  %v751_v0 = vld [vmem:[#allocation7 + $0x2d0] sm:$0xff]  ;;  %v745_v1 = vld [vmem:[#allocation7 + $0x2a0] sm:$0xff]  ;;  %vm1113_vm0 = vcmask 261120   ;;  %s4413_s27 = smov 96  }
  0x76   : > { %v847_v2 = vld [vmem:[#allocation7 + $0x5d0] sm:$0xff]  ;;  %867 = vmatpush.msra.mxu0 %v751_v0  ;;  %v841_v3 = vld [vmem:[#allocation7 + $0x5a0] sm:$0xff]  ;;  %s4414_s19 = smov 64   ;;  %s4415_s17 = smov 32   ;;  %vm1140_vm1 = vcmask 64512  }
  0x77   : > { %887 = vmatpush.msra.mxu1 %v847_v2  ;;  %v739_v4 = vld [vmem:[#allocation7 + $0x270] sm:$0xff]  ;;  %v733_v6 = vld [vmem:[#allocation7 + $0x240] sm:$0xff]  ;;  %s5112_s6 = sld [smem:[#allocation36_spill]]  ;;  %s3766_s18 = sshll.u32 %s4516_s20, 4 }
  0x78   : > { %v835_v5 = vld [vmem:[#allocation7 + $0x570] sm:$0xff]  ;;  %868 = vmatpush.msra.mxu0 %v745_v1  ;;  %v829_v7 = vld [vmem:[#allocation7 + $0x540] sm:$0xff]  ;;  %s5113_s3 = sld [smem:[#allocation38_spill]]  ;;  %s658_s20 = scalar_lea.vmem [#allocation20], %s3709_s7 }
  0x79   : > { %888 = vmatpush.msra.mxu1 %v841_v3  ;;  %v727_v8 = vld [vmem:[#allocation7 + $0x210] sm:$0xff]  ;;  %v721_v10 = vld [vmem:[#allocation7 + $0x1e0] sm:$0xff]  ;;  %s5114_s8 = sld [smem:[#allocation40_spill]] }
  0x7a   : > { %869 = vmatpush.msra.mxu0 %v739_v4  ;;  %v823_v9 = vld [vmem:[#allocation7 + $0x510] sm:$0xff]  ;;  %v817_v11 = vld [vmem:[#allocation7 + $0x4e0] sm:$0xff]  ;;  %s5115_s10 = sld [smem:[#allocation41_spill]] }
  0x7b   : > { %889 = vmatpush.msra.mxu1 %v835_v5  ;;  %v715_v12 = vld [vmem:[#allocation7 + $0x1b0] sm:$0xff]  ;;  %v709_v14 = vld [vmem:[#allocation7 + $0x180] sm:$0xff] }
  0x7c   : > { %870 = vmatpush.msra.mxu0 %v733_v6  ;;  %v811_v13 = vld [vmem:[#allocation7 + $0x4b0] sm:$0xff]  ;;  %v805_v15 = vld [vmem:[#allocation7 + $0x480] sm:$0xff] }
  0x7d   : > { %890 = vmatpush.msra.mxu1 %v829_v7  ;;  %v703_v16 = vld [vmem:[#allocation7 + $0x150] sm:$0xff]  ;;  %v697_v18 = vld [vmem:[#allocation7 + $0x120] sm:$0xff] }
  0x7e   : > { %871 = vmatpush.msra.mxu0 %v727_v8  ;;  %v799_v17 = vld [vmem:[#allocation7 + $0x450] sm:$0xff]  ;;  %v793_v19 = vld [vmem:[#allocation7 + $0x420] sm:$0xff] }
  0x7f   : > { %891 = vmatpush.msra.mxu1 %v823_v9  ;;  %v691_v20 = vld [vmem:[#allocation7 + $0xf0] sm:$0xff]  ;;  %v685_v22 = vld [vmem:[#allocation7 + $0xc0] sm:$0xff] }
  0x80   : > { %872 = vmatpush.msra.mxu0 %v721_v10  ;;  %v787_v21 = vld [vmem:[#allocation7 + $0x3f0] sm:$0xff]  ;;  %v781_v23 = vld [vmem:[#allocation7 + $0x3c0] sm:$0xff]  ;;  %s3514_s21 = scalar_lea.hbm %s5115_s10, %s3766_s18  ;;  %s4326_s7 = scalar_lea.hbm %s5115_s10, 32 }
  0x81   : > { %892 = vmatpush.msra.mxu1 %v817_v11  ;;  %v679_v24 = vld [vmem:[#allocation7 + $0x90] sm:$0xff]  ;;  %v673_v26 = vld [vmem:[#allocation7 + $0x60] sm:$0xff] }
  0x82   : > { %873 = vmatpush.msra.mxu0 %v715_v12  ;;  %v775_v25 = vld [vmem:[#allocation7 + $0x390] sm:$0xff]  ;;  %v769_v27 = vld [vmem:[#allocation7 + $0x360] sm:$0xff] }
  0x83   : > { %893 = vmatpush.msra.mxu1 %v811_v13  ;;  %v667_v28 = vld [vmem:[#allocation7 + $0x30] sm:$0xff]  ;;  %v661_v30 = vld [vmem:[#allocation7] sm:$0xff] }
  0x84   : > { %874 = vmatpush.msra.mxu0 %v709_v14  ;;  %v763_v29 = vld [vmem:[#allocation7 + $0x330] sm:$0xff]  ;;  %v757_v31 = vld [vmem:[#allocation7 + $0x300] sm:$0xff] }
  0x85   : > { %894 = vmatpush.msra.mxu1 %v805_v15  ;;  %v753_v32 = vld [vmem:[#allocation7 + $0x2e0] sm:$0xff]  ;;  %v747_v36 = vld [vmem:[#allocation7 + $0x2b0] sm:$0xff] }
  0x86   : > { %875 = vmatpush.msra.mxu0 %v703_v16  ;;  %v849_v33 = vld [vmem:[#allocation7 + $0x5e0] sm:$0xff]  ;;  %v843_v37 = vld [vmem:[#allocation7 + $0x5b0] sm:$0xff] }
  0x87   : > { %895 = vmatpush.msra.mxu1 %v799_v17  ;;  %v4698_v34 = vld [vmem:[%s4665_s12] sm:$0xff]  ;;  %v4701_v35 = vld [vmem:[%s4665_s12 + $0x8] sm:$0xff] }
  0x88   : > { %876 = vmatpush.msra.mxu0 %v697_v18  ;;  %v741_v38 = vld [vmem:[#allocation7 + $0x280] sm:$0xff]  ;;  %v735_v40 = vld [vmem:[#allocation7 + $0x250] sm:$0xff] }
  0x89   : > { %896 = vmatpush.msra.mxu1 %v793_v19  ;;  %v837_v39 = vld [vmem:[#allocation7 + $0x580] sm:$0xff]  ;;  %v831_v41 = vld [vmem:[#allocation7 + $0x550] sm:$0xff] }
  0x8a   : > { %877 = vmatpush.msra.mxu0 %v691_v20  ;;  %v729_v42 = vld [vmem:[#allocation7 + $0x220] sm:$0xff]  ;;  %v723_v44 = vld [vmem:[#allocation7 + $0x1f0] sm:$0xff] }
  0x8b   : > { %897 = vmatpush.msra.mxu1 %v787_v21  ;;  %v825_v43 = vld [vmem:[#allocation7 + $0x520] sm:$0xff]  ;;  %v819_v45 = vld [vmem:[#allocation7 + $0x4f0] sm:$0xff] }
  0x8c   : > { %878 = vmatpush.msra.mxu0 %v685_v22  ;;  %v717_v46 = vld [vmem:[#allocation7 + $0x1c0] sm:$0xff]  ;;  %v711_v48 = vld [vmem:[#allocation7 + $0x190] sm:$0xff] }
  0x8d   : > { %898 = vmatpush.msra.mxu1 %v781_v23  ;;  %v813_v47 = vld [vmem:[#allocation7 + $0x4c0] sm:$0xff]  ;;  %v807_v49 = vld [vmem:[#allocation7 + $0x490] sm:$0xff] }
  0x8e   : > { %879 = vmatpush.msra.mxu0 %v679_v24  ;;  %v705_v50 = vld [vmem:[#allocation7 + $0x160] sm:$0xff]  ;;  %v699_v52 = vld [vmem:[#allocation7 + $0x130] sm:$0xff] }
  0x8f   : > { %899 = vmatpush.msra.mxu1 %v775_v25  ;;  %v801_v51 = vld [vmem:[#allocation7 + $0x460] sm:$0xff]  ;;  %v795_v53 = vld [vmem:[#allocation7 + $0x430] sm:$0xff] }
  0x90   : > { %880 = vmatpush.msra.mxu0 %v673_v26  ;;  %v693_v54 = vld [vmem:[#allocation7 + $0x100] sm:$0xff]  ;;  %v687_v56 = vld [vmem:[#allocation7 + $0xd0] sm:$0xff] }
  0x91   : > { %900 = vmatpush.msra.mxu1 %v769_v27  ;;  %v789_v55 = vld [vmem:[#allocation7 + $0x400] sm:$0xff]  ;;  %v783_v57 = vld [vmem:[#allocation7 + $0x3d0] sm:$0xff] }
  0x92   : > { %881 = vmatpush.msra.mxu0 %v667_v28  ;;  %v681_v58 = vld [vmem:[#allocation7 + $0xa0] sm:$0xff]  ;;  %v675_v60 = vld [vmem:[#allocation7 + $0x70] sm:$0xff] }
  0x93   : > { %901 = vmatpush.msra.mxu1 %v763_v29  ;;  %v777_v59 = vld [vmem:[#allocation7 + $0x3a0] sm:$0xff]  ;;  %v771_v61 = vld [vmem:[#allocation7 + $0x370] sm:$0xff] }
  0x94   : > { %882 = vmatpush.msra.mxu0 %v661_v30  ;;  %v669_v62 = vld [vmem:[#allocation7 + $0x40] sm:$0xff]  ;;  %v663_v0 = vld [vmem:[#allocation7 + $0x10] sm:$0xff] }
  0x95   : > { %902 = vmatpush.msra.mxu1 %v757_v31  ;;  %883 = vmatmul.f32.vlgmr.msra.gmra.mxu0 %v4698_v34  ;;  %v765_v63 = vld [vmem:[#allocation7 + $0x340] sm:$0xff]  ;;  %v759_v1 = vld [vmem:[#allocation7 + $0x310] sm:$0xff] }
  0x96   : > { %947 = vmatpush.msrb.mxu0 %v753_v32  ;;  %903 = vmatmul.f32.vlgmr.msra.gmra.mxu1 %v4701_v35  ;;  %v755_v2 = vld [vmem:[#allocation7 + $0x2f0] sm:$0xff]  ;;  %v749_v4 = vld [vmem:[#allocation7 + $0x2c0] sm:$0xff] }
  0x97   : > { %967 = vmatpush.msrb.mxu1 %v849_v33  ;;  %v851_v3 = vld [vmem:[#allocation7 + $0x5f0] sm:$0xff]  ;;  %v845_v5 = vld [vmem:[#allocation7 + $0x5c0] sm:$0xff] }
  0x98   : > { %948 = vmatpush.msrb.mxu0 %v747_v36  ;;  %v743_v6 = vld [vmem:[#allocation7 + $0x290] sm:$0xff]  ;;  %v737_v8 = vld [vmem:[#allocation7 + $0x260] sm:$0xff]  ;;  %v752_v36 = vld [vmem:[#allocation7 + $0x2d8] sm:$0xff] }
  0x99   : > { %968 = vmatpush.msrb.mxu1 %v843_v37  ;;  %v839_v7 = vld [vmem:[#allocation7 + $0x590] sm:$0xff]  ;;  %v833_v9 = vld [vmem:[#allocation7 + $0x560] sm:$0xff]  ;;  %v746_v37 = vld [vmem:[#allocation7 + $0x2a8] sm:$0xff]  ;;  %907 = vmatpush.msra.mxu2 %v752_v36 }
  0x9a   : > { %949 = vmatpush.msrb.mxu0 %v741_v38  ;;  %v731_v10 = vld [vmem:[#allocation7 + $0x230] sm:$0xff]  ;;  %v725_v12 = vld [vmem:[#allocation7 + $0x200] sm:$0xff]  ;;  %v848_v38 = vld [vmem:[#allocation7 + $0x5d8] sm:$0xff] }
  0x9b   : > { %969 = vmatpush.msrb.mxu1 %v837_v39  ;;  %v827_v11 = vld [vmem:[#allocation7 + $0x530] sm:$0xff]  ;;  %v821_v13 = vld [vmem:[#allocation7 + $0x500] sm:$0xff]  ;;  %927 = vmatpush.msra.mxu3 %v848_v38  ;;  %v712_v36 = vld [vmem:[#allocation7 + $0x198] sm:$0xff] }
  0x9c   : > { %950 = vmatpush.msrb.mxu0 %v735_v40  ;;  %v719_v14 = vld [vmem:[#allocation7 + $0x1d0] sm:$0xff]  ;;  %v713_v16 = vld [vmem:[#allocation7 + $0x1a0] sm:$0xff]  ;;  %908 = vmatpush.msra.mxu2 %v746_v37  ;;  %v814_v37 = vld [vmem:[#allocation7 + $0x4c8] sm:$0xff] }
  0x9d   : > { %970 = vmatpush.msrb.mxu1 %v831_v41  ;;  %v815_v15 = vld [vmem:[#allocation7 + $0x4d0] sm:$0xff]  ;;  %v809_v17 = vld [vmem:[#allocation7 + $0x4a0] sm:$0xff]  ;;  %v842_v41 = vld [vmem:[#allocation7 + $0x5a8] sm:$0xff] }
  0x9e   : > { %951 = vmatpush.msrb.mxu0 %v729_v42  ;;  %v707_v18 = vld [vmem:[#allocation7 + $0x170] sm:$0xff]  ;;  %v701_v20 = vld [vmem:[#allocation7 + $0x140] sm:$0xff]  ;;  %928 = vmatpush.msra.mxu3 %v842_v41  ;;  %v706_v38 = vld [vmem:[#allocation7 + $0x168] sm:$0xff] }
  0x9f   : > { %971 = vmatpush.msrb.mxu1 %v825_v43  ;;  %v803_v19 = vld [vmem:[#allocation7 + $0x470] sm:$0xff]  ;;  %v797_v21 = vld [vmem:[#allocation7 + $0x440] sm:$0xff]  ;;  %v740_v43 = vld [vmem:[#allocation7 + $0x278] sm:$0xff] }
  0xa0   : > { %952 = vmatpush.msrb.mxu0 %v723_v44  ;;  %v695_v22 = vld [vmem:[#allocation7 + $0x110] sm:$0xff]  ;;  %v689_v24 = vld [vmem:[#allocation7 + $0xe0] sm:$0xff]  ;;  %909 = vmatpush.msra.mxu2 %v740_v43  ;;  %v802_v41 = vld [vmem:[#allocation7 + $0x468] sm:$0xff] }
  0xa1   : > { %972 = vmatpush.msrb.mxu1 %v819_v45  ;;  %v791_v23 = vld [vmem:[#allocation7 + $0x410] sm:$0xff]  ;;  %v785_v25 = vld [vmem:[#allocation7 + $0x3e0] sm:$0xff]  ;;  %v694_v43 = vld [vmem:[#allocation7 + $0x108] sm:$0xff] }
  0xa2   : > { %953 = vmatpush.msrb.mxu0 %v717_v46  ;;  %v683_v26 = vld [vmem:[#allocation7 + $0xb0] sm:$0xff]  ;;  %v677_v28 = vld [vmem:[#allocation7 + $0x80] sm:$0xff] }
  0xa3   : > { %973 = vmatpush.msrb.mxu1 %v813_v47  ;;  %v779_v27 = vld [vmem:[#allocation7 + $0x3b0] sm:$0xff]  ;;  %v773_v29 = vld [vmem:[#allocation7 + $0x380] sm:$0xff] }
  0xa4   : > { %954 = vmatpush.msrb.mxu0 %v711_v48  ;;  %v671_v30 = vld [vmem:[#allocation7 + $0x50] sm:$0xff]  ;;  %v665_v32 = vld [vmem:[#allocation7 + $0x20] sm:$0xff] }
  0xa5   : > { %974 = vmatpush.msrb.mxu1 %v807_v49  ;;  %v767_v31 = vld [vmem:[#allocation7 + $0x350] sm:$0xff]  ;;  %v761_v33 = vld [vmem:[#allocation7 + $0x320] sm:$0xff] }
  0xa6   : > { %955 = vmatpush.msrb.mxu0 %v705_v50  ;;  %v4709_v42 = vld [vmem:[#allocation8] sm:$0x3f]  ;;  %v734_v50 = vld [vmem:[#allocation7 + $0x248] sm:$0xff] }
  0xa7   : > { %975 = vmatpush.msrb.mxu1 %v801_v51  ;;  %v855_v44 = vperm.slane %v4709_v42, 0  ;;  %v857_v45 = vperm.slane %v4709_v42, 2  ;;  %v836_v51 = vld [vmem:[#allocation7 + $0x578] sm:$0xff]  ;;  %910 = vmatpush.msra.mxu2 %v734_v50  ;;  %v778_v50 = vld [vmem:[#allocation7 + $0x3a8] sm:$0xff] }
  0xa8   : > { %956 = vmatpush.msrb.mxu0 %v699_v52  ;;  %929 = vmatpush.msra.mxu3 %v836_v51  ;;  %v670_v51 = vld [vmem:[#allocation7 + $0x48] sm:$0xff] }
  0xa9   : > { %976 = vmatpush.msrb.mxu1 %v795_v53 }
  0xaa   : > { %957 = vmatpush.msrb.mxu0 %v693_v54  ;;  %v728_v54 = vld [vmem:[#allocation7 + $0x218] sm:$0xff] }
  0xab   : > { %977 = vmatpush.msrb.mxu1 %v789_v55  ;;  %v830_v55 = vld [vmem:[#allocation7 + $0x548] sm:$0xff]  ;;  %911 = vmatpush.msra.mxu2 %v728_v54  ;;  %v664_v54 = vld [vmem:[#allocation7 + $0x18] sm:$0xff] }
  0xac   : > { %958 = vmatpush.msrb.mxu0 %v687_v56  ;;  %930 = vmatpush.msra.mxu3 %v830_v55  ;;  %v722_v56 = vld [vmem:[#allocation7 + $0x1e8] sm:$0xff] }
  0xad   : > { %978 = vmatpush.msrb.mxu1 %v783_v57  ;;  %v824_v57 = vld [vmem:[#allocation7 + $0x518] sm:$0xff]  ;;  %912 = vmatpush.msra.mxu2 %v722_v56  ;;  %v766_v55 = vld [vmem:[#allocation7 + $0x348] sm:$0xff] }
  0xae   : > { %959 = vmatpush.msrb.mxu0 %v681_v58  ;;  %v716_v58 = vld [vmem:[#allocation7 + $0x1b8] sm:$0xff]  ;;  %931 = vmatpush.msra.mxu3 %v824_v57 }
  0xaf   : > { %979 = vmatpush.msrb.mxu1 %v777_v59  ;;  %913 = vmatpush.msra.mxu2 %v716_v58  ;;  %v756_v56 = vld [vmem:[#allocation7 + $0x2f8] sm:$0xff]  ;;  %v750_v58 = vld [vmem:[#allocation7 + $0x2c8] sm:$0xff] }
  0xb0   : > { %960 = vmatpush.msrb.mxu0 %v675_v60  ;;  %v818_v60 = vld [vmem:[#allocation7 + $0x4e8] sm:$0xff]  ;;  %v760_v57 = vld [vmem:[#allocation7 + $0x318] sm:$0xff] }
  0xb1   : > { %980 = vmatpush.msrb.mxu1 %v771_v61  ;;  %v710_v61 = vld [vmem:[#allocation7 + $0x188] sm:$0xff]  ;;  %932 = vmatpush.msra.mxu3 %v818_v60  ;;  %v852_v60 = vld [vmem:[#allocation7 + $0x5f8] sm:$0xff] }
  0xb2   : > { %961 = vmatpush.msrb.mxu0 %v669_v62  ;;  %v812_v62 = vld [vmem:[#allocation7 + $0x4b8] sm:$0xff]  ;;  %914 = vmatpush.msra.mxu2 %v710_v61 }
  0xb3   : > { %981 = vmatpush.msrb.mxu1 %v765_v63  ;;  %v704_v63 = vld [vmem:[#allocation7 + $0x158] sm:$0xff]  ;;  %933 = vmatpush.msra.mxu3 %v812_v62  ;;  %v738_v62 = vld [vmem:[#allocation7 + $0x268] sm:$0xff] }
  0xb4   : > { %962 = vmatpush.msrb.mxu0 %v663_v0  ;;  %v806_v0 = vld [vmem:[#allocation7 + $0x488] sm:$0xff]  ;;  %915 = vmatpush.msra.mxu2 %v704_v63  ;;  %v744_v61 = vld [vmem:[#allocation7 + $0x298] sm:$0xff] }
  0xb5   : > { %982 = vmatpush.msrb.mxu1 %v759_v1  ;;  %963 = vmatmul.f32.vlgmr.msrb.gmra.mxu0 %v4698_v34  ;;  %v698_v1 = vld [vmem:[#allocation7 + $0x128] sm:$0xff]  ;;  %v840_v63 = vld [vmem:[#allocation7 + $0x598] sm:$0xff] }
  0xb6   : > { %983 = vmatmul.f32.vlgmr.msrb.gmra.mxu1 %v4701_v35  ;;  %1027 = vmatpush.msra.mxu0 %v755_v2  ;;  %v800_v2 = vld [vmem:[#allocation7 + $0x458] sm:$0xff] }
  0xb7   : > { %1047 = vmatpush.msra.mxu1 %v851_v3  ;;  %934 = vmatpush.msra.mxu3 %v806_v0  ;;  %v692_v3 = vld [vmem:[#allocation7 + $0xf8] sm:$0xff] }
  0xb8   : > { %1028 = vmatpush.msra.mxu0 %v749_v4  ;;  %916 = vmatpush.msra.mxu2 %v698_v1  ;;  %v794_v4 = vld [vmem:[#allocation7 + $0x428] sm:$0xff]  ;;  %v732_v0 = vld [vmem:[#allocation7 + $0x238] sm:$0xff] }
  0xb9   : > { %1048 = vmatpush.msra.mxu1 %v845_v5  ;;  %935 = vmatpush.msra.mxu3 %v800_v2  ;;  %v686_v5 = vld [vmem:[#allocation7 + $0xc8] sm:$0xff] }
  0xba   : > { %1029 = vmatpush.msra.mxu0 %v743_v6  ;;  %917 = vmatpush.msra.mxu2 %v692_v3  ;;  %v788_v6 = vld [vmem:[#allocation7 + $0x3f8] sm:$0xff]  ;;  %v834_v1 = vld [vmem:[#allocation7 + $0x568] sm:$0xff] }
  0xbb   : > { %1049 = vmatpush.msra.mxu1 %v839_v7  ;;  %936 = vmatpush.msra.mxu3 %v794_v4  ;;  %v680_v7 = vld [vmem:[#allocation7 + $0x98] sm:$0xff]  ;;  %v726_v2 = vld [vmem:[#allocation7 + $0x208] sm:$0xff] }
  0xbc   : > { %1030 = vmatpush.msra.mxu0 %v737_v8  ;;  %918 = vmatpush.msra.mxu2 %v686_v5  ;;  %v782_v8 = vld [vmem:[#allocation7 + $0x3c8] sm:$0xff]  ;;  %v828_v3 = vld [vmem:[#allocation7 + $0x538] sm:$0xff] }
  0xbd   : > { %1050 = vmatpush.msra.mxu1 %v833_v9  ;;  %937 = vmatpush.msra.mxu3 %v788_v6  ;;  %v674_v9 = vld [vmem:[#allocation7 + $0x68] sm:$0xff]  ;;  %v720_v4 = vld [vmem:[#allocation7 + $0x1d8] sm:$0xff] }
  0xbe   : > { %1031 = vmatpush.msra.mxu0 %v731_v10  ;;  %919 = vmatpush.msra.mxu2 %v680_v7  ;;  %v776_v10 = vld [vmem:[#allocation7 + $0x398] sm:$0xff]  ;;  %v822_v5 = vld [vmem:[#allocation7 + $0x508] sm:$0xff] }
  0xbf   : > { %1051 = vmatpush.msra.mxu1 %v827_v11  ;;  %938 = vmatpush.msra.mxu3 %v782_v8  ;;  %v668_v11 = vld [vmem:[#allocation7 + $0x38] sm:$0xff]  ;;  %v714_v6 = vld [vmem:[#allocation7 + $0x1a8] sm:$0xff] }
  0xc0   : > { %1032 = vmatpush.msra.mxu0 %v725_v12  ;;  %920 = vmatpush.msra.mxu2 %v674_v9  ;;  %v770_v12 = vld [vmem:[#allocation7 + $0x368] sm:$0xff]  ;;  %v816_v7 = vld [vmem:[#allocation7 + $0x4d8] sm:$0xff] }
  0xc1   : > { %1052 = vmatpush.msra.mxu1 %v821_v13  ;;  %939 = vmatpush.msra.mxu3 %v776_v10  ;;  %v662_v13 = vld [vmem:[#allocation7 + $0x8] sm:$0xff]  ;;  %v708_v8 = vld [vmem:[#allocation7 + $0x178] sm:$0xff] }
  0xc2   : > { %1033 = vmatpush.msra.mxu0 %v719_v14  ;;  %921 = vmatpush.msra.mxu2 %v668_v11  ;;  %v764_v14 = vld [vmem:[#allocation7 + $0x338] sm:$0xff]  ;;  %v810_v9 = vld [vmem:[#allocation7 + $0x4a8] sm:$0xff] }
  0xc3   : > { %1053 = vmatpush.msra.mxu1 %v815_v15  ;;  %v754_v15 = vld [vmem:[#allocation7 + $0x2e8] sm:$0xff]  ;;  %940 = vmatpush.msra.mxu3 %v770_v12  ;;  %v804_v11 = vld [vmem:[#allocation7 + $0x478] sm:$0xff] }
  0xc4   : > { %1034 = vmatpush.msra.mxu0 %v713_v16  ;;  %922 = vmatpush.msra.mxu2 %v662_v13  ;;  %v758_v16 = vld [vmem:[#allocation7 + $0x308] sm:$0xff]  ;;  %v696_v12 = vld [vmem:[#allocation7 + $0x118] sm:$0xff] }
  0xc5   : > { %1054 = vmatpush.msra.mxu1 %v809_v17  ;;  %v748_v17 = vld [vmem:[#allocation7 + $0x2b8] sm:$0xff]  ;;  %941 = vmatpush.msra.mxu3 %v764_v14  ;;  %v702_v10 = vld [vmem:[#allocation7 + $0x148] sm:$0xff] }
  0xc6   : > { %1035 = vmatpush.msra.mxu0 %v707_v18  ;;  %987 = vmatpush.msrb.mxu2 %v754_v15  ;;  %v850_v18 = vld [vmem:[#allocation7 + $0x5e8] sm:$0xff]  ;;  %v792_v15 = vld [vmem:[#allocation7 + $0x418] sm:$0xff] }
  0xc7   : > { %1055 = vmatpush.msra.mxu1 %v803_v19  ;;  %v742_v19 = vld [vmem:[#allocation7 + $0x288] sm:$0xff]  ;;  %923 = vmatmul.f32.vlgmr.msra.gmra.mxu2 %v4698_v34 }
  0xc8   : > { %1036 = vmatpush.msra.mxu0 %v701_v20  ;;  %v859_v20 = vperm.slane %v4709_v42, 4  ;;  %942 = vmatpush.msra.mxu3 %v758_v16  ;;  %v798_v13 = vld [vmem:[#allocation7 + $0x448] sm:$0xff]  ;;  %v684_v16 = vld [vmem:[#allocation7 + $0xb8] sm:$0xff] }
  0xc9   : > { %1056 = vmatpush.msra.mxu1 %v797_v21  ;;  %988 = vmatpush.msrb.mxu2 %v748_v17  ;;  %v844_v21 = vld [vmem:[#allocation7 + $0x5b8] sm:$0xff]  ;;  %v690_v14 = vld [vmem:[#allocation7 + $0xe8] sm:$0xff] }
  0xca   : > { %1037 = vmatpush.msra.mxu0 %v695_v22  ;;  %1007 = vmatpush.msrb.mxu3 %v850_v18  ;;  %v736_v22 = vld [vmem:[#allocation7 + $0x258] sm:$0xff]  ;;  %v786_v17 = vld [vmem:[#allocation7 + $0x3e8] sm:$0xff] }
  0xcb   : > { %1057 = vmatpush.msra.mxu1 %v791_v23  ;;  %989 = vmatpush.msrb.mxu2 %v742_v19  ;;  %v838_v23 = vld [vmem:[#allocation7 + $0x588] sm:$0xff]  ;;  %v780_v19 = vld [vmem:[#allocation7 + $0x3b8] sm:$0xff] }
  0xcc   : > { %1038 = vmatpush.msra.mxu0 %v689_v24  ;;  %943 = vmatmul.f32.vlgmr.msra.gmra.mxu3 %v4701_v35  ;;  %v678_v18 = vld [vmem:[#allocation7 + $0x88] sm:$0xff] }
  0xcd   : > { %1058 = vmatpush.msra.mxu1 %v785_v25  ;;  %1008 = vmatpush.msrb.mxu3 %v844_v21  ;;  %v774_v21 = vld [vmem:[#allocation7 + $0x388] sm:$0xff] }
  0xce   : > { %1039 = vmatpush.msra.mxu0 %v683_v26  ;;  %v730_v26 = vld [vmem:[#allocation7 + $0x228] sm:$0xff]  ;;  %990 = vmatpush.msrb.mxu2 %v736_v22 }
  0xcf   : > { %1059 = vmatpush.msra.mxu1 %v779_v27  ;;  %1009 = vmatpush.msrb.mxu3 %v838_v23  ;;  %v666_v22 = vld [vmem:[#allocation7 + $0x28] sm:$0xff]  ;;  %v768_v23 = vld [vmem:[#allocation7 + $0x358] sm:$0xff] }
  0xd0   : > { %1040 = vmatpush.msra.mxu0 %v677_v28  ;;  %v832_v28 = vld [vmem:[#allocation7 + $0x558] sm:$0xff]  ;;  %991 = vmatpush.msrb.mxu2 %v730_v26  ;;  %v1279_v26 = vld [vmem:[#allocation10 + $0x60] sm:$0xff] }
  0xd1   : > { %1060 = vmatpush.msra.mxu1 %v773_v29  ;;  %v724_v29 = vld [vmem:[#allocation7 + $0x1f8] sm:$0xff]  ;;  %1010 = vmatpush.msrb.mxu3 %v832_v28  ;;  %v1275_v28 = vld [vmem:[#allocation10 + $0x40] sm:$0xff] }
  0xd2   : > { %1041 = vmatpush.msra.mxu0 %v671_v30  ;;  %992 = vmatpush.msrb.mxu2 %v724_v29 }
  0xd3   : > { %1061 = vmatpush.msra.mxu1 %v767_v31  ;;  %v826_v31 = vld [vmem:[#allocation7 + $0x528] sm:$0xff] }
  0xd4   : > { %1042 = vmatpush.msra.mxu0 %v665_v32  ;;  %v718_v32 = vld [vmem:[#allocation7 + $0x1c8] sm:$0xff]  ;;  %1011 = vmatpush.msrb.mxu3 %v826_v31 }
  0xd5   : > { %1062 = vmatpush.msra.mxu1 %v761_v33  ;;  %1043 = vmatmul.f32.vlgmr.msra.gmra.mxu0 %v4698_v34  ;;  %v820_v33 = vld [vmem:[#allocation7 + $0x4f8] sm:$0xff] }
  0xd6   : > { %1063 = vmatmul.f32.vlgmr.msra.gmra.mxu1 %v4701_v35  ;;  %993 = vmatpush.msrb.mxu2 %v718_v32 }
  0xd7   : > { %1012 = vmatpush.msrb.mxu3 %v820_v33 }
  0xd8   : > { %994 = vmatpush.msrb.mxu2 %v712_v36 }
  0xd9   : > { %1013 = vmatpush.msrb.mxu3 %v814_v37 }
  0xda   : > { %995 = vmatpush.msrb.mxu2 %v706_v38 }
 0x112   : > { %v884_v39 = vpop.f32.mrf.mxu0 }
 0x113   : > { %v904_v40 = vpop.f32.mrf.mxu1  ;;  %v885_v46 = vadd.f32 %v884_v39, %v855_v44  ;;  %v808_v39 = vld [vmem:[#allocation7 + $0x498] sm:$0xff] }
 0x114   : > { %1014 = vmatpush.msrb.mxu3 %v808_v39  ;;  %v796_v44 = vld [vmem:[#allocation7 + $0x438] sm:$0xff] }
 0x115   : > { %v905_v52 = vadd.f32 %v904_v40, %v885_v46  ;;  %v700_v40 = vld [vmem:[#allocation7 + $0x138] sm:$0xff]  ;;  %v790_v46 = vld [vmem:[#allocation7 + $0x408] sm:$0xff] }
 0x116   : > { %996 = vmatpush.msrb.mxu2 %v700_v40  ;;  %1015 = vmatpush.msrb.mxu3 %v802_v41  ;;  %v858_v40 = vperm.slane %v4709_v42, 3 }
 0x117   : > { %v4719_v59 = vmul.f32 0.17677669, %v905_v52  ;;  %v772_v52 = vld [vmem:[#allocation7 + $0x378] sm:$0xff] }
 0x118   : > { %997 = vmatpush.msrb.mxu2 %v694_v43  ;;  %1016 = vmatpush.msrb.mxu3 %v796_v44 }
 0x11a   : > { %1017 = vmatpush.msrb.mxu3 %v790_v46 }
 0x132   : > { %v964_v47 = vpop.f32.mrf.mxu0 }
 0x133   : > { %v984_v48 = vpop.f32.mrf.mxu1  ;;  %v965_v49 = vadd.f32 %v964_v47, %v857_v45  ;;  %v688_v45 = vld [vmem:[#allocation7 + $0xd8] sm:$0xff]  ;;  %v682_v47 = vld [vmem:[#allocation7 + $0xa8] sm:$0xff] }
 0x134   : > { %998 = vmatpush.msrb.mxu2 %v688_v45 }
 0x135   : > { %v4713_v53 = vadd.f32 %v984_v48, %v965_v49  ;;  %v784_v48 = vld [vmem:[#allocation7 + $0x3d8] sm:$0xff] }
 0x136   : > { %v676_v49 = vld [vmem:[#allocation7 + $0x78] sm:$0xff]  ;;  %999 = vmatpush.msrb.mxu2 %v682_v47  ;;  %1018 = vmatpush.msrb.mxu3 %v784_v48 }
 0x137   : > { %1198 = vrot.lane.b32.xlu0 %v4713_v53, %s4413_s27  ;;  %3720 = vmatpush.xpose.msk.msrb.mxu0 %vm1113_vm0, %v4713_v53  ;;  %v4758_v47 = vld [vmem:[%s564_s28] ss:$0 sm:$0xff]  ;;  %s3516_s28 = sshll.u32 %s658_s20, 4  ;;  %s3517_s28 = int_to_ptr.vmem [resolvable:$true] %s3516_s28 }
 0x138   : > { %1000 = vmatpush.msrb.mxu2 %v676_v49  ;;  %1019 = vmatpush.msrb.mxu3 %v778_v50 }
 0x13a   : > { %3721 = vmatmul.msk.f32.vlgmr.msrb.gmra.mxu0 %vm1113_vm0, %v4719_v59  ;;  %1001 = vmatpush.msrb.mxu2 %v670_v51 }
 0x13b   : > { %1020 = vmatpush.msrb.mxu3 %v772_v52 }
 0x13c   : > { %1002 = vmatpush.msrb.mxu2 %v664_v54 }
 0x13d   : > { %1021 = vmatpush.msrb.mxu3 %v766_v55  ;;  %1003 = vmatmul.f32.vlgmr.msrb.gmra.mxu2 %v4698_v34 }
 0x13e   : > { %1067 = vmatpush.msra.mxu2 %v756_v56 }
 0x13f   : > { %1196 = vrot.lane.b32.xlu0 %v4719_v59, %s4413_s27  ;;  %1022 = vmatpush.msrb.mxu3 %v760_v57 }
 0x140   : > { %1068 = vmatpush.msra.mxu2 %v750_v58  ;;  %1023 = vmatmul.f32.vlgmr.msrb.gmra.mxu3 %v4701_v35 }
 0x141   : > { %1087 = vmatpush.msra.mxu3 %v852_v60 }
 0x142   : > { %1069 = vmatpush.msra.mxu2 %v744_v61 }
 0x144   : > { %1070 = vmatpush.msra.mxu2 %v738_v62 }
 0x146   : > { %1071 = vmatpush.msra.mxu2 %v732_v0 }
 0x147   : > { %1369 = vrot.lane.b32.xlu0 %v4719_v59, %s4414_s19 }
 0x148   : > { %1072 = vmatpush.msra.mxu2 %v726_v2 }
 0x14a   : > { %1073 = vmatpush.msra.mxu2 %v720_v4  ;;  %v924_v33 = vpop.f32.mrf.mxu2 }
 0x14c   : > { %1074 = vmatpush.msra.mxu2 %v714_v6 }
 0x14e   : > { %1075 = vmatpush.msra.mxu2 %v708_v8 }
 0x14f   : > { %v944_v37 = vpop.f32.mrf.mxu3 }
 0x150   : > { %1076 = vmatpush.msra.mxu2 %v702_v10 }
 0x152   : > { %v1044_v24 = vpop.f32.mrf.mxu0  ;;  %1077 = vmatpush.msra.mxu2 %v696_v12 }
 0x153   : > { %v1064_v25 = vpop.f32.mrf.mxu1  ;;  %v1045_v27 = vadd.f32 %v1044_v24, %v859_v20  ;;  %v672_v20 = vld [vmem:[#allocation7 + $0x58] sm:$0xff]  ;;  %v762_v24 = vld [vmem:[#allocation7 + $0x328] sm:$0xff] }
 0x154   : > { %1078 = vmatpush.msra.mxu2 %v690_v14 }
 0x155   : > { %v4730_v30 = vadd.f32 %v1064_v25, %v1045_v27  ;;  %v1281_v25 = vld [vmem:[#allocation10 + $0x70] sm:$0xff] }
 0x156   : > { %1079 = vmatpush.msra.mxu2 %v684_v16  ;;  %1298 = vmatpush.msra.mxu0 %v1281_v25  ;;  %v1277_v27 = vld [vmem:[#allocation10 + $0x50] sm:$0xff] }
 0x157   : > { %1249 = vrot.lane.b32.xlu2 %v4730_v30, %s4413_s27  ;;  %1183 = vmatpush.msrb.mxu1 %v4730_v30 }
 0x158   : > { %1080 = vmatpush.msra.mxu2 %v678_v18  ;;  %1299 = vmatpush.msra.mxu0 %v1279_v26 }
 0x15a   : > { %1081 = vmatpush.msra.mxu2 %v672_v20  ;;  %1300 = vmatpush.msra.mxu0 %v1277_v27 }
 0x15c   : > { %1082 = vmatpush.msra.mxu2 %v666_v22  ;;  %1301 = vmatpush.msra.mxu0 %v1275_v28 }
 0x15d   : > { %1083 = vmatmul.f32.vlgmr.msra.gmra.mxu2 %v4698_v34 }
 0x15f   : > { %1371 = vrot.lane.b32.xlu2 %v4713_v53, %s4414_s19 }
 0x167   : > { %1500 = vrot.lane.b32.xlu2 %v4719_v59, %s4415_s17  ;;  %v846_v59 = vld [vmem:[#allocation7 + $0x5c8] sm:$0xff] }
 0x168   : > { %1088 = vmatpush.msra.mxu3 %v846_v59 }
 0x16a   : > { %1089 = vmatpush.msra.mxu3 %v840_v63 }
 0x16c   : > { %1090 = vmatpush.msra.mxu3 %v834_v1 }
 0x16e   : > { %1091 = vmatpush.msra.mxu3 %v828_v3 }
 0x170   : > { %1092 = vmatpush.msra.mxu3 %v822_v5 }
 0x172   : > { %1093 = vmatpush.msra.mxu3 %v816_v7 }
 0x174   : > { %1094 = vmatpush.msra.mxu3 %v810_v9 }
 0x176   : > { %1095 = vmatpush.msra.mxu3 %v804_v11 }
 0x178   : > { %1096 = vmatpush.msra.mxu3 %v798_v13 }
 0x17a   : > { %1097 = vmatpush.msra.mxu3 %v792_v15 }
 0x17c   : > { %1098 = vmatpush.msra.mxu3 %v786_v17 }
 0x17e   : > { %1099 = vmatpush.msra.mxu3 %v780_v19 }
 0x180   : > { %1100 = vmatpush.msra.mxu3 %v774_v21 }
 0x182   : > { %1101 = vmatpush.msra.mxu3 %v768_v23 }
 0x184   : > { %1102 = vmatpush.msra.mxu3 %v762_v24 }
 0x185   : > { %1103 = vmatmul.f32.vlgmr.msra.gmra.mxu3 %v4701_v35  ;;  %v856_v35 = vperm.slane %v4709_v42, 1 }
 0x187   : > { %v925_v36 = vadd.f32 %v924_v33, %v856_v35 }
 0x189   : > { %v945_v38 = vadd.f32 %v944_v37, %v925_v36 }
 0x18b   : > { %v1108_v39 = vmul.f32 0.17677669, %v945_v38 }
 0x18d   : > { %1757 = vrot.lane.b32.xlu2 %v1108_v39, %s4413_s27 }
 0x195   : > { %1889 = vrot.lane.b32.xlu2 %v1108_v39, %s4414_s19 }
 0x19d   : > { %2020 = vrot.lane.b32.xlu2 %v1108_v39, %s4415_s17 }
 0x1a9   : > { %v1199_v29 = vpop.permute.xlu0 %1198 }
 0x1aa   : > { %3723 = vmatpush.xpose.msk.msrb.mxu2 %vm1113_vm0, %v1199_v29 }
 0x1b1   : > { %v1250_v31 = vpop.permute.xlu2 %1249  ;;  %v1197_v32 = vpop.permute.xlu0 %1196 }
 0x1b2   : > { %3724 = vmatmul.msk.f32.vlgmr.msrb.gmra.mxu2 %vm1113_vm0, %v1197_v32  ;;  %1270 = vmatpush.msrb.mxu3 %v1250_v31 }
 0x1b7   : > { %v1137_v57 = vpop.f32.mrf.mxu0 }
 0x1b8   : > { %v1138_v58 = vadd.f32 %v4758_v47, %v1137_v57 }
 0x1b9   : > { %v1372_v34 = vpop.permute.xlu2 %1371  ;;  %v1370_v10 = vpop.permute.xlu0 %1369 }
 0x1ba   : > { %3730 = vmatpush.xpose.msk.msrb.mxu0 %vm1113_vm0, %v1372_v34  ;;  %v1141_v60 = vsel %vm1140_vm1, %v1138_v58, -inf }
 0x1c0   : > { %v1004_v41 = vpop.f32.mrf.mxu2 }
 0x1c1   : > { %v1005_v43 = vadd.f32 %v1004_v41, %v858_v40  ;;  %v1501_v12 = vpop.permute.xlu2 %1500 }
 0x1c3   : > { %v1024_v44 = vpop.f32.mrf.mxu3 }
 0x1c4   : > { %v1025_v45 = vadd.f32 %v1024_v44, %v1005_v43 }
 0x1c6   : > { %1759 = vrot.lane.b32.xlu0 %v1025_v45, %s4413_s27 }
 0x1ce   : > { %1891 = vrot.lane.b32.xlu0 %v1025_v45, %s4414_s19 }
 0x1d6   : > { %2022 = vrot.lane.b32.xlu0 %v1025_v45, %s4415_s17 }
 0x1e0   : > { %v4754_v46 = vpop.f32.mrf.mxu2 }
 0x1e7   : > { %v1758_v14 = vpop.permute.xlu2 %1757 }
 0x1ef   : > { %v1890_v16 = vpop.permute.xlu2 %1889 }
 0x1f7   : > { %v2021_v17 = vpop.permute.xlu2 %2020 }
 0x208   : > { %v4768_v7 = vpop.f32.mrf.mxu3 }
 0x235   : > { %v1221_v48 = vpop.f32.mrf.mxu2 }
 0x236   : > { %v1222_v49 = vadd.f32 %v4758_v47, %v1221_v48 }
 0x238   : > { %v1224_v50 = vsel %vm1140_vm1, %v1222_v49, -inf  ;;  %v1760_v11 = vpop.permute.xlu0 %1759 }
 0x239   : > { %1225 = vmax.xlane.f32.xlu1 %v1224_v50 }
 0x240   : > { %v1892_v13 = vpop.permute.xlu0 %1891 }
 0x248   : > { %v2023_v15 = vpop.permute.xlu0 %2022 }
 0x2ac   : > { %v1226_v51 = vpop.xlane.xlu1 %1225 }
 0x2ad   : > { %v1227_v52 = vsub.f32 %v1222_v49, %v1226_v51 }
 0x2af   : > { %v1228_v54 = vmul.f32 1.442695, %v1227_v52 }
 0x2b1   : > { %3920 = vpow2.f32 %v1228_v54 }
 0x2b7   : > { %v3921_v55 = vpop.eup %3920 }
 0x2b8   : > { %v1230_v56 = vsel %vm1140_vm1, %v3921_v55, 0.0 }
 0x2b9   : > { %1231 = vadd.xlane.f32.xlu1 %v1230_v56  ;;  %v1278_v56 = vld [vmem:[#allocation10 + $0x58] sm:$0xff] }
 0x2d2   : > { %1502 = vrot.lane.b32.xlu1 %v4713_v53, %s4415_s17 }
 0x2fc   : > { %1142 = vmax.xlane.f32.xlu1 %v1141_v60  ;;  %v1276_v60 = vld [vmem:[#allocation10 + $0x48] sm:$0xff] }
 0x32c   : > { %v1232_v61 = vpop.xlane.xlu1 %1231 }
 0x32d   : > { %3922 = vrcp.f32 %v1232_v61  ;;  %v1244_v0 = vand.u32 2147483648, %v1232_v61  ;;  %v1242_v2 = vand.u32 2147483647, %v1232_v61  ;;  %vm1238_vm3 = vweird.f32 %v1232_v61 }
 0x32f   : > { %v1245_v4 = vor.u32 1.1754944e-38, %v1244_v0  ;;  %vm1243_vm5 = vcmp.eq.f32.partialorder %v1242_v2, 8.507059e+37 }
 0x333   : > { %v3923_v59 = vpop.eup %3922 }
 0x334   : > { %v1234_v62 = vmul.f32 %v3923_v59, %v1232_v61  ;;  %vm1239_vm2 = vweird.f32 %v3923_v59 }
 0x335   : > { %vm1240_vm4 = vmor %vm1238_vm3, %vm1239_vm2 }
 0x336   : > { %v1235_v63 = vsub.f32 1.0, %v1234_v62 }
 0x338   : > { %v1236_v1 = vmul.f32 %v3923_v59, %v1235_v63 }
 0x33a   : > { %v1237_v3 = vadd.f32 %v3923_v59, %v1236_v1 }
 0x33c   : > { %v1241_v53 = vsel %vm1240_vm4, %v3923_v59, %v1237_v3 }
 0x33d   : > { %v1246_v5 = vsel %vm1243_vm5, %v1245_v4, %v1241_v53 }
 0x33e   : > { %v1247_v6 = vmul.f32 %v3921_v55, %v1246_v5  ;;  %v1280_v55 = vld [vmem:[#allocation10 + $0x68] sm:$0xff]  ;;  %v860_v5 = vperm.slane %v4709_v42, 5 }
 0x340   : > { %3725 = vmatmul.msk.f32.vlgmr.msrb.gmra.mxu3 %vm1140_vm1, %v1247_v6 }
 0x344   : > { %v1503_v9 = vpop.permute.xlu1 %1502 }
 0x36f   : > { %v1143_v22 = vpop.xlane.xlu1 %1142 }
 0x370   : > { %v1144_v25 = vsub.f32 %v1138_v58, %v1143_v22 }
 0x372   : > { %v1145_v27 = vmul.f32 1.442695, %v1144_v25 }
 0x374   : > { %3924 = vpow2.f32 %v1145_v27 }
 0x37a   : > { %v4793_v32 = vpop.eup %3924 }
 0x37b   : > { %v1147_v36 = vsel %vm1140_vm1, %v4793_v32, 0.0 }
 0x3c3   : > { %v4770_v8 = vpop.f32.mrf.mxu3 }
 0x3c4   : > { %3726 = vmatmul.msk.f32.vlgmr.msra.gmra.mxu0 %vm1113_vm0, %v4770_v8 }
 0x3c5   : > { %3735 = vmatpush.xpose.msk.msra.mxu0 %vm1113_vm0, %v1503_v9 }
 0x3cc   : > { %3731 = vmatmul.msk.f32.vlgmr.msrb.gmra.mxu0 %vm1113_vm0, %v1370_v10 }
 0x3cd   : > { %3740 = vmatpush.xpose.msk.msrb.mxu0 %vm1113_vm0, %v1025_v45 }
 0x3d4   : > { %3736 = vmatmul.msk.f32.vlgmr.msra.gmra.mxu0 %vm1113_vm0, %v1501_v12 }
 0x3d5   : > { %3745 = vmatpush.xpose.msk.msra.mxu0 %vm1113_vm0, %v1760_v11 }
 0x3dc   : > { %3741 = vmatmul.msk.f32.vlgmr.msrb.gmra.mxu0 %vm1113_vm0, %v1108_v39 }
 0x3dd   : > { %3750 = vmatpush.xpose.msk.msrb.mxu0 %vm1113_vm0, %v1892_v13  ;;  %v1085_v13 = vadd.f32 %v4754_v46, %v860_v5 }
 0x3e4   : > { %3746 = vmatmul.msk.f32.vlgmr.msra.gmra.mxu0 %vm1113_vm0, %v1758_v14 }
 0x3e5   : > { %3755 = vmatpush.xpose.msk.msra.mxu0 %vm1113_vm0, %v2023_v15 }
 0x3ec   : > { %3751 = vmatmul.msk.f32.vlgmr.msrb.gmra.mxu0 %vm1113_vm0, %v1890_v16 }
 0x3f4   : > { %3756 = vmatmul.msk.f32.vlgmr.msra.gmra.mxu0 %vm1113_vm0, %v2021_v17 }
 0x441   : > { %v4785_v18 = vpop.f32.mrf.mxu0 }
 0x449   : > { %v1394_v19 = vpop.f32.mrf.mxu0 }
 0x44a   : > { %v1395_v20 = vadd.f32 %v4758_v47, %v1394_v19 }
 0x44c   : > { %v1397_v21 = vsel %vm1140_vm1, %v1395_v20, -inf }
 0x44d   : > { %1398 = vmax.xlane.f32.xlu0 %v1397_v21 }
 0x451   : > { %v1525_v23 = vpop.f32.mrf.mxu0 }
 0x452   : > { %v1526_v24 = vadd.f32 %v4758_v47, %v1525_v23 }
 0x454   : > { %v1528_v26 = vsel %vm1140_vm1, %v1526_v24, -inf }
 0x455   : > { %1529 = vmax.xlane.f32.xlu2 %v1528_v26 }
 0x459   : > { %v1654_v28 = vpop.f32.mrf.mxu0 }
 0x45a   : > { %v1655_v29 = vadd.f32 %v4758_v47, %v1654_v28 }
 0x45c   : > { %v1657_v31 = vsel %vm1140_vm1, %v1655_v29, -inf }
 0x45d   : > { %1658 = vmax.xlane.f32.xlu1 %v1657_v31 }
 0x461   : > { %v1782_v34 = vpop.f32.mrf.mxu0 }
 0x462   : > { %v1783_v35 = vadd.f32 %v4758_v47, %v1782_v34  ;;  %v1195_v34 = vld [vmem:[#allocation10 + $0x38] sm:$0xff] }
 0x463   : > { %1361 = vmatpush.msra.mxu3 %v1195_v34 }
 0x464   : > { %v1785_v33 = vsel %vm1140_vm1, %v1783_v35, -inf }
 0x465   : > { %1786 = vmax.xlane.f32.xlu2 %v1785_v33  ;;  %1148 = vadd.xlane.f32.xlu1 %v1147_v36  ;;  %v1193_v33 = vld [vmem:[#allocation10 + $0x28] sm:$0xff]  ;;  %v1190_v36 = vld [vmem:[#allocation10 + $0x10] sm:$0xff] }
 0x466   : > { %1362 = vmatpush.msra.mxu3 %v1193_v33  ;;  %v1453_v33 = vld [vmem:[#allocation10 + $0xb0] sm:$0xff] }
 0x469   : > { %v1914_v37 = vpop.f32.mrf.mxu0 }
 0x46a   : > { %v1915_v38 = vadd.f32 %v4758_v47, %v1914_v37  ;;  %v1191_v37 = vld [vmem:[#allocation10 + $0x18] sm:$0xff] }
 0x46b   : > { %1363 = vmatpush.msra.mxu3 %v1191_v37  ;;  %v1452_v37 = vld [vmem:[#allocation10 + $0xa8] sm:$0xff] }
 0x46c   : > { %v1917_v39 = vsel %vm1140_vm1, %v1915_v38, -inf }
 0x46d   : > { %1918 = vmax.xlane.f32.xlu0 %v1917_v39 }
 0x471   : > { %v2045_v40 = vpop.f32.mrf.mxu0 }
 0x472   : > { %v4802_v41 = vadd.f32 %v4758_v47, %v2045_v40  ;;  %v1282_v47 = vld [vmem:[#allocation10 + $0x78] sm:$0xff]  ;;  %v1189_v40 = vld [vmem:[#allocation10 + $0x8] sm:$0xff] }
 0x473   : > { %1318 = vmatpush.msra.mxu1 %v1282_v47  ;;  %1364 = vmatpush.msra.mxu3 %v1189_v40 }
 0x474   : > { %v2048_v43 = vsel %vm1140_vm1, %v4802_v41, -inf }
 0x475   : > { %2049 = vmax.xlane.f32.xlu2 %v2048_v43  ;;  %1319 = vmatpush.msra.mxu1 %v1280_v55 }
 0x477   : > { %1320 = vmatpush.msra.mxu1 %v1278_v56 }
 0x479   : > { %1321 = vmatpush.msra.mxu1 %v1276_v60 }
 0x4c0   : > { %v1399_v44 = vpop.xlane.xlu0 %1398 }
 0x4c1   : > { %v1400_v45 = vsub.f32 %v1395_v20, %v1399_v44  ;;  %v4827_v20 = vadd.f32 %v4768_v7, %v1085_v13 }
 0x4c3   : > { %v1401_v48 = vmul.f32 1.442695, %v1400_v45 }
 0x4c5   : > { %3926 = vpow2.f32 %v1401_v48 }
 0x4c8   : > { %v1530_v49 = vpop.xlane.xlu2 %1529 }
 0x4c9   : > { %v1531_v50 = vsub.f32 %v1526_v24, %v1530_v49 }
 0x4cb   : > { %v4806_v51 = vpop.eup %3926  ;;  %v1532_v52 = vmul.f32 1.442695, %v1531_v50 }
 0x4cc   : > { %v1403_v54 = vsel %vm1140_vm1, %v4806_v51, 0.0 }
 0x4cd   : > { %3928 = vpow2.f32 %v1532_v52  ;;  %1404 = vadd.xlane.f32.xlu0 %v1403_v54 }
 0x4d0   : > { %v1659_v57 = vpop.xlane.xlu1 %1658 }
 0x4d1   : > { %v1660_v58 = vsub.f32 %v1655_v29, %v1659_v57 }
 0x4d3   : > { %v4810_v61 = vpop.eup %3928  ;;  %v1661_v59 = vmul.f32 1.442695, %v1660_v58 }
 0x4d4   : > { %v1534_v62 = vsel %vm1140_vm1, %v4810_v61, 0.0 }
 0x4d5   : > { %3930 = vpow2.f32 %v1661_v59  ;;  %1535 = vadd.xlane.f32.xlu1 %v1534_v62 }
 0x4d8   : > { %v1787_v63 = vpop.xlane.xlu2 %1786  ;;  %v1149_v0 = vpop.xlane.xlu1 %1148 }
 0x4d9   : > { %v1788_v1 = vsub.f32 %v1783_v35, %v1787_v63  ;;  %3932 = vrcp.f32 %v1149_v0  ;;  %v1161_v14 = vand.u32 2147483648, %v1149_v0  ;;  %v1159_v17 = vand.u32 2147483647, %v1149_v0  ;;  %v1192_v35 = vld [vmem:[#allocation10 + $0x20] sm:$0xff] }
 0x4da   : > { %vm1155_vm7 = vweird.f32 %v1149_v0 }
 0x4db   : > { %v4814_v2 = vpop.eup %3930  ;;  %v1789_v3 = vmul.f32 1.442695, %v1788_v1  ;;  %v1162_v21 = vor.u32 1.1754944e-38, %v1161_v14  ;;  %vm1160_vm9 = vcmp.eq.f32.partialorder %v1159_v17, 8.507059e+37 }
 0x4dc   : > { %v1663_v4 = vsel %vm1140_vm1, %v4814_v2, 0.0 }
 0x4dd   : > { %3934 = vpow2.f32 %v1789_v3  ;;  %1664 = vadd.xlane.f32.xlu2 %v1663_v4 }
 0x4df   : > { %v3933_v53 = vpop.eup %3932 }
 0x4e0   : > { %v1151_v6 = vmul.f32 %v3933_v53, %v1149_v0  ;;  %v1919_v9 = vpop.xlane.xlu0 %1918  ;;  %vm1156_vm6 = vweird.f32 %v3933_v53 }
 0x4e1   : > { %v1920_v10 = vsub.f32 %v1915_v38, %v1919_v9  ;;  %1421 = vrot.lane.b32.xlu0 %v4730_v30, %s4414_s19  ;;  %vm1157_vm8 = vmor %vm1155_vm7, %vm1156_vm6 }
 0x4e2   : > { %v1152_v11 = vsub.f32 1.0, %v1151_v6 }
 0x4e3   : > { %v4821_v12 = vpop.eup %3934  ;;  %v1921_v15 = vmul.f32 1.442695, %v1920_v10 }
 0x4e4   : > { %v1153_v16 = vmul.f32 %v3933_v53, %v1152_v11  ;;  %v1791_v19 = vsel %vm1140_vm1, %v4821_v12, 0.0 }
 0x4e5   : > { %3936 = vpow2.f32 %v1921_v15  ;;  %1792 = vadd.xlane.f32.xlu1 %v1791_v19 }
 0x4e6   : > { %v1154_v42 = vadd.f32 %v3933_v53, %v1153_v16 }
 0x4e8   : > { %v1158_v22 = vsel %vm1157_vm8, %v3933_v53, %v1154_v42  ;;  %v2050_v46 = vpop.xlane.xlu2 %2049 }
 0x4e9   : > { %v1163_v23 = vsel %vm1160_vm9, %v1162_v21, %v1158_v22  ;;  %v2051_v24 = vsub.f32 %v4802_v41, %v2050_v46  ;;  %1810 = vrot.lane.b32.xlu0 %v4827_v20, %s4413_s27  ;;  %s3518_s27 = sshll.u32 %s3514_s21, 4  ;;  %s3519_s27 = int_to_ptr.hbm [resolvable:$true] %s3518_s27 }
 0x4ea   : > { %v1164_v25 = vmul.f32 %v4793_v32, %v1163_v23  ;;  %v1194_v32 = vld [vmem:[#allocation10 + $0x30] sm:$0xff] }
 0x4eb   : > { %v4833_v26 = vpop.eup %3936  ;;  %v2052_v27 = vmul.f32 1.442695, %v2051_v24  ;;  %1341 = vmatpush.msra.mxu2 %v1194_v32 }
 0x4ec   : > { %3722 = vmatmul.msk.f32.vlgmr.msrb.gmra.mxu1 %vm1140_vm1, %v1164_v25  ;;  %v1923_v7 = vsel %vm1140_vm1, %v4833_v26, 0.0 }
 0x4ed   : > { %3938 = vpow2.f32 %v2052_v27  ;;  %1924 = vadd.xlane.f32.xlu1 %v1923_v7  ;;  %1342 = vmatpush.msra.mxu2 %v1192_v35 }
 0x4ef   : > { %1343 = vmatpush.msra.mxu2 %v1190_v36  ;;  %v1451_v36 = vld [vmem:[#allocation10 + $0xa0] sm:$0xff] }
 0x4f1   : > { %2072 = vrot.lane.b32.xlu0 %v4827_v20, %s4415_s17 }
 0x4f3   : > { %v4840_v28 = vpop.eup %3938 }
 0x4f4   : > { %3727 = vmatmul.msk.f32.vlgmr.msra.gmra.mxu1 %vm1113_vm0, %v4770_v8  ;;  %v2054_v29 = vsel %vm1140_vm1, %v4840_v28, 0.0 }
 0x4f5   : > { %2055 = vadd.xlane.f32.xlu1 %v2054_v29  ;;  %1552 = vrot.lane.b32.xlu2 %v4730_v30, %s4415_s17  ;;  %v1188_v30 = vld [vmem:[#allocation10] sm:$0xff]  ;;  %s4320_s17 = sshra.s32 %s3519_s27, 4  ;;  %s4321_s17 = int_to_ptr.hbm [resolvable:$true] %s4320_s17 }
 0x4f6   : > { %1344 = vmatpush.msra.mxu2 %v1188_v30  ;;  %s4322_s14 = scalar_lea.hbm %s4321_s17, 16  ;;  %p4327_p7 = scmp.lt.s32.totalorder %s4321_s17, %s5115_s10 }
 0x4f7   : > { %p4323_p1 = scmp.ne.s32.totalorder %s4321_s17, %s4322_s14  ;;  %p4328_p9 = scmp.lt.s32.totalorder %s4326_s7, %s4322_s14 }
 0x4f8   : > { %1470 = vmatpush.msrb.mxu2 %v1453_v33  ;;  %v1970_v33 = vld [vmem:[#allocation10 + $0x198] sm:$0xff] }
 0x4f9   : > { %p4324_p3 = pnand %p4323_p1, %p4602_p0  ;;  %p4329_p8 = por %p4328_p9, %p4327_p7 }
 0x4fa   : > { %1471 = vmatpush.msrb.mxu2 %v1451_v36  ;;  %v1968_v36 = vld [vmem:[#allocation10 + $0x188] sm:$0xff] }
 0x4fb   : > { %p4325_p13 = pneg %p4324_p3 }
 0x4fd   : > { %p4330_p10 = pnand %p4329_p8, %p4325_p13 }
 0x50e   : > { %1941 = vrot.lane.b32.xlu1 %v4827_v20, %s4414_s19  ;;  %s3503_s19 = scalar_lea.sflag [#allocation4], %s4659_s4 }
 0x540   : > { %v1405_v31 = vpop.xlane.xlu0 %1404 }
 0x541   : > { %3940 = vrcp.f32 %v1405_v31  ;;  %v1417_v43 = vand.u32 2147483648, %v1405_v31  ;;  %v1415_v45 = vand.u32 2147483647, %v1405_v31  ;;  %vm1411_vm11 = vweird.f32 %v1405_v31 }
 0x543   : > { %v1418_v50 = vor.u32 1.1754944e-38, %v1417_v43  ;;  %vm1416_vm13 = vcmp.eq.f32.partialorder %v1415_v45, 8.507059e+37 }
 0x547   : > { %v3941_v8 = vpop.eup %3940 }
 0x548   : > { %v1407_v38 = vmul.f32 %v3941_v8, %v1405_v31  ;;  %v1536_v39 = vpop.xlane.xlu1 %1535  ;;  %vm1412_vm10 = vweird.f32 %v3941_v8 }
 0x549   : > { %3942 = vrcp.f32 %v1536_v39  ;;  %vm1413_vm12 = vmor %vm1411_vm11, %vm1412_vm10  ;;  %v1548_v58 = vand.u32 2147483648, %v1536_v39  ;;  %v1546_v62 = vand.u32 2147483647, %v1536_v39  ;;  %vm1542_vm15 = vweird.f32 %v1536_v39 }
 0x54a   : > { %v1408_v41 = vsub.f32 1.0, %v1407_v38  ;;  %v1449_v38 = vld [vmem:[#allocation10 + $0x90] sm:$0xff] }
 0x54b   : > { %v1549_v1 = vor.u32 1.1754944e-38, %v1548_v58  ;;  %vm1547_vm3 = vcmp.eq.f32.partialorder %v1546_v62, 8.507059e+37  ;;  %1472 = vmatpush.msrb.mxu2 %v1449_v38  ;;  %v2105_v38 = vld [vmem:[#allocation10 + $0x1f8] sm:$0xff] }
 0x54c   : > { %v1409_v44 = vmul.f32 %v3941_v8, %v1408_v41 }
 0x54e   : > { %v1410_v48 = vadd.f32 %v3941_v8, %v1409_v44 }
 0x54f   : > { %v3943_v49 = vpop.eup %3942 }
 0x550   : > { %v1414_v52 = vsel %vm1413_vm12, %v3941_v8, %v1410_v48  ;;  %v1538_v54 = vmul.f32 %v3943_v49, %v1536_v39  ;;  %v1665_v47 = vpop.xlane.xlu2 %1664  ;;  %vm1543_vm14 = vweird.f32 %v3943_v49  ;;  %v1454_v8 = vld [vmem:[#allocation10 + $0xb8] sm:$0xff] }
 0x551   : > { %v1419_v55 = vsel %vm1416_vm13, %v1418_v50, %v1414_v52  ;;  %3944 = vrcp.f32 %v1665_v47  ;;  %vm1544_vm2 = vmor %vm1542_vm15, %vm1543_vm14  ;;  %v1677_v10 = vand.u32 2147483648, %v1665_v47  ;;  %v1675_v14 = vand.u32 2147483647, %v1665_v47  ;;  %1490 = vmatpush.msrb.mxu3 %v1454_v8  ;;  %v1450_v39 = vld [vmem:[#allocation10 + $0x98] sm:$0xff]  ;;  %v1967_v8 = vld [vmem:[#allocation10 + $0x180] sm:$0xff] }
 0x552   : > { %v1539_v56 = vsub.f32 1.0, %v1538_v54  ;;  %v1420_v57 = vmul.f32 %v4806_v51, %v1419_v55  ;;  %vm1671_vm5 = vweird.f32 %v1665_v47 }
 0x553   : > { %v1422_v60 = vpop.permute.xlu0 %1421  ;;  %v1678_v17 = vor.u32 1.1754944e-38, %v1677_v10  ;;  %vm1676_vm7 = vcmp.eq.f32.partialorder %v1675_v14, 8.507059e+37  ;;  %1491 = vmatpush.msrb.mxu3 %v1452_v37  ;;  %v2104_v37 = vld [vmem:[#allocation10 + $0x1f0] sm:$0xff] }
 0x554   : > { %v1540_v59 = vmul.f32 %v3943_v49, %v1539_v56  ;;  %1442 = vmatpush.msrb.mxu1 %v1422_v60 }
 0x555   : > { %3732 = vmatmul.msk.f32.vlgmr.msrb.gmra.mxu1 %vm1140_vm1, %v1420_v57  ;;  %1492 = vmatpush.msrb.mxu3 %v1450_v39 }
 0x556   : > { %v1541_v63 = vadd.f32 %v3943_v49, %v1540_v59 }
 0x557   : > { %v3945_v0 = vpop.eup %3944 }
 0x558   : > { %v1545_v3 = vsel %vm1544_vm2, %v3943_v49, %v1541_v63  ;;  %v1667_v4 = vmul.f32 %v3945_v0, %v1665_v47  ;;  %v1553_v53 = vpop.permute.xlu2 %1552  ;;  %v1793_v5 = vpop.xlane.xlu1 %1792  ;;  %vm1672_vm4 = vweird.f32 %v3945_v0 }
 0x559   : > { %v1550_v6 = vsel %vm1547_vm3, %v1549_v1, %v1545_v3  ;;  %3946 = vrcp.f32 %v1793_v5  ;;  %1573 = vmatpush.msra.mxu1 %v1553_v53  ;;  %vm1673_vm6 = vmor %vm1671_vm5, %vm1672_vm4  ;;  %v1805_v46 = vand.u32 2147483648, %v1793_v5  ;;  %v1803_v24 = vand.u32 2147483647, %v1793_v5  ;;  %v1447_v1 = vld [vmem:[#allocation10 + $0x80] sm:$0xff]  ;;  %v1448_v3 = vld [vmem:[#allocation10 + $0x88] sm:$0xff] }
 0x55a   : > { %v1668_v51 = vsub.f32 1.0, %v1667_v4  ;;  %v1551_v9 = vmul.f32 %v4810_v61, %v1550_v6  ;;  %vm1799_vm9 = vweird.f32 %v1793_v5  ;;  %1473 = vmatpush.msrb.mxu2 %v1447_v1  ;;  %1493 = vmatpush.msrb.mxu3 %v1448_v3  ;;  %v1584_v4 = vld [vmem:[#allocation10 + $0xf0] sm:$0xff]  ;;  %v1582_v53 = vld [vmem:[#allocation10 + $0xe0] sm:$0xff] }
 0x55b   : > { %1699 = vmatpush.msrb.mxu1 %v4827_v20  ;;  %v1811_v11 = vpop.permute.xlu0 %1810  ;;  %v1806_v7 = vor.u32 1.1754944e-38, %v1805_v46  ;;  %vm1804_vm11 = vcmp.eq.f32.partialorder %v1803_v24, 8.507059e+37  ;;  %v1580_v6 = vld [vmem:[#allocation10 + $0xd0] sm:$0xff]  ;;  %v1840_v46 = vld [vmem:[#allocation10 + $0x160] sm:$0xff] }
 0x55c   : > { %v1669_v13 = vmul.f32 %v3945_v0, %v1668_v51  ;;  %v1581_v51 = vld [vmem:[#allocation10 + $0xd8] sm:$0xff]  ;;  %v1838_v24 = vld [vmem:[#allocation10 + $0x150] sm:$0xff] }
 0x55d   : > { %3737 = vmatmul.msk.f32.vlgmr.msra.gmra.mxu1 %vm1140_vm1, %v1551_v9  ;;  %v1578_v9 = vld [vmem:[#allocation10 + $0xc0] sm:$0xff] }
 0x55e   : > { %v1670_v15 = vadd.f32 %v3945_v0, %v1669_v13  ;;  %1831 = vmatpush.msra.mxu1 %v1811_v11  ;;  %v1710_v11 = vld [vmem:[#allocation10 + $0x130] sm:$0xff]  ;;  %v1711_v13 = vld [vmem:[#allocation10 + $0x138] sm:$0xff] }
 0x55f   : > { %v3947_v16 = vpop.eup %3946 }
 0x560   : > { %v1674_v19 = vsel %vm1673_vm6, %v3945_v0, %v1670_v15  ;;  %v1795_v42 = vmul.f32 %v3947_v16, %v1793_v5  ;;  %v1925_v21 = vpop.xlane.xlu1 %1924  ;;  %vm1800_vm8 = vweird.f32 %v3947_v16  ;;  %v1583_v5 = vld [vmem:[#allocation10 + $0xe8] sm:$0xff]  ;;  %v1708_v15 = vld [vmem:[#allocation10 + $0x120] sm:$0xff] }
 0x561   : > { %v1679_v20 = vsel %vm1676_vm7, %v1678_v17, %v1674_v19  ;;  %3948 = vrcp.f32 %v1925_v21  ;;  %vm1801_vm10 = vmor %vm1799_vm9, %vm1800_vm8  ;;  %v1937_v45 = vand.u32 2147483648, %v1925_v21  ;;  %vm1931_vm13 = vweird.f32 %v1925_v21  ;;  %v1706_v17 = vld [vmem:[#allocation10 + $0x110] sm:$0xff]  ;;  %v1707_v19 = vld [vmem:[#allocation10 + $0x118] sm:$0xff] }
 0x562   : > { %v1796_v61 = vsub.f32 1.0, %v1795_v42  ;;  %v1680_v22 = vmul.f32 %v4814_v2, %v1679_v20  ;;  %v1935_v48 = vand.u32 2147483647, %v1925_v21  ;;  %v1704_v42 = vld [vmem:[#allocation10 + $0x100] sm:$0xff]  ;;  %v1842_v20 = vld [vmem:[#allocation10 + $0x170] sm:$0xff] }
 0x563   : > { %v1938_v52 = vor.u32 1.1754944e-38, %v1937_v45  ;;  %v2073_v60 = vpop.permute.xlu0 %2072 }
 0x564   : > { %v1797_v23 = vmul.f32 %v3947_v16, %v1796_v61  ;;  %vm1936_vm15 = vcmp.eq.f32.partialorder %v1935_v48, 8.507059e+37  ;;  %v1843_v61 = vld [vmem:[#allocation10 + $0x178] sm:$0xff] }
 0x565   : > { %3742 = vmatmul.msk.f32.vlgmr.msrb.gmra.mxu1 %vm1140_vm1, %v1680_v22 }
 0x566   : > { %v1798_v25 = vadd.f32 %v3947_v16, %v1797_v23  ;;  %v1841_v23 = vld [vmem:[#allocation10 + $0x168] sm:$0xff] }
 0x567   : > { %v3949_v27 = vpop.eup %3948 }
 0x568   : > { %v1802_v29 = vsel %vm1801_vm10, %v3947_v16, %v1798_v25  ;;  %v2056_v31 = vpop.xlane.xlu1 %2055  ;;  %v1927_v35 = vmul.f32 %v3949_v27, %v1925_v21  ;;  %vm1932_vm12 = vweird.f32 %v3949_v27  ;;  %v1709_v16 = vld [vmem:[#allocation10 + $0x128] sm:$0xff]  ;;  %v1839_v25 = vld [vmem:[#allocation10 + $0x158] sm:$0xff] }
 0x569   : > { %v1807_v32 = vsel %vm1804_vm11, %v1806_v7, %v1802_v29  ;;  %3950 = vrcp.f32 %v2056_v31  ;;  %v1185_v34 = vpop.f32.mrf.mxu1  ;;  %vm1933_vm14 = vmor %vm1931_vm13, %vm1932_vm12  ;;  %v2068_v55 = vand.u32 2147483648, %v2056_v31  ;;  %vm2062_vm3 = vweird.f32 %v2056_v31  ;;  %v1705_v21 = vld [vmem:[#allocation10 + $0x108] sm:$0xff]  ;;  %v1973_v29 = vld [vmem:[#allocation10 + $0x1b0] sm:$0xff] }
 0x56a   : > { %3728 = vmatmul.msk.f32.vlgmr.msra.gmra.mxu2 %vm1113_vm0, %v1185_v34  ;;  %3729 = vmatmul.msk.f32.vlgmr.msra.gmra.mxu3 %vm1113_vm0, %v1185_v34  ;;  %v1808_v2 = vmul.f32 %v4821_v12, %v1807_v32  ;;  %v1928_v30 = vsub.f32 1.0, %v1927_v35  ;;  %v2066_v56 = vand.u32 2147483647, %v2056_v31  ;;  %v1837_v7 = vld [vmem:[#allocation10 + $0x148] sm:$0xff]  ;;  %v1971_v34 = vld [vmem:[#allocation10 + $0x1a0] sm:$0xff] }
 0x56b   : > { %v2069_v62 = vor.u32 1.1754944e-38, %v2068_v55  ;;  %1601 = vmatpush.msra.mxu2 %v1584_v4  ;;  %v1972_v35 = vld [vmem:[#allocation10 + $0x1a8] sm:$0xff] }
 0x56c   : > { %v1929_v41 = vmul.f32 %v3949_v27, %v1928_v30  ;;  %vm2067_vm5 = vcmp.eq.f32.partialorder %v2066_v56, 8.507059e+37  ;;  %v2102_v30 = vld [vmem:[#allocation10 + $0x1e0] sm:$0xff] }
 0x56d   : > { %3747 = vmatmul.msk.f32.vlgmr.msra.gmra.mxu1 %vm1140_vm1, %v1808_v2  ;;  %1602 = vmatpush.msra.mxu2 %v1582_v53  ;;  %v1969_v2 = vld [vmem:[#allocation10 + $0x190] sm:$0xff] }
 0x56e   : > { %v1930_v44 = vadd.f32 %v3949_v27, %v1929_v41  ;;  %v2100_v41 = vld [vmem:[#allocation10 + $0x1d0] sm:$0xff] }
 0x56f   : > { %v3951_v40 = vpop.eup %3950  ;;  %1603 = vmatpush.msra.mxu2 %v1580_v6  ;;  %v2151_v6 = vld [vmem:[#allocation11] sm:$0x3] }
 0x570   : > { %v2058_v43 = vmul.f32 %v3951_v40, %v2056_v31  ;;  %v1934_v49 = vsel %vm1933_vm14, %v3949_v27, %v1930_v44  ;;  %vm2063_vm2 = vweird.f32 %v3951_v40  ;;  %v1836_v27 = vld [vmem:[#allocation10 + $0x140] sm:$0xff]  ;;  %v1974_v31 = vld [vmem:[#allocation10 + $0x1b8] sm:$0xff] }
 0x571   : > { %v1939_v54 = vsel %vm1936_vm15, %v1938_v52, %v1934_v49  ;;  %vm2064_vm4 = vmor %vm2062_vm3, %vm2063_vm2  ;;  %1604 = vmatpush.msra.mxu2 %v1578_v9  ;;  %v4865_v10 = vpop.f32.mrf.mxu1  ;;  %v2098_v44 = vld [vmem:[#allocation10 + $0x1c0] sm:$0xff] }
 0x572   : > { %v2059_v12 = vsub.f32 1.0, %v2058_v43  ;;  %v1940_v58 = vmul.f32 %v4833_v26, %v1939_v54  ;;  %v1585_v26 = vld [vmem:[#allocation10 + $0xf8] sm:$0xff] }
 0x573   : > { %1621 = vmatpush.msra.mxu3 %v1585_v26  ;;  %v2101_v43 = vld [vmem:[#allocation10 + $0x1d8] sm:$0xff] }
 0x574   : > { %v2060_v50 = vmul.f32 %v3951_v40, %v2059_v12  ;;  %v2099_v12 = vld [vmem:[#allocation10 + $0x1c8] sm:$0xff] }
 0x575   : > { %1622 = vmatpush.msra.mxu3 %v1583_v5 }
 0x576   : > { %v2061_v47 = vadd.f32 %v3951_v40, %v2060_v50 }
 0x577   : > { %1623 = vmatpush.msra.mxu3 %v1581_v51 }
 0x578   : > { %v2065_v59 = vsel %vm2064_vm4, %v3951_v40, %v2061_v47  ;;  %v2103_v40 = vld [vmem:[#allocation10 + $0x1e8] sm:$0xff] }
 0x579   : > { %v2070_v63 = vsel %vm2067_vm5, %v2069_v62, %v2065_v59 }
 0x57a   : > { %v2071_v0 = vmul.f32 %v4840_v28, %v2070_v63  ;;  %v1579_v28 = vld [vmem:[#allocation10 + $0xc8] sm:$0xff] }
 0x57b   : > { %1624 = vmatpush.msra.mxu3 %v1579_v28 }
 0x580   : > { %v1942_v57 = vpop.permute.xlu1 %1941 }
 0x581   : > { %1962 = vmatpush.msrb.mxu1 %v1942_v57 }
 0x582   : > { %3752 = vmatmul.msk.f32.vlgmr.msrb.gmra.mxu1 %vm1140_vm1, %v1940_v58 }
 0x583   : > { %2093 = vmatpush.msra.mxu1 %v2073_v60 }
 0x58a   : > { %3757 = vmatmul.msk.f32.vlgmr.msra.gmra.mxu1 %vm1140_vm1, %v2071_v0 }
 0x5d2   : > { %v1444_v14 = vpop.f32.mrf.mxu1 }
 0x5d3   : > { %3733 = vmatmul.msk.f32.vlgmr.msrb.gmra.mxu2 %vm1113_vm0, %v1444_v14  ;;  %3734 = vmatmul.msk.f32.vlgmr.msrb.gmra.mxu3 %vm1113_vm0, %v1444_v14  ;;  %v2154_v14 = vperm.slane %v2151_v6, 1 }
 0x5d4   : > { %1727 = vmatpush.msrb.mxu2 %v1710_v11  ;;  %1747 = vmatpush.msrb.mxu3 %v1711_v13  ;;  %v2153_v13 = vperm.slane %v2151_v6, 0  ;;  %v2249_v6 = vld [vmem:[#allocation16 + $0x140] sm:$0xff] }
 0x5d6   : > { %1728 = vmatpush.msrb.mxu2 %v1708_v15  ;;  %1748 = vmatpush.msrb.mxu3 %v1709_v16 }
 0x5d8   : > { %1729 = vmatpush.msrb.mxu2 %v1706_v17  ;;  %1749 = vmatpush.msrb.mxu3 %v1707_v19 }
 0x5da   : > { %v1575_v22 = vpop.f32.mrf.mxu1  ;;  %1730 = vmatpush.msrb.mxu2 %v1704_v42  ;;  %1750 = vmatpush.msrb.mxu3 %v1705_v21  ;;  %v3974_v42 = vld [vmem:[%s4665_s12] sm:$0xff] }
 0x5db   : > { %3738 = vmatmul.msk.f32.vlgmr.msra.gmra.mxu2 %vm1113_vm0, %v1575_v22  ;;  %3739 = vmatmul.msk.f32.vlgmr.msra.gmra.mxu3 %vm1113_vm0, %v1575_v22 }
 0x5dc   : > { %1859 = vmatpush.msra.mxu2 %v1842_v20  ;;  %1879 = vmatpush.msra.mxu3 %v1843_v61  ;;  %v3975_v20 = vld [vmem:[%s4665_s12 + $0x8] sm:$0xff] }
 0x5de   : > { %1860 = vmatpush.msra.mxu2 %v1840_v46  ;;  %1880 = vmatpush.msra.mxu3 %v1841_v23  ;;  %v4416_v46 = vmov 256.0   ;;  %v2329_v23 = vld [vmem:[#allocation16 + $0x3c0] sm:$0xff] }
 0x5df   : > { %3952 = vrcp.f32 %v4416_v46  ;;  %2483 = vmatpush.msrb.mxu0 %v2329_v23  ;;  %v2353_v46 = vld [vmem:[#allocation16 + $0x480] sm:$0xff]  ;;  %v2226_v23 = vld [vmem:[#allocation16 + $0x88] sm:$0xff] }
 0x5e0   : > { %1861 = vmatpush.msra.mxu2 %v1838_v24  ;;  %1881 = vmatpush.msra.mxu3 %v1839_v25  ;;  %v2457_v24 = vld [vmem:[#allocation16 + $0x7c0] sm:$0xff]  ;;  %v2330_v25 = vld [vmem:[#allocation16 + $0x3c8] sm:$0xff] }
 0x5e1   : > { %2503 = vmatpush.msrb.mxu1 %v2457_v24  ;;  %v2354_v24 = vld [vmem:[#allocation16 + $0x488] sm:$0xff] }
 0x5e2   : > { %v1701_v32 = vpop.f32.mrf.mxu1  ;;  %1862 = vmatpush.msra.mxu2 %v1836_v27  ;;  %1882 = vmatpush.msra.mxu3 %v1837_v7  ;;  %v2458_v27 = vld [vmem:[#allocation16 + $0x7c8] sm:$0xff]  ;;  %v2321_v7 = vld [vmem:[#allocation16 + $0x380] sm:$0xff] }
 0x5e3   : > { %3743 = vmatmul.msk.f32.vlgmr.msrb.gmra.mxu2 %vm1113_vm0, %v1701_v32  ;;  %3744 = vmatmul.msk.f32.vlgmr.msrb.gmra.mxu3 %vm1113_vm0, %v1701_v32  ;;  %v2322_v32 = vld [vmem:[#allocation16 + $0x388] sm:$0xff] }
 0x5e4   : > { %1990 = vmatpush.msrb.mxu2 %v1973_v29  ;;  %2010 = vmatpush.msrb.mxu3 %v1974_v31  ;;  %v2449_v29 = vld [vmem:[#allocation16 + $0x780] sm:$0xff] }
 0x5e5   : > { %v4889_v31 = vpop.eup %3952  ;;  %2484 = vmatpush.msrb.mxu0 %v2321_v7  ;;  %2504 = vmatpush.msrb.mxu1 %v2449_v29  ;;  %v2217_v7 = vld [vmem:[#allocation16 + $0x40] sm:$0xff] }
 0x5e6   : > { %1991 = vmatpush.msrb.mxu2 %v1971_v34  ;;  %2011 = vmatpush.msrb.mxu3 %v1972_v35  ;;  %v2450_v34 = vld [vmem:[#allocation16 + $0x788] sm:$0xff]  ;;  %v2313_v35 = vld [vmem:[#allocation16 + $0x340] sm:$0xff] }
 0x5e7   : > { %2485 = vmatpush.msrb.mxu0 %v2313_v35  ;;  %v2345_v29 = vld [vmem:[#allocation16 + $0x440] sm:$0xff] }
 0x5e8   : > { %1992 = vmatpush.msrb.mxu2 %v1969_v2  ;;  %2012 = vmatpush.msrb.mxu3 %v1970_v33  ;;  %v2441_v2 = vld [vmem:[#allocation16 + $0x740] sm:$0xff]  ;;  %v2314_v33 = vld [vmem:[#allocation16 + $0x348] sm:$0xff] }
 0x5e9   : > { %2505 = vmatpush.msrb.mxu1 %v2441_v2  ;;  %v2337_v2 = vld [vmem:[#allocation16 + $0x400] sm:$0xff] }
 0x5ea   : > { %v1833_v39 = vpop.f32.mrf.mxu1  ;;  %1993 = vmatpush.msrb.mxu2 %v1967_v8  ;;  %2013 = vmatpush.msrb.mxu3 %v1968_v36  ;;  %v2442_v8 = vld [vmem:[#allocation16 + $0x748] sm:$0xff]  ;;  %v2305_v36 = vld [vmem:[#allocation16 + $0x300] sm:$0xff] }
 0x5eb   : > { %3748 = vmatmul.msk.f32.vlgmr.msra.gmra.mxu2 %vm1113_vm0, %v1833_v39  ;;  %3749 = vmatmul.msk.f32.vlgmr.msra.gmra.mxu3 %vm1113_vm0, %v1833_v39  ;;  %v2306_v39 = vld [vmem:[#allocation16 + $0x308] sm:$0xff] }
 0x5ec   : > { %2121 = vmatpush.msra.mxu2 %v2104_v37  ;;  %2141 = vmatpush.msra.mxu3 %v2105_v38  ;;  %v2433_v37 = vld [vmem:[#allocation16 + $0x700] sm:$0xff]  ;;  %v2167_v38 = vmul.f32 256.0, %v4889_v31 }
 0x5ed   : > { %v1346_v49 = vpop.f32.mrf.mxu2  ;;  %v1366_v50 = vpop.f32.mrf.mxu3  ;;  %2486 = vmatpush.msrb.mxu0 %v2305_v36  ;;  %2506 = vmatpush.msrb.mxu1 %v2433_v37  ;;  %v2331_v36 = vld [vmem:[#allocation16 + $0x3d0] sm:$0xff] }
 0x5ee   : > { %2122 = vmatpush.msra.mxu2 %v2102_v30  ;;  %2142 = vmatpush.msra.mxu3 %v2103_v40  ;;  %v1347_v59 = vadd.f32 %v1346_v49, %v4785_v18  ;;  %v1367_v62 = vadd.f32 %v1366_v50, %v4865_v10  ;;  %v2434_v30 = vld [vmem:[#allocation16 + $0x708] sm:$0xff]  ;;  %v2297_v40 = vld [vmem:[#allocation16 + $0x2c0] sm:$0xff]  ;;  %v2459_v37 = vld [vmem:[#allocation16 + $0x7d0] sm:$0xff] }
 0x5ef   : > { %2487 = vmatpush.msrb.mxu0 %v2297_v40  ;;  %v2290_v49 = vld [vmem:[#allocation16 + $0x288] sm:$0xff]  ;;  %v2451_v40 = vld [vmem:[#allocation16 + $0x790] sm:$0xff] }
 0x5f0   : > { %2123 = vmatpush.msra.mxu2 %v2100_v41  ;;  %2143 = vmatpush.msra.mxu3 %v2101_v43  ;;  %v2425_v41 = vld [vmem:[#allocation16 + $0x6c0] sm:$0xff]  ;;  %v2298_v43 = vld [vmem:[#allocation16 + $0x2c8] sm:$0xff] }
 0x5f1   : > { %2507 = vmatpush.msrb.mxu1 %v2425_v41  ;;  %v2418_v50 = vld [vmem:[#allocation16 + $0x688] sm:$0xff]  ;;  %v2324_v41 = vld [vmem:[#allocation16 + $0x398] sm:$0xff] }
 0x5f2   : > { %2124 = vmatpush.msra.mxu2 %v2098_v44  ;;  %2144 = vmatpush.msra.mxu3 %v2099_v12  ;;  %v2426_v44 = vld [vmem:[#allocation16 + $0x6c8] sm:$0xff]  ;;  %v2289_v12 = vld [vmem:[#allocation16 + $0x280] sm:$0xff] }
 0x5f3   : > { %2488 = vmatpush.msrb.mxu0 %v2289_v12  ;;  %v2443_v12 = vld [vmem:[#allocation16 + $0x750] sm:$0xff] }
 0x5ff   : > { %v1964_v45 = vpop.f32.mrf.mxu1 }
 0x600   : > { %3753 = vmatmul.msk.f32.vlgmr.msrb.gmra.mxu2 %vm1113_vm0, %v1964_v45  ;;  %3754 = vmatmul.msk.f32.vlgmr.msrb.gmra.mxu3 %vm1113_vm0, %v1964_v45  ;;  %v2417_v45 = vld [vmem:[#allocation16 + $0x680] sm:$0xff] }
 0x601   : > { %2523 = vmatpush.msrb.mxu2 %v2330_v25  ;;  %2543 = vmatpush.msrb.mxu3 %v2458_v27 }
 0x602   : > { %2508 = vmatpush.msrb.mxu1 %v2417_v45  ;;  %v2316_v45 = vld [vmem:[#allocation16 + $0x358] sm:$0xff] }
 0x603   : > { %2524 = vmatpush.msrb.mxu2 %v2322_v32  ;;  %2544 = vmatpush.msrb.mxu3 %v2450_v34  ;;  %v2346_v32 = vld [vmem:[#allocation16 + $0x448] sm:$0xff] }
 0x605   : > { %2525 = vmatpush.msrb.mxu2 %v2314_v33  ;;  %2545 = vmatpush.msrb.mxu3 %v2442_v8  ;;  %v2338_v8 = vld [vmem:[#allocation16 + $0x408] sm:$0xff] }
 0x607   : > { %v2095_v48 = vpop.f32.mrf.mxu1  ;;  %2526 = vmatpush.msrb.mxu2 %v2306_v39  ;;  %2546 = vmatpush.msrb.mxu3 %v2434_v30  ;;  %v2460_v39 = vld [vmem:[#allocation16 + $0x7d8] sm:$0xff]  ;;  %v2323_v30 = vld [vmem:[#allocation16 + $0x390] sm:$0xff] }
 0x608   : > { %3758 = vmatmul.msk.f32.vlgmr.msra.gmra.mxu2 %vm1113_vm0, %v2095_v48  ;;  %3759 = vmatmul.msk.f32.vlgmr.msra.gmra.mxu3 %vm1113_vm0, %v2095_v48  ;;  %v2168_v48 = vsub.f32 1.0, %v2167_v38  ;;  %vm2171_vm0 = vweird.f32 %v4889_v31  ;;  %v2332_v38 = vld [vmem:[#allocation16 + $0x3d8] sm:$0xff] }
 0x609   : > { %2527 = vmatpush.msrb.mxu2 %v2298_v43  ;;  %2547 = vmatpush.msrb.mxu3 %v2426_v44  ;;  %v2452_v43 = vld [vmem:[#allocation16 + $0x798] sm:$0xff]  ;;  %v2315_v44 = vld [vmem:[#allocation16 + $0x350] sm:$0xff] }
 0x60b   : > { %2528 = vmatpush.msrb.mxu2 %v2290_v49  ;;  %2548 = vmatpush.msrb.mxu3 %v2418_v50  ;;  %v2307_v49 = vld [vmem:[#allocation16 + $0x310] sm:$0xff] }
 0x60c   : > { %v2435_v50 = vld [vmem:[#allocation16 + $0x710] sm:$0xff] }
 0x656   : > { %v1475_v52 = vpop.f32.mrf.mxu2  ;;  %v1495_v54 = vpop.f32.mrf.mxu3 }
 0x657   : > { %v1498_v63 = vadd.f32 %v1475_v52, %v1347_v59  ;;  %v1499_v0 = vadd.f32 %v1495_v54, %v1367_v62  ;;  %v2281_v52 = vld [vmem:[#allocation16 + $0x240] sm:$0xff]  ;;  %v2402_v59 = vld [vmem:[#allocation16 + $0x608] sm:$0xff] }
 0x658   : > { %v2409_v54 = vld [vmem:[#allocation16 + $0x640] sm:$0xff]  ;;  %2489 = vmatpush.msrb.mxu0 %v2281_v52  ;;  %v2308_v52 = vld [vmem:[#allocation16 + $0x318] sm:$0xff] }
 0x659   : > { %2509 = vmatpush.msrb.mxu1 %v2409_v54  ;;  %v2265_v62 = vld [vmem:[#allocation16 + $0x1c0] sm:$0xff]  ;;  %v2436_v54 = vld [vmem:[#allocation16 + $0x718] sm:$0xff] }
 0x65e   : > { %v1606_v47 = vpop.f32.mrf.mxu2  ;;  %v1626_v55 = vpop.f32.mrf.mxu3 }
 0x65f   : > { %v1629_v4 = vadd.f32 %v1606_v47, %v1498_v63  ;;  %v1630_v26 = vadd.f32 %v1626_v55, %v1499_v0  ;;  %v2282_v47 = vld [vmem:[#allocation16 + $0x248] sm:$0xff]  ;;  %v2393_v63 = vld [vmem:[#allocation16 + $0x5c0] sm:$0xff] }
 0x660   : > { %v2410_v55 = vld [vmem:[#allocation16 + $0x648] sm:$0xff]  ;;  %2529 = vmatpush.msrb.mxu2 %v2282_v47  ;;  %v2299_v47 = vld [vmem:[#allocation16 + $0x2d0] sm:$0xff] }
 0x661   : > { %2549 = vmatpush.msrb.mxu3 %v2410_v55  ;;  %v2266_v0 = vld [vmem:[#allocation16 + $0x1c8] sm:$0xff]  ;;  %v2427_v55 = vld [vmem:[#allocation16 + $0x6d0] sm:$0xff] }
 0x663   : > { %2550 = vmatpush.msrb.mxu3 %v2402_v59  ;;  %v2292_v59 = vld [vmem:[#allocation16 + $0x298] sm:$0xff] }
 0x666   : > { %v1732_v56 = vpop.f32.mrf.mxu2  ;;  %v1752_v57 = vpop.f32.mrf.mxu3 }
 0x667   : > { %v1755_v53 = vadd.f32 %v1732_v56, %v1629_v4  ;;  %v1756_v5 = vadd.f32 %v1752_v57, %v1630_v26  ;;  %v2273_v56 = vld [vmem:[#allocation16 + $0x200] sm:$0xff] }
 0x668   : > { %v2401_v57 = vld [vmem:[#allocation16 + $0x600] sm:$0xff]  ;;  %2490 = vmatpush.msrb.mxu0 %v2273_v56  ;;  %v2300_v56 = vld [vmem:[#allocation16 + $0x2d8] sm:$0xff] }
 0x669   : > { %2510 = vmatpush.msrb.mxu1 %v2401_v57  ;;  %v2385_v4 = vld [vmem:[#allocation16 + $0x580] sm:$0xff]  ;;  %v2428_v57 = vld [vmem:[#allocation16 + $0x6d8] sm:$0xff] }
 0x66a   : > { %2491 = vmatpush.msrb.mxu0 %v2265_v62  ;;  %v2420_v62 = vld [vmem:[#allocation16 + $0x698] sm:$0xff] }
 0x66b   : > { %2511 = vmatpush.msrb.mxu1 %v2393_v63  ;;  %v2283_v63 = vld [vmem:[#allocation16 + $0x250] sm:$0xff] }
 0x66d   : > { %2512 = vmatpush.msrb.mxu1 %v2385_v4  ;;  %v2275_v4 = vld [vmem:[#allocation16 + $0x210] sm:$0xff] }
 0x66e   : > { %v1864_v58 = vpop.f32.mrf.mxu2  ;;  %v1884_v60 = vpop.f32.mrf.mxu3 }
 0x66f   : > { %v1887_v51 = vadd.f32 %v1864_v58, %v1755_v53  ;;  %v1888_v9 = vadd.f32 %v1884_v60, %v1756_v5  ;;  %v2169_v58 = vmul.f32 %v4889_v31, %v2168_v48  ;;  %v2274_v60 = vld [vmem:[#allocation16 + $0x208] sm:$0xff]  ;;  %v2444_v48 = vld [vmem:[#allocation16 + $0x758] sm:$0xff] }
 0x670   : > { %2530 = vmatpush.msrb.mxu2 %v2274_v60  ;;  %v2258_v53 = vld [vmem:[#allocation16 + $0x188] sm:$0xff]  ;;  %v2419_v60 = vld [vmem:[#allocation16 + $0x690] sm:$0xff] }
 0x671   : > { %v2170_v26 = vadd.f32 %v4889_v31, %v2169_v58  ;;  %v2386_v5 = vld [vmem:[#allocation16 + $0x588] sm:$0xff]  ;;  %v2291_v58 = vld [vmem:[#allocation16 + $0x290] sm:$0xff] }
 0x672   : > { %2531 = vmatpush.msrb.mxu2 %v2266_v0  ;;  %v2411_v0 = vld [vmem:[#allocation16 + $0x650] sm:$0xff] }
 0x674   : > { %2532 = vmatpush.msrb.mxu2 %v2258_v53  ;;  %v2276_v53 = vld [vmem:[#allocation16 + $0x218] sm:$0xff] }
 0x683   : > { %v1995_v1 = vpop.f32.mrf.mxu2  ;;  %v2015_v3 = vpop.f32.mrf.mxu3 }
 0x684   : > { %v2018_v28 = vadd.f32 %v1995_v1, %v1887_v51  ;;  %v2019_v11 = vadd.f32 %v2015_v3, %v1888_v9  ;;  %v2394_v1 = vld [vmem:[#allocation16 + $0x5c8] sm:$0xff]  ;;  %v2257_v3 = vld [vmem:[#allocation16 + $0x180] sm:$0xff] }
 0x685   : > { %2551 = vmatpush.msrb.mxu3 %v2394_v1  ;;  %v2377_v51 = vld [vmem:[#allocation16 + $0x540] sm:$0xff]  ;;  %2492 = vmatpush.msrb.mxu0 %v2257_v3  ;;  %v2250_v9 = vld [vmem:[#allocation16 + $0x148] sm:$0xff]  ;;  %v2284_v1 = vld [vmem:[#allocation16 + $0x258] sm:$0xff] }
 0x686   : > { %2513 = vmatpush.msrb.mxu1 %v2377_v51  ;;  %2533 = vmatpush.msrb.mxu2 %v2250_v9  ;;  %v2412_v3 = vld [vmem:[#allocation16 + $0x658] sm:$0xff]  ;;  %v2395_v51 = vld [vmem:[#allocation16 + $0x5d0] sm:$0xff] }
 0x687   : > { %2552 = vmatpush.msrb.mxu3 %v2386_v5  ;;  %2493 = vmatpush.msrb.mxu0 %v2249_v6  ;;  %v2404_v5 = vld [vmem:[#allocation16 + $0x618] sm:$0xff]  ;;  %v2267_v6 = vld [vmem:[#allocation16 + $0x1d0] sm:$0xff] }
 0x688   : > { %v2268_v9 = vld [vmem:[#allocation16 + $0x1d8] sm:$0xff] }
 0x68b   : > { %v2126_v18 = vpop.f32.mrf.mxu2  ;;  %v2146_v15 = vpop.f32.mrf.mxu3 }
 0x68c   : > { %v2149_v10 = vadd.f32 %v2126_v18, %v2018_v28  ;;  %v2150_v16 = vadd.f32 %v2146_v15, %v2019_v11  ;;  %v2378_v28 = vld [vmem:[#allocation16 + $0x548] sm:$0xff]  ;;  %v2241_v11 = vld [vmem:[#allocation16 + $0x100] sm:$0xff] }
 0x68d   : > { %v2242_v18 = vld [vmem:[#allocation16 + $0x108] sm:$0xff]  ;;  %2553 = vmatpush.msrb.mxu3 %v2378_v28  ;;  %2494 = vmatpush.msrb.mxu0 %v2241_v11  ;;  %v2396_v28 = vld [vmem:[#allocation16 + $0x5d8] sm:$0xff]  ;;  %v2259_v11 = vld [vmem:[#allocation16 + $0x190] sm:$0xff] }
 0x68e   : > { %v2157_v17 = vadd.f32 %v2153_v13, %v2149_v10  ;;  %v2158_v19 = vadd.f32 %v2154_v14, %v2150_v16  ;;  %v2369_v13 = vld [vmem:[#allocation16 + $0x500] sm:$0xff]  ;;  %v4896_v14 = vsel %vm2171_vm0, %v4889_v31, %v2170_v26  ;;  %v2370_v15 = vld [vmem:[#allocation16 + $0x508] sm:$0xff]  ;;  %2534 = vmatpush.msrb.mxu2 %v2242_v18  ;;  %v2403_v26 = vld [vmem:[#allocation16 + $0x610] sm:$0xff] }
 0x68f   : > { %v2233_v10 = vld [vmem:[#allocation16 + $0xc0] sm:$0xff]  ;;  %2514 = vmatpush.msrb.mxu1 %v2369_v13  ;;  %2554 = vmatpush.msrb.mxu3 %v2370_v15  ;;  %v2218_v31 = vld [vmem:[#allocation16 + $0x48] sm:$0xff]  ;;  %v2387_v13 = vld [vmem:[#allocation16 + $0x590] sm:$0xff] }
 0x690   : > { %v4882_v21 = vadd.f32 %v3974_v42, %v2157_v17  ;;  %v4885_v61 = vadd.f32 %v3975_v20, %v2158_v19  ;;  %v2361_v16 = vld [vmem:[#allocation16 + $0x4c0] sm:$0xff]  ;;  %v2234_v19 = vld [vmem:[#allocation16 + $0xc8] sm:$0xff]  ;;  %2495 = vmatpush.msrb.mxu0 %v2233_v10  ;;  %v2260_v18 = vld [vmem:[#allocation16 + $0x198] sm:$0xff] }
 0x691   : > { %v2362_v42 = vld [vmem:[#allocation16 + $0x4c8] sm:$0xff]  ;;  %2515 = vmatpush.msrb.mxu1 %v2361_v16  ;;  %2535 = vmatpush.msrb.mxu2 %v2234_v19  ;;  %v2388_v15 = vld [vmem:[#allocation16 + $0x598] sm:$0xff]  ;;  %v2251_v10 = vld [vmem:[#allocation16 + $0x150] sm:$0xff] }
 0x692   : > { %v2163_v22 = vadd.f32 %v4885_v61, %v4882_v21  ;;  %2555 = vmatpush.msrb.mxu3 %v2362_v42  ;;  %v2379_v16 = vld [vmem:[#allocation16 + $0x550] sm:$0xff]  ;;  %v2380_v19 = vld [vmem:[#allocation16 + $0x558] sm:$0xff] }
 0x693   : > { %2516 = vmatpush.msrb.mxu1 %v2353_v46  ;;  %2536 = vmatpush.msrb.mxu2 %v2226_v23  ;;  %v2243_v42 = vld [vmem:[#allocation16 + $0x110] sm:$0xff]  ;;  %v2372_v46 = vld [vmem:[#allocation16 + $0x518] sm:$0xff] }
 0x694   : > { %2164 = vadd.xlane.f32.xlu2 %v2163_v22  ;;  %v2225_v22 = vld [vmem:[#allocation16 + $0x80] sm:$0xff]  ;;  %2556 = vmatpush.msrb.mxu3 %v2354_v24  ;;  %v2235_v23 = vld [vmem:[#allocation16 + $0xd0] sm:$0xff] }
 0x695   : > { %2496 = vmatpush.msrb.mxu0 %v2225_v22  ;;  %2517 = vmatpush.msrb.mxu1 %v2345_v29  ;;  %v2244_v22 = vld [vmem:[#allocation16 + $0x118] sm:$0xff]  ;;  %v2363_v24 = vld [vmem:[#allocation16 + $0x4d0] sm:$0xff] }
 0x696   : > { %2537 = vmatpush.msrb.mxu2 %v2218_v31  ;;  %2557 = vmatpush.msrb.mxu3 %v2346_v32  ;;  %v2364_v29 = vld [vmem:[#allocation16 + $0x4d8] sm:$0xff]  ;;  %v2227_v31 = vld [vmem:[#allocation16 + $0x90] sm:$0xff] }
 0x697   : > { %2497 = vmatpush.msrb.mxu0 %v2217_v7  ;;  %2518 = vmatpush.msrb.mxu1 %v2337_v2  ;;  %v2236_v7 = vld [vmem:[#allocation16 + $0xd8] sm:$0xff]  ;;  %v2355_v32 = vld [vmem:[#allocation16 + $0x490] sm:$0xff] }
 0x698   : > { %2558 = vmatpush.msrb.mxu3 %v2338_v8  ;;  %v2347_v2 = vld [vmem:[#allocation16 + $0x450] sm:$0xff] }
 0x699   : > { %2583 = vmatpush.msra.mxu1 %v2459_v37  ;;  %v2211_v8 = vld [vmem:[#allocation16 + $0x10] sm:$0xff]  ;;  %v2212_v37 = vld [vmem:[#allocation16 + $0x18] sm:$0xff] }
 0x69a   : > { %2623 = vmatpush.msra.mxu3 %v2460_v39 }
 0x69b   : > { %2584 = vmatpush.msra.mxu1 %v2451_v40 }
 0x69c   : > { %2624 = vmatpush.msra.mxu3 %v2452_v43 }
 0x69d   : > { %2585 = vmatpush.msra.mxu1 %v2443_v12 }
 0x69e   : > { %2625 = vmatpush.msra.mxu3 %v2444_v48 }
 0x69f   : > { %2586 = vmatpush.msra.mxu1 %v2435_v50 }
 0x6a0   : > { %2626 = vmatpush.msra.mxu3 %v2436_v54 }
 0x6a1   : > { %2587 = vmatpush.msra.mxu1 %v2427_v55 }
 0x6a2   : > { %2627 = vmatpush.msra.mxu3 %v2428_v57 }
 0x6a3   : > { %2588 = vmatpush.msra.mxu1 %v2419_v60 }
 0x6a4   : > { %2628 = vmatpush.msra.mxu3 %v2420_v62 }
 0x6a5   : > { %2589 = vmatpush.msra.mxu1 %v2411_v0  ;;  %v2333_v0 = vld [vmem:[#allocation16 + $0x3e0] sm:$0xff] }
 0x6a6   : > { %2629 = vmatpush.msra.mxu3 %v2412_v3  ;;  %v2334_v3 = vld [vmem:[#allocation16 + $0x3e8] sm:$0xff] }
 0x6a7   : > { %2590 = vmatpush.msra.mxu1 %v2403_v26  ;;  %v2326_v26 = vld [vmem:[#allocation16 + $0x3a8] sm:$0xff] }
 0x6a8   : > { %2630 = vmatpush.msra.mxu3 %v2404_v5  ;;  %v2317_v5 = vld [vmem:[#allocation16 + $0x360] sm:$0xff] }
 0x6a9   : > { %2591 = vmatpush.msra.mxu1 %v2395_v51  ;;  %v2318_v51 = vld [vmem:[#allocation16 + $0x368] sm:$0xff] }
 0x6aa   : > { %2631 = vmatpush.msra.mxu3 %v2396_v28  ;;  %v2309_v28 = vld [vmem:[#allocation16 + $0x320] sm:$0xff] }
 0x6ab   : > { %2592 = vmatpush.msra.mxu1 %v2387_v13  ;;  %v2310_v13 = vld [vmem:[#allocation16 + $0x328] sm:$0xff] }
 0x6ac   : > { %2632 = vmatpush.msra.mxu3 %v2388_v15  ;;  %v2301_v15 = vld [vmem:[#allocation16 + $0x2e0] sm:$0xff] }
 0x6ad   : > { %2593 = vmatpush.msra.mxu1 %v2379_v16  ;;  %v2302_v16 = vld [vmem:[#allocation16 + $0x2e8] sm:$0xff] }
 0x6ae   : > { %2633 = vmatpush.msra.mxu3 %v2380_v19  ;;  %v2293_v19 = vld [vmem:[#allocation16 + $0x2a0] sm:$0xff] }
 0x6b0   : > { %2634 = vmatpush.msra.mxu3 %v2372_v46  ;;  %v2285_v46 = vld [vmem:[#allocation16 + $0x260] sm:$0xff] }
 0x6b2   : > { %2635 = vmatpush.msra.mxu3 %v2364_v29  ;;  %v2277_v29 = vld [vmem:[#allocation16 + $0x220] sm:$0xff] }
 0x707   : > { %v2165_v17 = vpop.xlane.xlu2 %2164 }
 0x708   : > { %v2173_v20 = vmul.f32 %v4896_v14, %v2165_v17  ;;  %v2252_v17 = vld [vmem:[#allocation16 + $0x158] sm:$0xff] }
 0x70a   : > { %v4900_v25 = vsub.f32 %v4882_v21, %v2173_v20  ;;  %v4903_v27 = vsub.f32 %v4885_v61, %v2173_v20  ;;  %v2209_v21 = vld [vmem:[#allocation16] sm:$0xff]  ;;  %v2210_v61 = vld [vmem:[#allocation16 + $0x8] sm:$0xff]  ;;  %v2371_v20 = vld [vmem:[#allocation16 + $0x510] sm:$0xff] }
 0x70b   : > { %2498 = vmatpush.msrb.mxu0 %v2209_v21  ;;  %2538 = vmatpush.msrb.mxu2 %v2210_v61  ;;  %v2219_v21 = vld [vmem:[#allocation16 + $0x50] sm:$0xff]  ;;  %v2220_v61 = vld [vmem:[#allocation16 + $0x58] sm:$0xff] }
 0x70c   : > { %v2176_v34 = vmul.f32 %v4900_v25, %v4900_v25  ;;  %v2177_v35 = vmul.f32 %v4903_v27, %v4903_v27  ;;  %2594 = vmatpush.msra.mxu1 %v2371_v20  ;;  %v2294_v20 = vld [vmem:[#allocation16 + $0x2a8] sm:$0xff] }
 0x70d   : > { %2563 = vmatpush.msra.mxu0 %v2331_v36  ;;  %2603 = vmatpush.msra.mxu2 %v2332_v38  ;;  %v2339_v36 = vld [vmem:[#allocation16 + $0x410] sm:$0xff]  ;;  %v2340_v38 = vld [vmem:[#allocation16 + $0x418] sm:$0xff] }
 0x70e   : > { %v2178_v33 = vadd.f32 %v2177_v35, %v2176_v34  ;;  %2595 = vmatpush.msra.mxu1 %v2363_v24  ;;  %v2228_v34 = vld [vmem:[#allocation16 + $0x98] sm:$0xff]  ;;  %v2286_v24 = vld [vmem:[#allocation16 + $0x268] sm:$0xff] }
 0x70f   : > { %2564 = vmatpush.msra.mxu0 %v2323_v30  ;;  %2604 = vmatpush.msra.mxu2 %v2324_v41  ;;  %v2356_v35 = vld [vmem:[#allocation16 + $0x498] sm:$0xff] }
 0x710   : > { %2179 = vadd.xlane.f32.xlu0 %v2178_v33  ;;  %2596 = vmatpush.msra.mxu1 %v2355_v32  ;;  %v2348_v33 = vld [vmem:[#allocation16 + $0x458] sm:$0xff]  ;;  %v2278_v32 = vld [vmem:[#allocation16 + $0x228] sm:$0xff] }
 0x711   : > { %2565 = vmatpush.msra.mxu0 %v2315_v44  ;;  %2605 = vmatpush.msra.mxu2 %v2316_v45  ;;  %v2161_v45 = vld [vmem:[#allocation13] sm:$0x3] }
 0x712   : > { %2636 = vmatpush.msra.mxu3 %v2356_v35  ;;  %2597 = vmatpush.msra.mxu1 %v2347_v2  ;;  %v2197_v54 = vperm.slane %v2161_v45, 1  ;;  %v2269_v35 = vld [vmem:[#allocation16 + $0x1e0] sm:$0xff]  ;;  %v2270_v2 = vld [vmem:[#allocation16 + $0x1e8] sm:$0xff] }
 0x713   : > { %2566 = vmatpush.msra.mxu0 %v2307_v49  ;;  %2606 = vmatpush.msra.mxu2 %v2308_v52  ;;  %v2162_v49 = vld [vmem:[#allocation14] sm:$0x3]  ;;  %v2196_v52 = vperm.slane %v2161_v45, 0  ;;  %v2237_v45 = vld [vmem:[#allocation16 + $0xe0] sm:$0xff] }
 0x714   : > { %2637 = vmatpush.msra.mxu3 %v2348_v33  ;;  %2598 = vmatpush.msra.mxu1 %v2339_v36  ;;  %v2203_v55 = vperm.slane %v2162_v49, 0  ;;  %v2261_v33 = vld [vmem:[#allocation16 + $0x1a0] sm:$0xff]  ;;  %v2262_v36 = vld [vmem:[#allocation16 + $0x1a8] sm:$0xff] }
 0x715   : > { %2567 = vmatpush.msra.mxu0 %v2299_v47  ;;  %2607 = vmatpush.msra.mxu2 %v2300_v56  ;;  %v2204_v56 = vperm.slane %v2162_v49, 1  ;;  %v2238_v49 = vld [vmem:[#allocation16 + $0xe8] sm:$0xff] }
 0x716   : > { %2638 = vmatpush.msra.mxu3 %v2340_v38  ;;  %v2253_v38 = vld [vmem:[#allocation16 + $0x160] sm:$0xff] }
 0x717   : > { %2568 = vmatpush.msra.mxu0 %v2291_v58  ;;  %2608 = vmatpush.msra.mxu2 %v2292_v59 }
 0x719   : > { %2569 = vmatpush.msra.mxu0 %v2283_v63  ;;  %2609 = vmatpush.msra.mxu2 %v2284_v1  ;;  %v2461_v1 = vld [vmem:[#allocation16 + $0x7e0] sm:$0xff] }
 0x71b   : > { %2570 = vmatpush.msra.mxu0 %v2275_v4  ;;  %2610 = vmatpush.msra.mxu2 %v2276_v53  ;;  %v2462_v4 = vld [vmem:[#allocation16 + $0x7e8] sm:$0xff] }
 0x71c   : > { %v2454_v53 = vld [vmem:[#allocation16 + $0x7a8] sm:$0xff] }
 0x71d   : > { %2571 = vmatpush.msra.mxu0 %v2267_v6  ;;  %2611 = vmatpush.msra.mxu2 %v2268_v9  ;;  %v2445_v6 = vld [vmem:[#allocation16 + $0x760] sm:$0xff]  ;;  %v2446_v9 = vld [vmem:[#allocation16 + $0x768] sm:$0xff] }
 0x71f   : > { %2572 = vmatpush.msra.mxu0 %v2259_v11  ;;  %2612 = vmatpush.msra.mxu2 %v2260_v18  ;;  %v2437_v11 = vld [vmem:[#allocation16 + $0x720] sm:$0xff]  ;;  %v2438_v18 = vld [vmem:[#allocation16 + $0x728] sm:$0xff] }
 0x721   : > { %2573 = vmatpush.msra.mxu0 %v2251_v10  ;;  %2613 = vmatpush.msra.mxu2 %v2252_v17  ;;  %v2429_v10 = vld [vmem:[#allocation16 + $0x6e0] sm:$0xff]  ;;  %v2430_v17 = vld [vmem:[#allocation16 + $0x6e8] sm:$0xff] }
 0x723   : > { %2574 = vmatpush.msra.mxu0 %v2243_v42  ;;  %2614 = vmatpush.msra.mxu2 %v2244_v22  ;;  %v2421_v42 = vld [vmem:[#allocation16 + $0x6a0] sm:$0xff]  ;;  %v2422_v22 = vld [vmem:[#allocation16 + $0x6a8] sm:$0xff] }
 0x725   : > { %2575 = vmatpush.msra.mxu0 %v2235_v23  ;;  %2615 = vmatpush.msra.mxu2 %v2236_v7  ;;  %v2413_v23 = vld [vmem:[#allocation16 + $0x660] sm:$0xff]  ;;  %v2414_v7 = vld [vmem:[#allocation16 + $0x668] sm:$0xff] }
 0x727   : > { %2576 = vmatpush.msra.mxu0 %v2227_v31  ;;  %2616 = vmatpush.msra.mxu2 %v2228_v34  ;;  %v2405_v31 = vld [vmem:[#allocation16 + $0x620] sm:$0xff]  ;;  %v2406_v34 = vld [vmem:[#allocation16 + $0x628] sm:$0xff] }
 0x729   : > { %2577 = vmatpush.msra.mxu0 %v2219_v21  ;;  %2617 = vmatpush.msra.mxu2 %v2220_v61  ;;  %v2397_v21 = vld [vmem:[#allocation16 + $0x5e0] sm:$0xff]  ;;  %v2398_v61 = vld [vmem:[#allocation16 + $0x5e8] sm:$0xff] }
 0x72b   : > { %2578 = vmatpush.msra.mxu0 %v2211_v8  ;;  %2618 = vmatpush.msra.mxu2 %v2212_v37  ;;  %v2389_v8 = vld [vmem:[#allocation16 + $0x5a0] sm:$0xff]  ;;  %v2390_v37 = vld [vmem:[#allocation16 + $0x5a8] sm:$0xff] }
 0x783   : > { %v2180_v39 = vpop.xlane.xlu0 %2179 }
 0x784   : > { %v2181_v30 = vmul.f32 %v2180_v39, %v4896_v14  ;;  %v2381_v39 = vld [vmem:[#allocation16 + $0x560] sm:$0xff] }
 0x786   : > { %v2182_v40 = vadd.f32 1e-05, %v2181_v30  ;;  %v2254_v30 = vld [vmem:[#allocation16 + $0x168] sm:$0xff] }
 0x788   : > { %3954 = vrsqrt.f32 %v2182_v40  ;;  %vm2189_vm6 = vweird.f32 %v2182_v40 }
 0x78e   : > { %v3955_v41 = vpop.eup %3954 }
 0x78f   : > { %v2184_v43 = vmul.f32 %v3955_v41, %v2182_v40  ;;  %vm2190_vm1 = vweird.f32 %v3955_v41  ;;  %v2382_v40 = vld [vmem:[#allocation16 + $0x568] sm:$0xff] }
 0x790   : > { %vm2191_vm7 = vmor %vm2189_vm6, %vm2190_vm1 }
 0x791   : > { %v2185_v44 = vmul.f32 %v3955_v41, %v2184_v43  ;;  %v2373_v43 = vld [vmem:[#allocation16 + $0x520] sm:$0xff] }
 0x793   : > { %v2186_v12 = vmul.f32 0.5, %v2185_v44  ;;  %v2246_v44 = vld [vmem:[#allocation16 + $0x128] sm:$0xff] }
 0x795   : > { %v2187_v48 = vsub.f32 1.5, %v2186_v12  ;;  %v2374_v12 = vld [vmem:[#allocation16 + $0x528] sm:$0xff] }
 0x797   : > { %v2188_v50 = vmul.f32 %v3955_v41, %v2187_v48  ;;  %v2365_v48 = vld [vmem:[#allocation16 + $0x4e0] sm:$0xff] }
 0x799   : > { %v2192_v47 = vsel %vm2191_vm7, %v3955_v41, %v2188_v50  ;;  %v2245_v41 = vld [vmem:[#allocation16 + $0x120] sm:$0xff]  ;;  %v2366_v50 = vld [vmem:[#allocation16 + $0x4e8] sm:$0xff] }
 0x79a   : > { %v2193_v57 = vmul.f32 %v2192_v47, %v4900_v25  ;;  %v2194_v58 = vmul.f32 %v2192_v47, %v4903_v27  ;;  %v2325_v25 = vld [vmem:[#allocation16 + $0x3a0] sm:$0xff]  ;;  %v2230_v47 = vld [vmem:[#allocation16 + $0xa8] sm:$0xff] }
 0x79b   : > { %v2453_v27 = vld [vmem:[#allocation16 + $0x7a0] sm:$0xff] }
 0x79c   : > { %v2200_v60 = vmul.f32 %v2196_v52, %v2193_v57  ;;  %v2201_v59 = vmul.f32 %v2197_v54, %v2194_v58  ;;  %v2229_v52 = vld [vmem:[#allocation16 + $0xa0] sm:$0xff]  ;;  %v2222_v58 = vld [vmem:[#allocation16 + $0x68] sm:$0xff] }
 0x79d   : > { %v2357_v54 = vld [vmem:[#allocation16 + $0x4a0] sm:$0xff] }
 0x79e   : > { %v4912_v62 = vadd.f32 %v2203_v55, %v2200_v60  ;;  %v4914_v63 = vadd.f32 %v2204_v56, %v2201_v59  ;;  %v2358_v55 = vld [vmem:[#allocation16 + $0x4a8] sm:$0xff]  ;;  %v2221_v56 = vld [vmem:[#allocation16 + $0x60] sm:$0xff] }
 0x79f   : > { %v2349_v57 = vld [vmem:[#allocation16 + $0x460] sm:$0xff]  ;;  %v2350_v60 = vld [vmem:[#allocation16 + $0x468] sm:$0xff] }
 0x7a0   : > { %2499 = vmatmul.f32.vlgmr.msrb.gmra.mxu0 %v4912_v62  ;;  %2519 = vmatmul.f32.vlgmr.msrb.gmra.mxu1 %v4914_v63  ;;  %v2213_v59 = vld [vmem:[#allocation16 + $0x20] sm:$0xff] }
 0x7a1   : > { %2539 = vmatmul.f32.vlgmr.msrb.gmra.mxu2 %v4912_v62  ;;  %2559 = vmatmul.f32.vlgmr.msrb.gmra.mxu3 %v4914_v63 }
 0x7a2   : > { %2643 = vmatpush.msrb.mxu0 %v2333_v0  ;;  %2663 = vmatpush.msrb.mxu1 %v2461_v1  ;;  %v2341_v0 = vld [vmem:[#allocation16 + $0x420] sm:$0xff]  ;;  %v2214_v1 = vld [vmem:[#allocation16 + $0x28] sm:$0xff] }
 0x7a3   : > { %2683 = vmatpush.msrb.mxu2 %v2334_v3  ;;  %2703 = vmatpush.msrb.mxu3 %v2462_v4  ;;  %v2342_v3 = vld [vmem:[#allocation16 + $0x428] sm:$0xff]  ;;  %v2335_v4 = vld [vmem:[#allocation16 + $0x3f0] sm:$0xff] }
 0x7a4   : > { %2644 = vmatpush.msrb.mxu0 %v2325_v25  ;;  %2664 = vmatpush.msrb.mxu1 %v2453_v27  ;;  %v2463_v25 = vld [vmem:[#allocation16 + $0x7f0] sm:$0xff]  ;;  %v2336_v27 = vld [vmem:[#allocation16 + $0x3f8] sm:$0xff] }
 0x7a5   : > { %2684 = vmatpush.msrb.mxu2 %v2326_v26  ;;  %2704 = vmatpush.msrb.mxu3 %v2454_v53  ;;  %v2464_v26 = vld [vmem:[#allocation16 + $0x7f8] sm:$0xff]  ;;  %v2327_v53 = vld [vmem:[#allocation16 + $0x3b0] sm:$0xff] }
 0x7a6   : > { %2645 = vmatpush.msrb.mxu0 %v2317_v5  ;;  %2665 = vmatpush.msrb.mxu1 %v2445_v6  ;;  %v2455_v5 = vld [vmem:[#allocation16 + $0x7b0] sm:$0xff]  ;;  %v2328_v6 = vld [vmem:[#allocation16 + $0x3b8] sm:$0xff] }
 0x7a7   : > { %2685 = vmatpush.msrb.mxu2 %v2318_v51  ;;  %2705 = vmatpush.msrb.mxu3 %v2446_v9  ;;  %v2456_v51 = vld [vmem:[#allocation16 + $0x7b8] sm:$0xff]  ;;  %v2319_v9 = vld [vmem:[#allocation16 + $0x370] sm:$0xff] }
 0x7a8   : > { %2646 = vmatpush.msrb.mxu0 %v2309_v28  ;;  %2666 = vmatpush.msrb.mxu1 %v2437_v11  ;;  %v2447_v28 = vld [vmem:[#allocation16 + $0x770] sm:$0xff]  ;;  %v2320_v11 = vld [vmem:[#allocation16 + $0x378] sm:$0xff] }
 0x7a9   : > { %2686 = vmatpush.msrb.mxu2 %v2310_v13  ;;  %2706 = vmatpush.msrb.mxu3 %v2438_v18  ;;  %v2448_v13 = vld [vmem:[#allocation16 + $0x778] sm:$0xff]  ;;  %v2311_v18 = vld [vmem:[#allocation16 + $0x330] sm:$0xff] }
 0x7aa   : > { %2579 = vmatmul.f32.vlgmr.msra.gmra.mxu0 %v4912_v62  ;;  %2599 = vmatmul.f32.vlgmr.msra.gmra.mxu1 %v4914_v63 }
 0x7ab   : > { %2619 = vmatmul.f32.vlgmr.msra.gmra.mxu2 %v4912_v62  ;;  %2639 = vmatmul.f32.vlgmr.msra.gmra.mxu3 %v4914_v63 }
 0x7ac   : > { %2647 = vmatpush.msrb.mxu0 %v2301_v15  ;;  %2667 = vmatpush.msrb.mxu1 %v2429_v10  ;;  %v2439_v15 = vld [vmem:[#allocation16 + $0x730] sm:$0xff]  ;;  %v2312_v10 = vld [vmem:[#allocation16 + $0x338] sm:$0xff] }
 0x7ad   : > { %2687 = vmatpush.msrb.mxu2 %v2302_v16  ;;  %2707 = vmatpush.msrb.mxu3 %v2430_v17  ;;  %v2440_v16 = vld [vmem:[#allocation16 + $0x738] sm:$0xff]  ;;  %v2303_v17 = vld [vmem:[#allocation16 + $0x2f0] sm:$0xff] }
 0x7ae   : > { %2648 = vmatpush.msrb.mxu0 %v2293_v19  ;;  %2668 = vmatpush.msrb.mxu1 %v2421_v42  ;;  %v2431_v19 = vld [vmem:[#allocation16 + $0x6f0] sm:$0xff]  ;;  %v2304_v42 = vld [vmem:[#allocation16 + $0x2f8] sm:$0xff] }
 0x7af   : > { %2688 = vmatpush.msrb.mxu2 %v2294_v20  ;;  %2708 = vmatpush.msrb.mxu3 %v2422_v22  ;;  %v2432_v20 = vld [vmem:[#allocation16 + $0x6f8] sm:$0xff]  ;;  %v2295_v22 = vld [vmem:[#allocation16 + $0x2b0] sm:$0xff] }
 0x7b0   : > { %2649 = vmatpush.msrb.mxu0 %v2285_v46  ;;  %2669 = vmatpush.msrb.mxu1 %v2413_v23  ;;  %v2423_v46 = vld [vmem:[#allocation16 + $0x6b0] sm:$0xff]  ;;  %v2296_v23 = vld [vmem:[#allocation16 + $0x2b8] sm:$0xff] }
 0x7b1   : > { %2689 = vmatpush.msrb.mxu2 %v2286_v24  ;;  %2709 = vmatpush.msrb.mxu3 %v2414_v7  ;;  %v2424_v24 = vld [vmem:[#allocation16 + $0x6b8] sm:$0xff]  ;;  %v2287_v7 = vld [vmem:[#allocation16 + $0x270] sm:$0xff] }
 0x7b2   : > { %2650 = vmatpush.msrb.mxu0 %v2277_v29  ;;  %2670 = vmatpush.msrb.mxu1 %v2405_v31  ;;  %v2415_v29 = vld [vmem:[#allocation16 + $0x670] sm:$0xff]  ;;  %v2288_v31 = vld [vmem:[#allocation16 + $0x278] sm:$0xff] }
 0x7b3   : > { %2690 = vmatpush.msrb.mxu2 %v2278_v32  ;;  %2710 = vmatpush.msrb.mxu3 %v2406_v34  ;;  %v2416_v32 = vld [vmem:[#allocation16 + $0x678] sm:$0xff]  ;;  %v2279_v34 = vld [vmem:[#allocation16 + $0x230] sm:$0xff] }
 0x7b4   : > { %2651 = vmatpush.msrb.mxu0 %v2269_v35  ;;  %2671 = vmatpush.msrb.mxu1 %v2397_v21  ;;  %v2407_v35 = vld [vmem:[#allocation16 + $0x630] sm:$0xff]  ;;  %v2280_v21 = vld [vmem:[#allocation16 + $0x238] sm:$0xff] }
 0x7b5   : > { %2691 = vmatpush.msrb.mxu2 %v2270_v2  ;;  %2711 = vmatpush.msrb.mxu3 %v2398_v61  ;;  %v2408_v2 = vld [vmem:[#allocation16 + $0x638] sm:$0xff]  ;;  %v2271_v61 = vld [vmem:[#allocation16 + $0x1f0] sm:$0xff] }
 0x7b6   : > { %2652 = vmatpush.msrb.mxu0 %v2261_v33  ;;  %2672 = vmatpush.msrb.mxu1 %v2389_v8  ;;  %v2399_v33 = vld [vmem:[#allocation16 + $0x5f0] sm:$0xff]  ;;  %v2272_v8 = vld [vmem:[#allocation16 + $0x1f8] sm:$0xff] }
 0x7b7   : > { %2692 = vmatpush.msrb.mxu2 %v2262_v36  ;;  %2712 = vmatpush.msrb.mxu3 %v2390_v37  ;;  %v2400_v36 = vld [vmem:[#allocation16 + $0x5f8] sm:$0xff]  ;;  %v2263_v37 = vld [vmem:[#allocation16 + $0x1b0] sm:$0xff] }
 0x7b8   : > { %2653 = vmatpush.msrb.mxu0 %v2253_v38  ;;  %2673 = vmatpush.msrb.mxu1 %v2381_v39  ;;  %v2391_v38 = vld [vmem:[#allocation16 + $0x5b0] sm:$0xff]  ;;  %v2264_v39 = vld [vmem:[#allocation16 + $0x1b8] sm:$0xff] }
 0x7b9   : > { %2693 = vmatpush.msrb.mxu2 %v2254_v30  ;;  %2713 = vmatpush.msrb.mxu3 %v2382_v40  ;;  %v2392_v30 = vld [vmem:[#allocation16 + $0x5b8] sm:$0xff]  ;;  %v2255_v40 = vld [vmem:[#allocation16 + $0x170] sm:$0xff] }
 0x7ba   : > { %2654 = vmatpush.msrb.mxu0 %v2245_v41  ;;  %2674 = vmatpush.msrb.mxu1 %v2373_v43  ;;  %v2383_v41 = vld [vmem:[#allocation16 + $0x570] sm:$0xff]  ;;  %v2256_v43 = vld [vmem:[#allocation16 + $0x178] sm:$0xff] }
 0x7bb   : > { %2694 = vmatpush.msrb.mxu2 %v2246_v44  ;;  %2714 = vmatpush.msrb.mxu3 %v2374_v12  ;;  %v2384_v44 = vld [vmem:[#allocation16 + $0x578] sm:$0xff]  ;;  %v2247_v12 = vld [vmem:[#allocation16 + $0x130] sm:$0xff] }
 0x7bc   : > { %2655 = vmatpush.msrb.mxu0 %v2237_v45  ;;  %2675 = vmatpush.msrb.mxu1 %v2365_v48  ;;  %v2375_v45 = vld [vmem:[#allocation16 + $0x530] sm:$0xff]  ;;  %v2248_v48 = vld [vmem:[#allocation16 + $0x138] sm:$0xff] }
 0x7bd   : > { %2695 = vmatpush.msrb.mxu2 %v2238_v49  ;;  %2715 = vmatpush.msrb.mxu3 %v2366_v50  ;;  %v2376_v49 = vld [vmem:[#allocation16 + $0x538] sm:$0xff]  ;;  %v2239_v50 = vld [vmem:[#allocation16 + $0xf0] sm:$0xff] }
 0x7be   : > { %2656 = vmatpush.msrb.mxu0 %v2229_v52  ;;  %2676 = vmatpush.msrb.mxu1 %v2357_v54  ;;  %v2367_v52 = vld [vmem:[#allocation16 + $0x4f0] sm:$0xff]  ;;  %v2240_v54 = vld [vmem:[#allocation16 + $0xf8] sm:$0xff] }
 0x7bf   : > { %2696 = vmatpush.msrb.mxu2 %v2230_v47  ;;  %2716 = vmatpush.msrb.mxu3 %v2358_v55  ;;  %v2368_v47 = vld [vmem:[#allocation16 + $0x4f8] sm:$0xff]  ;;  %v2231_v55 = vld [vmem:[#allocation16 + $0xb0] sm:$0xff] }
 0x7c0   : > { %2657 = vmatpush.msrb.mxu0 %v2221_v56  ;;  %2677 = vmatpush.msrb.mxu1 %v2349_v57  ;;  %v2359_v56 = vld [vmem:[#allocation16 + $0x4b0] sm:$0xff]  ;;  %v2232_v57 = vld [vmem:[#allocation16 + $0xb8] sm:$0xff] }
 0x7c1   : > { %2697 = vmatpush.msrb.mxu2 %v2222_v58  ;;  %2717 = vmatpush.msrb.mxu3 %v2350_v60  ;;  %v2360_v58 = vld [vmem:[#allocation16 + $0x4b8] sm:$0xff]  ;;  %v2223_v60 = vld [vmem:[#allocation16 + $0x70] sm:$0xff] }
 0x7c2   : > { %2658 = vmatpush.msrb.mxu0 %v2213_v59  ;;  %2678 = vmatpush.msrb.mxu1 %v2341_v0  ;;  %v2351_v59 = vld [vmem:[#allocation16 + $0x470] sm:$0xff]  ;;  %v2224_v0 = vld [vmem:[#allocation16 + $0x78] sm:$0xff] }
 0x7c3   : > { %2698 = vmatpush.msrb.mxu2 %v2214_v1  ;;  %2718 = vmatpush.msrb.mxu3 %v2342_v3  ;;  %v2352_v1 = vld [vmem:[#allocation16 + $0x478] sm:$0xff]  ;;  %v2215_v3 = vld [vmem:[#allocation16 + $0x30] sm:$0xff] }
 0x7c4   : > { %2659 = vmatmul.f32.vlgmr.msrb.gmra.mxu0 %v4912_v62  ;;  %2679 = vmatmul.f32.vlgmr.msrb.gmra.mxu1 %v4914_v63 }
 0x7c5   : > { %2699 = vmatmul.f32.vlgmr.msrb.gmra.mxu2 %v4912_v62  ;;  %2719 = vmatmul.f32.vlgmr.msrb.gmra.mxu3 %v4914_v63 }
 0x7c6   : > { %2723 = vmatpush.msra.mxu0 %v2335_v4  ;;  %2743 = vmatpush.msra.mxu1 %v2463_v25  ;;  %v2343_v4 = vld [vmem:[#allocation16 + $0x430] sm:$0xff]  ;;  %v2216_v25 = vld [vmem:[#allocation16 + $0x38] sm:$0xff] }
 0x7c7   : > { %2763 = vmatpush.msra.mxu2 %v2336_v27  ;;  %2783 = vmatpush.msra.mxu3 %v2464_v26  ;;  %v2344_v27 = vld [vmem:[#allocation16 + $0x438] sm:$0xff]  ;;  %v2905_v26 = vld [vmem:[#allocation17 + $0xf0] sm:$0xff] }
 0x7c8   : > { %2724 = vmatpush.msra.mxu0 %v2327_v53  ;;  %2744 = vmatpush.msra.mxu1 %v2455_v5  ;;  %v2937_v53 = vld [vmem:[#allocation17 + $0x1f0] sm:$0xff] }
 0x7c9   : > { %2764 = vmatpush.msra.mxu2 %v2328_v6  ;;  %2784 = vmatpush.msra.mxu3 %v2456_v51  ;;  %v2969_v5 = vld [vmem:[#allocation17 + $0x2f0] sm:$0xff]  ;;  %v2903_v6 = vld [vmem:[#allocation17 + $0xe0] sm:$0xff] }
 0x7ca   : > { %2725 = vmatpush.msra.mxu0 %v2319_v9  ;;  %2745 = vmatpush.msra.mxu1 %v2447_v28  ;;  %v2935_v51 = vld [vmem:[#allocation17 + $0x1e0] sm:$0xff]  ;;  %v2901_v28 = vld [vmem:[#allocation17 + $0xd0] sm:$0xff] }
 0x7cb   : > { %2765 = vmatpush.msra.mxu2 %v2320_v11  ;;  %2785 = vmatpush.msra.mxu3 %v2448_v13  ;;  %v2967_v9 = vld [vmem:[#allocation17 + $0x2e0] sm:$0xff]  ;;  %v2933_v11 = vld [vmem:[#allocation17 + $0x1d0] sm:$0xff] }
 0x7cc   : > { %2726 = vmatpush.msra.mxu0 %v2311_v18  ;;  %2746 = vmatpush.msra.mxu1 %v2439_v15  ;;  %v2965_v13 = vld [vmem:[#allocation17 + $0x2d0] sm:$0xff]  ;;  %v2899_v18 = vld [vmem:[#allocation17 + $0xc0] sm:$0xff] }
 0x7cd   : > { %2766 = vmatpush.msra.mxu2 %v2312_v10  ;;  %2786 = vmatpush.msra.mxu3 %v2440_v16  ;;  %v2931_v15 = vld [vmem:[#allocation17 + $0x1c0] sm:$0xff]  ;;  %v2897_v10 = vld [vmem:[#allocation17 + $0xb0] sm:$0xff] }
 0x7ce   : > { %2727 = vmatpush.msra.mxu0 %v2303_v17  ;;  %2747 = vmatpush.msra.mxu1 %v2431_v19  ;;  %v2929_v16 = vld [vmem:[#allocation17 + $0x1b0] sm:$0xff]  ;;  %v2895_v17 = vld [vmem:[#allocation17 + $0xa0] sm:$0xff] }
 0x7cf   : > { %2767 = vmatpush.msra.mxu2 %v2304_v42  ;;  %2787 = vmatpush.msra.mxu3 %v2432_v20  ;;  %v2927_v19 = vld [vmem:[#allocation17 + $0x1a0] sm:$0xff]  ;;  %v2893_v42 = vld [vmem:[#allocation17 + $0x90] sm:$0xff] }
 0x7d0   : > { %2728 = vmatpush.msra.mxu0 %v2295_v22  ;;  %2748 = vmatpush.msra.mxu1 %v2423_v46  ;;  %v2925_v20 = vld [vmem:[#allocation17 + $0x190] sm:$0xff]  ;;  %v2891_v22 = vld [vmem:[#allocation17 + $0x80] sm:$0xff] }
 0x7d1   : > { %2768 = vmatpush.msra.mxu2 %v2296_v23  ;;  %2788 = vmatpush.msra.mxu3 %v2424_v24  ;;  %v2923_v46 = vld [vmem:[#allocation17 + $0x180] sm:$0xff]  ;;  %v2889_v23 = vld [vmem:[#allocation17 + $0x70] sm:$0xff] }
 0x7d2   : > { %2729 = vmatpush.msra.mxu0 %v2287_v7  ;;  %2749 = vmatpush.msra.mxu1 %v2415_v29  ;;  %v2921_v24 = vld [vmem:[#allocation17 + $0x170] sm:$0xff]  ;;  %v2887_v7 = vld [vmem:[#allocation17 + $0x60] sm:$0xff] }
 0x7d3   : > { %2769 = vmatpush.msra.mxu2 %v2288_v31  ;;  %2789 = vmatpush.msra.mxu3 %v2416_v32  ;;  %v2919_v29 = vld [vmem:[#allocation17 + $0x160] sm:$0xff]  ;;  %v2885_v31 = vld [vmem:[#allocation17 + $0x50] sm:$0xff] }
 0x7d4   : > { %2730 = vmatpush.msra.mxu0 %v2279_v34  ;;  %2750 = vmatpush.msra.mxu1 %v2407_v35  ;;  %v2917_v32 = vld [vmem:[#allocation17 + $0x150] sm:$0xff]  ;;  %v2883_v34 = vld [vmem:[#allocation17 + $0x40] sm:$0xff] }
 0x7d5   : > { %2770 = vmatpush.msra.mxu2 %v2280_v21  ;;  %2790 = vmatpush.msra.mxu3 %v2408_v2  ;;  %v2915_v35 = vld [vmem:[#allocation17 + $0x140] sm:$0xff]  ;;  %v2881_v21 = vld [vmem:[#allocation17 + $0x30] sm:$0xff] }
 0x7d6   : > { %2731 = vmatpush.msra.mxu0 %v2271_v61  ;;  %2751 = vmatpush.msra.mxu1 %v2399_v33  ;;  %v2913_v2 = vld [vmem:[#allocation17 + $0x130] sm:$0xff]  ;;  %v2879_v61 = vld [vmem:[#allocation17 + $0x20] sm:$0xff] }
 0x7d7   : > { %2771 = vmatpush.msra.mxu2 %v2272_v8  ;;  %2791 = vmatpush.msra.mxu3 %v2400_v36  ;;  %v2911_v33 = vld [vmem:[#allocation17 + $0x120] sm:$0xff]  ;;  %v2877_v8 = vld [vmem:[#allocation17 + $0x10] sm:$0xff] }
 0x7d8   : > { %2732 = vmatpush.msra.mxu0 %v2263_v37  ;;  %2752 = vmatpush.msra.mxu1 %v2391_v38  ;;  %v2909_v36 = vld [vmem:[#allocation17 + $0x110] sm:$0xff]  ;;  %v2875_v37 = vld [vmem:[#allocation17] sm:$0xff] }
 0x7d9   : > { %2772 = vmatpush.msra.mxu2 %v2264_v39  ;;  %2792 = vmatpush.msra.mxu3 %v2392_v30  ;;  %v3033_v38 = vld [vmem:[#allocation17 + $0x4f0] sm:$0xff]  ;;  %v2907_v39 = vld [vmem:[#allocation17 + $0x100] sm:$0xff] }
 0x7da   : > { %2733 = vmatpush.msra.mxu0 %v2255_v40  ;;  %2753 = vmatpush.msra.mxu1 %v2383_v41  ;;  %v3031_v30 = vld [vmem:[#allocation17 + $0x4e0] sm:$0xff]  ;;  %v3001_v41 = vld [vmem:[#allocation17 + $0x3f0] sm:$0xff] }
 0x7db   : > { %2773 = vmatpush.msra.mxu2 %v2256_v43  ;;  %2793 = vmatpush.msra.mxu3 %v2384_v44  ;;  %v2963_v40 = vld [vmem:[#allocation17 + $0x2c0] sm:$0xff]  ;;  %v3065_v43 = vld [vmem:[#allocation17 + $0x5f0] sm:$0xff] }
 0x7dc   : > { %2734 = vmatpush.msra.mxu0 %v2247_v12  ;;  %2754 = vmatpush.msra.mxu1 %v2375_v45  ;;  %v2961_v44 = vld [vmem:[#allocation17 + $0x2b0] sm:$0xff]  ;;  %v2999_v12 = vld [vmem:[#allocation17 + $0x3e0] sm:$0xff] }
 0x7dd   : > { %2774 = vmatpush.msra.mxu2 %v2248_v48  ;;  %2794 = vmatpush.msra.mxu3 %v2376_v49  ;;  %v3029_v45 = vld [vmem:[#allocation17 + $0x4d0] sm:$0xff]  ;;  %v3063_v48 = vld [vmem:[#allocation17 + $0x5e0] sm:$0xff] }
 0x7de   : > { %2735 = vmatpush.msra.mxu0 %v2239_v50  ;;  %2755 = vmatpush.msra.mxu1 %v2367_v52  ;;  %v2959_v49 = vld [vmem:[#allocation17 + $0x2a0] sm:$0xff]  ;;  %v2997_v50 = vld [vmem:[#allocation17 + $0x3d0] sm:$0xff] }
 0x7df   : > { %2775 = vmatpush.msra.mxu2 %v2240_v54  ;;  %2795 = vmatpush.msra.mxu3 %v2368_v47  ;;  %v3061_v52 = vld [vmem:[#allocation17 + $0x5d0] sm:$0xff]  ;;  %v3027_v54 = vld [vmem:[#allocation17 + $0x4c0] sm:$0xff] }
 0x7e0   : > { %2736 = vmatpush.msra.mxu0 %v2231_v55  ;;  %2756 = vmatpush.msra.mxu1 %v2359_v56  ;;  %v3025_v47 = vld [vmem:[#allocation17 + $0x4b0] sm:$0xff]  ;;  %v2995_v56 = vld [vmem:[#allocation17 + $0x3c0] sm:$0xff] }
 0x7e1   : > { %2776 = vmatpush.msra.mxu2 %v2232_v57  ;;  %2796 = vmatpush.msra.mxu3 %v2360_v58  ;;  %v2957_v55 = vld [vmem:[#allocation17 + $0x290] sm:$0xff]  ;;  %v3059_v57 = vld [vmem:[#allocation17 + $0x5c0] sm:$0xff] }
 0x7e2   : > { %2737 = vmatpush.msra.mxu0 %v2223_v60  ;;  %2757 = vmatpush.msra.mxu1 %v2351_v59  ;;  %v3023_v58 = vld [vmem:[#allocation17 + $0x4a0] sm:$0xff]  ;;  %v2993_v59 = vld [vmem:[#allocation17 + $0x3b0] sm:$0xff] }
 0x7e3   : > { %2777 = vmatpush.msra.mxu2 %v2224_v0  ;;  %2797 = vmatpush.msra.mxu3 %v2352_v1  ;;  %v2955_v60 = vld [vmem:[#allocation17 + $0x280] sm:$0xff]  ;;  %v3057_v0 = vld [vmem:[#allocation17 + $0x5b0] sm:$0xff] }
 0x7e4   : > { %2738 = vmatpush.msra.mxu0 %v2215_v3  ;;  %2758 = vmatpush.msra.mxu1 %v2343_v4  ;;  %v3021_v1 = vld [vmem:[#allocation17 + $0x490] sm:$0xff]  ;;  %v2991_v4 = vld [vmem:[#allocation17 + $0x3a0] sm:$0xff] }
 0x7e5   : > { %2778 = vmatpush.msra.mxu2 %v2216_v25  ;;  %2798 = vmatpush.msra.mxu3 %v2344_v27  ;;  %v2953_v3 = vld [vmem:[#allocation17 + $0x270] sm:$0xff]  ;;  %v3055_v25 = vld [vmem:[#allocation17 + $0x5a0] sm:$0xff] }
 0x7e6   : > { %2739 = vmatmul.f32.vlgmr.msra.gmra.mxu0 %v4912_v62  ;;  %2759 = vmatmul.f32.vlgmr.msra.gmra.mxu1 %v4914_v63  ;;  %v2951_v27 = vld [vmem:[#allocation17 + $0x260] sm:$0xff] }
 0x7e7   : > { %2779 = vmatmul.f32.vlgmr.msra.gmra.mxu2 %v4912_v62  ;;  %2799 = vmatmul.f32.vlgmr.msra.gmra.mxu3 %v4914_v63 }
 0x7e8   : > { %3137 = vmatpush.msrb.mxu0 %v2905_v26  ;;  %3157 = vmatpush.msrb.mxu1 %v2937_v53  ;;  %v2989_v26 = vld [vmem:[#allocation17 + $0x390] sm:$0xff]  ;;  %v3019_v53 = vld [vmem:[#allocation17 + $0x480] sm:$0xff] }
 0x7e9   : > { %3177 = vmatpush.msrb.mxu2 %v2969_v5  ;;  %3197 = vmatpush.msrb.mxu3 %v3001_v41  ;;  %v3053_v5 = vld [vmem:[#allocation17 + $0x590] sm:$0xff] }
 0x7ea   : > { %3138 = vmatpush.msrb.mxu0 %v2903_v6  ;;  %3158 = vmatpush.msrb.mxu1 %v2935_v51  ;;  %v3017_v6 = vld [vmem:[#allocation17 + $0x470] sm:$0xff] }
 0x7eb   : > { %3178 = vmatpush.msrb.mxu2 %v2967_v9  ;;  %3198 = vmatpush.msrb.mxu3 %v2999_v12  ;;  %v2949_v51 = vld [vmem:[#allocation17 + $0x250] sm:$0xff]  ;;  %v2987_v9 = vld [vmem:[#allocation17 + $0x380] sm:$0xff] }
 0x7ec   : > { %3139 = vmatpush.msrb.mxu0 %v2901_v28  ;;  %3159 = vmatpush.msrb.mxu1 %v2933_v11  ;;  %v4935_v28 = vld [vmem:[%s5112_s6] sm:$0xff]  ;;  %v3051_v11 = vld [vmem:[#allocation17 + $0x580] sm:$0xff] }
 0x7ed   : > { %3179 = vmatpush.msrb.mxu2 %v2965_v13  ;;  %3199 = vmatpush.msrb.mxu3 %v2997_v50  ;;  %v3015_v13 = vld [vmem:[#allocation17 + $0x460] sm:$0xff]  ;;  %v2468_v41 = vperm.slane %v4935_v28, 1 }
 0x7ee   : > { %3140 = vmatpush.msrb.mxu0 %v2899_v18  ;;  %3160 = vmatpush.msrb.mxu1 %v2931_v15  ;;  %v2947_v18 = vld [vmem:[#allocation17 + $0x240] sm:$0xff]  ;;  %v2985_v15 = vld [vmem:[#allocation17 + $0x370] sm:$0xff] }
 0x7ef   : > { %3180 = vmatpush.msrb.mxu2 %v2963_v40  ;;  %3200 = vmatpush.msrb.mxu3 %v2995_v56  ;;  %v3095_v40 = vld [vmem:[#allocation17 + $0x6e0] sm:$0xff] }
 0x7f0   : > { %3141 = vmatpush.msrb.mxu0 %v2897_v10  ;;  %3161 = vmatpush.msrb.mxu1 %v2929_v16  ;;  %v3049_v10 = vld [vmem:[#allocation17 + $0x570] sm:$0xff]  ;;  %v3091_v56 = vld [vmem:[#allocation17 + $0x6c0] sm:$0xff] }
 0x7f1   : > { %3181 = vmatpush.msrb.mxu2 %v2961_v44  ;;  %3201 = vmatpush.msrb.mxu3 %v2993_v59  ;;  %v2945_v16 = vld [vmem:[#allocation17 + $0x230] sm:$0xff] }
 0x7f2   : > { %3142 = vmatpush.msrb.mxu0 %v2895_v17  ;;  %3162 = vmatpush.msrb.mxu1 %v2927_v19  ;;  %v2983_v17 = vld [vmem:[#allocation17 + $0x360] sm:$0xff]  ;;  %v3013_v19 = vld [vmem:[#allocation17 + $0x450] sm:$0xff] }
 0x7f3   : > { %3182 = vmatpush.msrb.mxu2 %v2959_v49  ;;  %3202 = vmatpush.msrb.mxu3 %v2991_v4  ;;  %v3037_v44 = vld [vmem:[#allocation17 + $0x510] sm:$0xff] }
 0x7f4   : > { %3143 = vmatpush.msrb.mxu0 %v2893_v42  ;;  %3163 = vmatpush.msrb.mxu1 %v2925_v20  ;;  %v3047_v42 = vld [vmem:[#allocation17 + $0x560] sm:$0xff] }
 0x7f5   : > { %3183 = vmatpush.msrb.mxu2 %v2957_v55  ;;  %3203 = vmatpush.msrb.mxu3 %v2989_v26  ;;  %v2943_v20 = vld [vmem:[#allocation17 + $0x220] sm:$0xff] }
 0x7f6   : > { %3144 = vmatpush.msrb.mxu0 %v2891_v22  ;;  %3164 = vmatpush.msrb.mxu1 %v2923_v46  ;;  %v2981_v22 = vld [vmem:[#allocation17 + $0x350] sm:$0xff] }
 0x7f7   : > { %3184 = vmatpush.msrb.mxu2 %v2955_v60  ;;  %3204 = vmatpush.msrb.mxu3 %v2987_v9  ;;  %v3045_v46 = vld [vmem:[#allocation17 + $0x550] sm:$0xff] }
 0x7f8   : > { %3145 = vmatpush.msrb.mxu0 %v2889_v23  ;;  %3165 = vmatpush.msrb.mxu1 %v2921_v24  ;;  %v2467_v23 = vperm.slane %v4935_v28, 0  ;;  %v3011_v24 = vld [vmem:[#allocation17 + $0x440] sm:$0xff] }
 0x7f9   : > { %3185 = vmatpush.msrb.mxu2 %v2953_v3  ;;  %3205 = vmatpush.msrb.mxu3 %v2985_v15  ;;  %v3127_v3 = vld [vmem:[#allocation17 + $0x7e0] sm:$0xff] }
 0x7fa   : > { %3146 = vmatpush.msrb.mxu0 %v2887_v7  ;;  %3166 = vmatpush.msrb.mxu1 %v2919_v29  ;;  %v2941_v7 = vld [vmem:[#allocation17 + $0x210] sm:$0xff]  ;;  %v2979_v29 = vld [vmem:[#allocation17 + $0x340] sm:$0xff] }
 0x7fb   : > { %3186 = vmatpush.msrb.mxu2 %v2951_v27  ;;  %3206 = vmatpush.msrb.mxu3 %v2983_v17  ;;  %v3121_v17 = vld [vmem:[#allocation17 + $0x7b0] sm:$0xff] }
 0x7fc   : > { %3147 = vmatpush.msrb.mxu0 %v2885_v31  ;;  %3167 = vmatpush.msrb.mxu1 %v2917_v32  ;;  %v3043_v31 = vld [vmem:[#allocation17 + $0x540] sm:$0xff]  ;;  %v3009_v32 = vld [vmem:[#allocation17 + $0x430] sm:$0xff] }
 0x7fd   : > { %3187 = vmatpush.msrb.mxu2 %v2949_v51  ;;  %3207 = vmatpush.msrb.mxu3 %v2981_v22 }
 0x7fe   : > { %3148 = vmatpush.msrb.mxu0 %v2883_v34  ;;  %3168 = vmatpush.msrb.mxu1 %v2915_v35  ;;  %v2939_v34 = vld [vmem:[#allocation17 + $0x200] sm:$0xff] }
 0x7ff   : > { %3188 = vmatpush.msrb.mxu2 %v2947_v18  ;;  %3208 = vmatpush.msrb.mxu3 %v2979_v29  ;;  %v3123_v18 = vld [vmem:[#allocation17 + $0x7c0] sm:$0xff] }
 0x800   : > { %3149 = vmatpush.msrb.mxu0 %v2881_v21  ;;  %3169 = vmatpush.msrb.mxu1 %v2913_v2  ;;  %v2977_v21 = vld [vmem:[#allocation17 + $0x330] sm:$0xff] }
 0x801   : > { %3189 = vmatpush.msrb.mxu2 %v2945_v16  ;;  %v3041_v2 = vld [vmem:[#allocation17 + $0x530] sm:$0xff]  ;;  %3209 = vmatpush.msrb.mxu3 %v2977_v21  ;;  %v3083_v16 = vld [vmem:[#allocation17 + $0x680] sm:$0xff] }
 0x802   : > { %3150 = vmatpush.msrb.mxu0 %v2879_v61  ;;  %3170 = vmatpush.msrb.mxu1 %v2911_v33  ;;  %v3007_v33 = vld [vmem:[#allocation17 + $0x420] sm:$0xff] }
 0x803   : > { %3190 = vmatpush.msrb.mxu2 %v2943_v20 }
 0x804   : > { %3151 = vmatpush.msrb.mxu0 %v2877_v8  ;;  %3171 = vmatpush.msrb.mxu1 %v2909_v36  ;;  %v3097_v8 = vld [vmem:[#allocation17 + $0x6f0] sm:$0xff] }
 0x805   : > { %3191 = vmatpush.msrb.mxu2 %v2941_v7 }
 0x806   : > { %3152 = vmatpush.msrb.mxu0 %v2875_v37  ;;  %3172 = vmatpush.msrb.mxu1 %v2907_v39  ;;  %v2975_v37 = vld [vmem:[#allocation17 + $0x320] sm:$0xff] }
 0x807   : > { %3192 = vmatpush.msrb.mxu2 %v2939_v34  ;;  %3210 = vmatpush.msrb.mxu3 %v2975_v37  ;;  %v3117_v34 = vld [vmem:[#allocation17 + $0x790] sm:$0xff] }
 0x808   : > { %3217 = vmatpush.msra.mxu0 %v3033_v38  ;;  %3237 = vmatpush.msra.mxu1 %v3065_v43  ;;  %v3039_v38 = vld [vmem:[#allocation17 + $0x520] sm:$0xff]  ;;  %v2973_v43 = vld [vmem:[#allocation17 + $0x310] sm:$0xff] }
 0x809   : > { %3257 = vmatpush.msra.mxu2 %v3097_v8  ;;  %3211 = vmatpush.msrb.mxu3 %v2973_v43  ;;  %v3113_v43 = vld [vmem:[#allocation17 + $0x770] sm:$0xff] }
 0x80a   : > { %3218 = vmatpush.msra.mxu0 %v3031_v30  ;;  %3238 = vmatpush.msra.mxu1 %v3063_v48  ;;  %v3005_v30 = vld [vmem:[#allocation17 + $0x410] sm:$0xff] }
 0x80b   : > { %v3093_v48 = vld [vmem:[#allocation17 + $0x6d0] sm:$0xff]  ;;  %3258 = vmatpush.msra.mxu2 %v3095_v40 }
 0x80c   : > { %3219 = vmatpush.msra.mxu0 %v3029_v45  ;;  %3239 = vmatpush.msra.mxu1 %v3061_v52  ;;  %v3003_v45 = vld [vmem:[#allocation17 + $0x400] sm:$0xff]  ;;  %v2469_v52 = vperm.slane %v4935_v28, 2 }
 0x80d   : > { %3259 = vmatpush.msra.mxu2 %v3093_v48  ;;  %v3071_v48 = vld [vmem:[#allocation17 + $0x620] sm:$0xff] }
 0x80e   : > { %3220 = vmatpush.msra.mxu0 %v3027_v54  ;;  %3240 = vmatpush.msra.mxu1 %v3059_v57  ;;  %v2971_v54 = vld [vmem:[#allocation17 + $0x300] sm:$0xff]  ;;  %v3129_v57 = vld [vmem:[#allocation17 + $0x7f0] sm:$0xff] }
 0x80f   : > { %3212 = vmatpush.msrb.mxu3 %v2971_v54  ;;  %3260 = vmatpush.msra.mxu2 %v3091_v56  ;;  %v3109_v54 = vld [vmem:[#allocation17 + $0x750] sm:$0xff] }
 0x810   : > { %3221 = vmatpush.msra.mxu0 %v3025_v47  ;;  %3241 = vmatpush.msra.mxu1 %v3057_v0  ;;  %v3035_v47 = vld [vmem:[#allocation17 + $0x500] sm:$0xff]  ;;  %v3069_v56 = vld [vmem:[#allocation17 + $0x610] sm:$0xff] }
 0x811   : > { %3277 = vmatpush.msra.mxu3 %v3129_v57  ;;  %v2900_v57 = vld [vmem:[#allocation17 + $0xc8] sm:$0xff] }
 0x812   : > { %3222 = vmatpush.msra.mxu0 %v3023_v58  ;;  %3242 = vmatpush.msra.mxu1 %v3055_v25 }
 0x813   : > { %3278 = vmatpush.msra.mxu3 %v3127_v3  ;;  %v3107_v3 = vld [vmem:[#allocation17 + $0x740] sm:$0xff] }
 0x814   : > { %3223 = vmatpush.msra.mxu0 %v3021_v1  ;;  %3243 = vmatpush.msra.mxu1 %v3053_v5  ;;  %v3089_v1 = vld [vmem:[#allocation17 + $0x6b0] sm:$0xff] }
 0x815   : > { %3261 = vmatpush.msra.mxu2 %v3089_v1  ;;  %v3125_v5 = vld [vmem:[#allocation17 + $0x7d0] sm:$0xff]  ;;  %v2938_v1 = vld [vmem:[#allocation17 + $0x1f8] sm:$0xff] }
 0x816   : > { %3224 = vmatpush.msra.mxu0 %v3019_v53  ;;  %3244 = vmatpush.msra.mxu1 %v3051_v11  ;;  %v3087_v53 = vld [vmem:[#allocation17 + $0x6a0] sm:$0xff]  ;;  %v2470_v11 = vperm.slane %v4935_v28, 3 }
 0x817   : > { %3262 = vmatpush.msra.mxu2 %v3087_v53  ;;  %3279 = vmatpush.msra.mxu3 %v3125_v5  ;;  %v2936_v53 = vld [vmem:[#allocation17 + $0x1e8] sm:$0xff] }
 0x818   : > { %3225 = vmatpush.msra.mxu0 %v3017_v6  ;;  %3245 = vmatpush.msra.mxu1 %v3049_v10 }
 0x819   : > { %3280 = vmatpush.msra.mxu3 %v3123_v18  ;;  %v2894_v18 = vld [vmem:[#allocation17 + $0x98] sm:$0xff] }
 0x81a   : > { %3226 = vmatpush.msra.mxu0 %v3015_v13  ;;  %3246 = vmatpush.msra.mxu1 %v3047_v42  ;;  %v3085_v13 = vld [vmem:[#allocation17 + $0x690] sm:$0xff] }
 0x81b   : > { %3263 = vmatpush.msra.mxu2 %v3085_v13  ;;  %3281 = vmatpush.msra.mxu3 %v3121_v17  ;;  %v2968_v17 = vld [vmem:[#allocation17 + $0x2e8] sm:$0xff] }
 0x81c   : > { %3227 = vmatpush.msra.mxu0 %v3013_v19  ;;  %3247 = vmatpush.msra.mxu1 %v3045_v46  ;;  %v3081_v46 = vld [vmem:[#allocation17 + $0x670] sm:$0xff] }
 0x81d   : > { %v2500_v35 = vpop.f32.mrf.mxu0  ;;  %v2520_v36 = vpop.f32.mrf.mxu1  ;;  %3264 = vmatpush.msra.mxu2 %v3083_v16  ;;  %v2932_v16 = vld [vmem:[#allocation17 + $0x1c8] sm:$0xff] }
 0x81e   : > { %3228 = vmatpush.msra.mxu0 %v3011_v24  ;;  %v2501_v61 = vadd.f32 %v2500_v35, %v2467_v23  ;;  %3248 = vmatpush.msra.mxu1 %v3043_v31  ;;  %v3119_v23 = vld [vmem:[#allocation17 + $0x7a0] sm:$0xff] }
 0x81f   : > { %3265 = vmatpush.msra.mxu2 %v3081_v46  ;;  %3282 = vmatpush.msra.mxu3 %v3119_v23 }
 0x820   : > { %3229 = vmatpush.msra.mxu0 %v3009_v32  ;;  %v4938_v39 = vadd.f32 %v2520_v36, %v2501_v61  ;;  %3249 = vmatpush.msra.mxu1 %v3041_v2  ;;  %v3079_v32 = vld [vmem:[#allocation17 + $0x660] sm:$0xff]  ;;  %v3077_v2 = vld [vmem:[#allocation17 + $0x650] sm:$0xff] }
 0x821   : > { %v3115_v61 = vld [vmem:[#allocation17 + $0x780] sm:$0xff]  ;;  %3266 = vmatpush.msra.mxu2 %v3079_v32  ;;  %3283 = vmatpush.msra.mxu3 %v3117_v34  ;;  %v2472_v32 = vperm.slane %v4935_v28, 5  ;;  %v2890_v34 = vld [vmem:[#allocation17 + $0x78] sm:$0xff] }
 0x822   : > { %3230 = vmatpush.msra.mxu0 %v3007_v33  ;;  %v2811_v12 = vmul.f32 0.044715, %v4938_v39  ;;  %3250 = vmatpush.msra.mxu1 %v3039_v38  ;;  %v2803_v8 = vmul.f32 0.5, %v4938_v39  ;;  %v3075_v38 = vld [vmem:[#allocation17 + $0x640] sm:$0xff] }
 0x823   : > { %3267 = vmatpush.msra.mxu2 %v3077_v2  ;;  %3284 = vmatpush.msra.mxu3 %v3115_v61  ;;  %v2928_v2 = vld [vmem:[#allocation17 + $0x1a8] sm:$0xff]  ;;  %v3099_v61 = vld [vmem:[#allocation17 + $0x700] sm:$0xff] }
 0x824   : > { %3231 = vmatpush.msra.mxu0 %v3005_v30  ;;  %v2819_v49 = vmul.f32 %v2811_v12, %v4938_v39  ;;  %v2540_v50 = vpop.f32.mrf.mxu2  ;;  %3251 = vmatpush.msra.mxu1 %v3037_v44  ;;  %v2560_v60 = vpop.f32.mrf.mxu3  ;;  %v3073_v44 = vld [vmem:[#allocation17 + $0x630] sm:$0xff] }
 0x825   : > { %v2541_v55 = vadd.f32 %v2540_v50, %v2468_v41  ;;  %v2906_v41 = vld [vmem:[#allocation17 + $0xf8] sm:$0xff]  ;;  %3268 = vmatpush.msra.mxu2 %v3075_v38  ;;  %3285 = vmatpush.msra.mxu3 %v3113_v43 }
 0x826   : > { %3232 = vmatpush.msra.mxu0 %v3003_v45  ;;  %v2827_v58 = vmul.f32 %v2819_v49, %v4938_v39  ;;  %3252 = vmatpush.msra.mxu1 %v3035_v47  ;;  %v3111_v45 = vld [vmem:[#allocation17 + $0x760] sm:$0xff]  ;;  %v2902_v50 = vld [vmem:[#allocation17 + $0xd8] sm:$0xff] }
 0x827   : > { %v4945_v59 = vadd.f32 %v2560_v60, %v2541_v55  ;;  %v2580_v0 = vpop.f32.mrf.mxu0  ;;  %v2600_v26 = vpop.f32.mrf.mxu1  ;;  %3269 = vmatpush.msra.mxu2 %v3073_v44  ;;  %3286 = vmatpush.msra.mxu3 %v3111_v45  ;;  %v3002_v38 = vld [vmem:[#allocation17 + $0x3f8] sm:$0xff]  ;;  %v3000_v45 = vld [vmem:[#allocation17 + $0x3e8] sm:$0xff] }
 0x828   : > { %v2581_v4 = vadd.f32 %v2580_v0, %v2469_v52  ;;  %v2835_v25 = vadd.f32 %v2827_v58, %v4938_v39  ;;  %v2904_v39 = vld [vmem:[#allocation17 + $0xe8] sm:$0xff]  ;;  %v2962_v43 = vld [vmem:[#allocation17 + $0x2b8] sm:$0xff] }
 0x829   : > { %v2812_v27 = vmul.f32 0.044715, %v4945_v59  ;;  %v2804_v47 = vmul.f32 0.5, %v4945_v59  ;;  %3270 = vmatpush.msra.mxu2 %v3071_v48  ;;  %3287 = vmatpush.msra.mxu3 %v3109_v54 }
 0x82a   : > { %v4949_v6 = vadd.f32 %v2600_v26, %v2581_v4  ;;  %v2843_v51 = vmul.f32 0.7978846, %v2835_v25  ;;  %v2471_v26 = vperm.slane %v4935_v28, 4 }
 0x82b   : > { %v2820_v9 = vmul.f32 %v2812_v27, %v4945_v59  ;;  %v2898_v27 = vld [vmem:[#allocation17 + $0xb8] sm:$0xff]  ;;  %3271 = vmatpush.msra.mxu2 %v3069_v56  ;;  %3288 = vmatpush.msra.mxu3 %v3107_v3 }
 0x82c   : > { %v2813_v15 = vmul.f32 0.044715, %v4949_v6  ;;  %3956 = vtanh.f32 %v2843_v51  ;;  %v2805_v4 = vmul.f32 0.5, %v4949_v6  ;;  %v2896_v51 = vld [vmem:[#allocation17 + $0xa8] sm:$0xff]  ;;  %v2882_v56 = vld [vmem:[#allocation17 + $0x38] sm:$0xff] }
 0x82d   : > { %v2828_v10 = vmul.f32 %v2820_v9, %v4945_v59  ;;  %v3105_v9 = vld [vmem:[#allocation17 + $0x730] sm:$0xff] }
 0x82e   : > { %v2821_v19 = vmul.f32 %v2813_v15, %v4949_v6  ;;  %v2620_v42 = vpop.f32.mrf.mxu2  ;;  %v2640_v7 = vpop.f32.mrf.mxu3  ;;  %v3103_v15 = vld [vmem:[#allocation17 + $0x720] sm:$0xff]  ;;  %3289 = vmatpush.msra.mxu3 %v3105_v9  ;;  %v2916_v9 = vld [vmem:[#allocation17 + $0x148] sm:$0xff] }
 0x82f   : > { %v2621_v20 = vadd.f32 %v2620_v42, %v2470_v11  ;;  %v2836_v22 = vadd.f32 %v2828_v10, %v4945_v59  ;;  %v3067_v59 = vld [vmem:[#allocation17 + $0x600] sm:$0xff]  ;;  %v2934_v11 = vld [vmem:[#allocation17 + $0x1d8] sm:$0xff] }
 0x830   : > { %v2829_v24 = vmul.f32 %v2821_v19, %v4949_v6  ;;  %3272 = vmatpush.msra.mxu2 %v3067_v59  ;;  %3290 = vmatpush.msra.mxu3 %v3103_v15  ;;  %v2994_v59 = vld [vmem:[#allocation17 + $0x3b8] sm:$0xff] }
 0x831   : > { %v4958_v29 = vadd.f32 %v2640_v7, %v2621_v20  ;;  %v2844_v31 = vmul.f32 0.7978846, %v2836_v22  ;;  %v2892_v20 = vld [vmem:[#allocation17 + $0x88] sm:$0xff]  ;;  %v3101_v22 = vld [vmem:[#allocation17 + $0x710] sm:$0xff]  ;;  %v2930_v7 = vld [vmem:[#allocation17 + $0x1b8] sm:$0xff] }
 0x832   : > { %v3957_v35 = vpop.eup %3956  ;;  %v2837_v21 = vadd.f32 %v2829_v24, %v4949_v6  ;;  %v2970_v6 = vld [vmem:[#allocation17 + $0x2f8] sm:$0xff]  ;;  %3291 = vmatpush.msra.mxu3 %v3101_v22 }
 0x833   : > { %v2814_v33 = vmul.f32 0.044715, %v4958_v29  ;;  %v2859_v36 = vadd.f32 1.0, %v3957_v35  ;;  %3958 = vtanh.f32 %v2844_v31  ;;  %v2806_v23 = vmul.f32 0.5, %v4958_v29  ;;  %v2966_v31 = vld [vmem:[#allocation17 + $0x2d8] sm:$0xff] }
 0x834   : > { %v2845_v37 = vmul.f32 0.7978846, %v2837_v21  ;;  %3292 = vmatpush.msra.mxu3 %v3099_v61  ;;  %v2914_v15 = vld [vmem:[#allocation17 + $0x138] sm:$0xff]  ;;  %v3032_v61 = vld [vmem:[#allocation17 + $0x4e8] sm:$0xff] }
 0x835   : > { %v2822_v30 = vmul.f32 %v2814_v33, %v4958_v29  ;;  %v4964_v40 = vmul.f32 %v2859_v36, %v2803_v8  ;;  %v2888_v33 = vld [vmem:[#allocation17 + $0x68] sm:$0xff] }
 0x836   : > { %3960 = vtanh.f32 %v2845_v37  ;;  %v2926_v37 = vld [vmem:[#allocation17 + $0x198] sm:$0xff] }
 0x837   : > { %v2830_v12 = vmul.f32 %v2822_v30, %v4958_v29  ;;  %3153 = vmatmul.f32.vlgmr.msrb.gmra.mxu0 %v4964_v40 }
 0x838   : > { %3297 = vmatpush.msrb.mxu0 %v2906_v41  ;;  %v2886_v41 = vld [vmem:[#allocation17 + $0x58] sm:$0xff] }
 0x839   : > { %v3959_v49 = vpop.eup %3958  ;;  %v2838_v52 = vadd.f32 %v2830_v12, %v4958_v29  ;;  %v2964_v29 = vld [vmem:[#allocation17 + $0x2c8] sm:$0xff] }
 0x83a   : > { %3298 = vmatpush.msrb.mxu0 %v2904_v39  ;;  %v2860_v55 = vadd.f32 1.0, %v3959_v49  ;;  %v2924_v39 = vld [vmem:[#allocation17 + $0x188] sm:$0xff] }
 0x83b   : > { %v2846_v58 = vmul.f32 0.7978846, %v2838_v52  ;;  %v2884_v49 = vld [vmem:[#allocation17 + $0x48] sm:$0xff]  ;;  %v2922_v52 = vld [vmem:[#allocation17 + $0x178] sm:$0xff] }
 0x83c   : > { %v3961_v60 = vpop.eup %3960  ;;  %3299 = vmatpush.msrb.mxu0 %v2902_v50  ;;  %v4970_v0 = vmul.f32 %v2860_v55, %v2804_v47  ;;  %v2960_v50 = vld [vmem:[#allocation17 + $0x2a8] sm:$0xff]  ;;  %v2998_v47 = vld [vmem:[#allocation17 + $0x3d8] sm:$0xff] }
 0x83d   : > { %v2861_v25 = vadd.f32 1.0, %v3961_v60  ;;  %3962 = vtanh.f32 %v2846_v58  ;;  %v2920_v58 = vld [vmem:[#allocation17 + $0x168] sm:$0xff] }
 0x83e   : > { %3173 = vmatmul.f32.vlgmr.msrb.gmra.mxu1 %v4970_v0  ;;  %3300 = vmatpush.msrb.mxu0 %v2900_v57  ;;  %v2958_v57 = vld [vmem:[#allocation17 + $0x298] sm:$0xff] }
 0x83f   : > { %3317 = vmatpush.msrb.mxu1 %v2938_v1  ;;  %v4975_v5 = vmul.f32 %v2861_v25, %v2805_v4  ;;  %v2996_v1 = vld [vmem:[#allocation17 + $0x3c8] sm:$0xff] }
 0x840   : > { %3301 = vmatpush.msrb.mxu0 %v2898_v27  ;;  %v2880_v4 = vld [vmem:[#allocation17 + $0x28] sm:$0xff]  ;;  %v2918_v27 = vld [vmem:[#allocation17 + $0x158] sm:$0xff] }
 0x841   : > { %v2660_v13 = vpop.f32.mrf.mxu0  ;;  %3193 = vmatmul.f32.vlgmr.msrb.gmra.mxu2 %v4975_v5  ;;  %3318 = vmatpush.msrb.mxu1 %v2936_v53  ;;  %v2680_v42 = vpop.f32.mrf.mxu1  ;;  %v2956_v25 = vld [vmem:[#allocation17 + $0x288] sm:$0xff]  ;;  %v2878_v53 = vld [vmem:[#allocation17 + $0x18] sm:$0xff] }
 0x842   : > { %v2661_v10 = vadd.f32 %v2660_v13, %v2471_v26  ;;  %3302 = vmatpush.msrb.mxu0 %v2896_v51  ;;  %3337 = vmatpush.msrb.mxu2 %v2970_v6  ;;  %v2954_v51 = vld [vmem:[#allocation17 + $0x278] sm:$0xff]  ;;  %v2876_v6 = vld [vmem:[#allocation17 + $0x8] sm:$0xff] }
 0x843   : > { %v3963_v19 = vpop.eup %3962  ;;  %3319 = vmatpush.msrb.mxu1 %v2934_v11  ;;  %v2992_v11 = vld [vmem:[#allocation17 + $0x3a8] sm:$0xff] }
 0x844   : > { %v4978_v46 = vadd.f32 %v2680_v42, %v2661_v10  ;;  %3303 = vmatpush.msrb.mxu0 %v2894_v18  ;;  %v2862_v24 = vadd.f32 1.0, %v3963_v19  ;;  %3338 = vmatpush.msrb.mxu2 %v2968_v17  ;;  %v2952_v18 = vld [vmem:[#allocation17 + $0x268] sm:$0xff]  ;;  %v2990_v10 = vld [vmem:[#allocation17 + $0x398] sm:$0xff] }
 0x845   : > { %3320 = vmatpush.msrb.mxu1 %v2932_v16  ;;  %v2950_v17 = vld [vmem:[#allocation17 + $0x258] sm:$0xff]  ;;  %v2912_v42 = vld [vmem:[#allocation17 + $0x128] sm:$0xff] }
 0x846   : > { %v2815_v35 = vmul.f32 0.044715, %v4978_v46  ;;  %v4983_v21 = vmul.f32 %v2862_v24, %v2806_v23  ;;  %3304 = vmatpush.msrb.mxu0 %v2892_v20  ;;  %3339 = vmatpush.msrb.mxu2 %v2966_v31  ;;  %v2988_v20 = vld [vmem:[#allocation17 + $0x388] sm:$0xff]  ;;  %v2807_v22 = vmul.f32 0.5, %v4978_v46 }
 0x847   : > { %3321 = vmatpush.msrb.mxu1 %v2930_v7  ;;  %v2948_v24 = vld [vmem:[#allocation17 + $0x248] sm:$0xff]  ;;  %v2910_v7 = vld [vmem:[#allocation17 + $0x118] sm:$0xff] }
 0x848   : > { %v2823_v8 = vmul.f32 %v2815_v35, %v4978_v46  ;;  %v2700_v36 = vpop.f32.mrf.mxu2  ;;  %3213 = vmatmul.f32.vlgmr.msrb.gmra.mxu3 %v4983_v21  ;;  %3305 = vmatpush.msrb.mxu0 %v2890_v34  ;;  %v2720_v12 = vpop.f32.mrf.mxu3  ;;  %v2986_v34 = vld [vmem:[#allocation17 + $0x378] sm:$0xff]  ;;  %v2908_v35 = vld [vmem:[#allocation17 + $0x108] sm:$0xff] }
 0x849   : > { %v2701_v30 = vadd.f32 %v2700_v36, %v2472_v32  ;;  %3322 = vmatpush.msrb.mxu1 %v2928_v2  ;;  %3340 = vmatpush.msrb.mxu2 %v2964_v29  ;;  %v3034_v32 = vld [vmem:[#allocation17 + $0x4f8] sm:$0xff] }
 0x84a   : > { %v2831_v44 = vmul.f32 %v2823_v8, %v4978_v46  ;;  %3306 = vmatpush.msrb.mxu0 %v2888_v33  ;;  %3357 = vmatpush.msrb.mxu3 %v3002_v38  ;;  %v2946_v2 = vld [vmem:[#allocation17 + $0x238] sm:$0xff]  ;;  %v2944_v33 = vld [vmem:[#allocation17 + $0x228] sm:$0xff] }
 0x84b   : > { %v4988_v48 = vadd.f32 %v2720_v12, %v2701_v30  ;;  %3323 = vmatpush.msrb.mxu1 %v2926_v37  ;;  %3341 = vmatpush.msrb.mxu2 %v2962_v43  ;;  %v3030_v8 = vld [vmem:[#allocation17 + $0x4d8] sm:$0xff]  ;;  %v2473_v43 = vperm.slane %v4935_v28, 6 }
 0x84c   : > { %3307 = vmatpush.msrb.mxu0 %v2886_v41  ;;  %v2839_v54 = vadd.f32 %v2831_v44, %v4978_v46  ;;  %3358 = vmatpush.msrb.mxu3 %v3000_v45  ;;  %v2984_v46 = vld [vmem:[#allocation17 + $0x368] sm:$0xff]  ;;  %v2982_v36 = vld [vmem:[#allocation17 + $0x358] sm:$0xff] }
 0x84d   : > { %v2816_v55 = vmul.f32 0.044715, %v4988_v48  ;;  %3324 = vmatpush.msrb.mxu1 %v2924_v39  ;;  %3342 = vmatpush.msrb.mxu2 %v2960_v50  ;;  %v2808_v37 = vmul.f32 0.5, %v4988_v48  ;;  %v2942_v30 = vld [vmem:[#allocation17 + $0x218] sm:$0xff]  ;;  %v3028_v41 = vld [vmem:[#allocation17 + $0x4c8] sm:$0xff] }
 0x84e   : > { %3308 = vmatpush.msrb.mxu0 %v2884_v49  ;;  %v2847_v60 = vmul.f32 0.7978846, %v2839_v54  ;;  %3359 = vmatpush.msrb.mxu3 %v2998_v47  ;;  %v3066_v12 = vld [vmem:[#allocation17 + $0x5f8] sm:$0xff]  ;;  %v2980_v45 = vld [vmem:[#allocation17 + $0x348] sm:$0xff] }
 0x84f   : > { %v2824_v3 = vmul.f32 %v2816_v55, %v4988_v48  ;;  %3325 = vmatpush.msrb.mxu1 %v2922_v52  ;;  %3343 = vmatpush.msrb.mxu2 %v2958_v57  ;;  %v3026_v39 = vld [vmem:[#allocation17 + $0x4b8] sm:$0xff]  ;;  %v3064_v49 = vld [vmem:[#allocation17 + $0x5e8] sm:$0xff] }
 0x850   : > { %3309 = vmatpush.msrb.mxu0 %v2882_v56  ;;  %3964 = vtanh.f32 %v2847_v60  ;;  %3360 = vmatpush.msrb.mxu3 %v2996_v1  ;;  %v3024_v52 = vld [vmem:[#allocation17 + $0x4a8] sm:$0xff]  ;;  %v2978_v54 = vld [vmem:[#allocation17 + $0x338] sm:$0xff] }
 0x851   : > { %v2832_v26 = vmul.f32 %v2824_v3, %v4988_v48  ;;  %3326 = vmatpush.msrb.mxu1 %v2920_v58  ;;  %3344 = vmatpush.msrb.mxu2 %v2956_v25  ;;  %v3062_v55 = vld [vmem:[#allocation17 + $0x5d8] sm:$0xff]  ;;  %v2976_v58 = vld [vmem:[#allocation17 + $0x328] sm:$0xff]  ;;  %v2474_v3 = vperm.slane %v4935_v28, 7 }
 0x852   : > { %3310 = vmatpush.msrb.mxu0 %v2880_v4  ;;  %3361 = vmatpush.msrb.mxu3 %v2994_v59  ;;  %v3022_v57 = vld [vmem:[#allocation17 + $0x498] sm:$0xff]  ;;  %v3060_v1 = vld [vmem:[#allocation17 + $0x5c8] sm:$0xff] }
 0x853   : > { %3327 = vmatpush.msrb.mxu1 %v2918_v27  ;;  %v2840_v13 = vadd.f32 %v2832_v26, %v4988_v48  ;;  %3345 = vmatpush.msrb.mxu2 %v2954_v51  ;;  %v2940_v48 = vld [vmem:[#allocation17 + $0x208] sm:$0xff]  ;;  %v3058_v25 = vld [vmem:[#allocation17 + $0x5b8] sm:$0xff] }
 0x854   : > { %3311 = vmatpush.msrb.mxu0 %v2878_v53  ;;  %3362 = vmatpush.msrb.mxu3 %v2992_v11  ;;  %v2974_v27 = vld [vmem:[#allocation17 + $0x318] sm:$0xff]  ;;  %v3056_v51 = vld [vmem:[#allocation17 + $0x5a8] sm:$0xff] }
 0x855   : > { %3328 = vmatpush.msrb.mxu1 %v2916_v9  ;;  %v2848_v16 = vmul.f32 0.7978846, %v2840_v13  ;;  %3346 = vmatpush.msrb.mxu2 %v2952_v18  ;;  %v3018_v59 = vld [vmem:[#allocation17 + $0x478] sm:$0xff]  ;;  %v2972_v9 = vld [vmem:[#allocation17 + $0x308] sm:$0xff] }
 0x856   : > { %v3965_v19 = vpop.eup %3964  ;;  %3312 = vmatpush.msrb.mxu0 %v2876_v6  ;;  %3363 = vmatpush.msrb.mxu3 %v2990_v10  ;;  %v3016_v28 = vld [vmem:[#allocation17 + $0x468] sm:$0xff]  ;;  %v3054_v18 = vld [vmem:[#allocation17 + $0x598] sm:$0xff] }
 0x857   : > { %3329 = vmatpush.msrb.mxu1 %v2914_v15  ;;  %v2863_v23 = vadd.f32 1.0, %v3965_v19  ;;  %3966 = vtanh.f32 %v2848_v16  ;;  %3347 = vmatpush.msrb.mxu2 %v2950_v17  ;;  %v3014_v10 = vld [vmem:[#allocation17 + $0x458] sm:$0xff]  ;;  %v3052_v16 = vld [vmem:[#allocation17 + $0x588] sm:$0xff] }
 0x858   : > { %3364 = vmatpush.msrb.mxu3 %v2988_v20  ;;  %v3012_v19 = vld [vmem:[#allocation17 + $0x448] sm:$0xff] }
 0x859   : > { %v4996_v31 = vmul.f32 %v2863_v23, %v2807_v22  ;;  %3330 = vmatpush.msrb.mxu1 %v2912_v42  ;;  %3348 = vmatpush.msrb.mxu2 %v2948_v24  ;;  %v3050_v42 = vld [vmem:[#allocation17 + $0x578] sm:$0xff]  ;;  %v3048_v24 = vld [vmem:[#allocation17 + $0x568] sm:$0xff] }
 0x85a   : > { %3365 = vmatpush.msrb.mxu3 %v2986_v34  ;;  %v3010_v23 = vld [vmem:[#allocation17 + $0x438] sm:$0xff] }
 0x85b   : > { %3233 = vmatmul.f32.vlgmr.msra.gmra.mxu0 %v4996_v31  ;;  %3331 = vmatpush.msrb.mxu1 %v2910_v7  ;;  %v3046_v34 = vld [vmem:[#allocation17 + $0x558] sm:$0xff] }
 0x85c   : > { %3377 = vmatpush.msra.mxu0 %v3034_v32  ;;  %3349 = vmatpush.msrb.mxu2 %v2946_v2  ;;  %v3008_v32 = vld [vmem:[#allocation17 + $0x428] sm:$0xff] }
 0x85d   : > { %v3967_v29 = vpop.eup %3966  ;;  %3332 = vmatpush.msrb.mxu1 %v2908_v35  ;;  %3366 = vmatpush.msrb.mxu3 %v2984_v46  ;;  %v3006_v35 = vld [vmem:[#allocation17 + $0x418] sm:$0xff]  ;;  %v3004_v46 = vld [vmem:[#allocation17 + $0x408] sm:$0xff] }
 0x85e   : > { %3378 = vmatpush.msra.mxu0 %v3032_v61  ;;  %v2864_v38 = vadd.f32 1.0, %v3967_v29  ;;  %3350 = vmatpush.msrb.mxu2 %v2944_v33  ;;  %v3044_v61 = vld [vmem:[#allocation17 + $0x548] sm:$0xff] }
 0x85f   : > { %3367 = vmatpush.msrb.mxu3 %v2982_v36 }
 0x860   : > { %3379 = vmatpush.msra.mxu0 %v3030_v8  ;;  %v5001_v44 = vmul.f32 %v2864_v38, %v2808_v37  ;;  %3351 = vmatpush.msrb.mxu2 %v2942_v30  ;;  %v3042_v8 = vld [vmem:[#allocation17 + $0x538] sm:$0xff]  ;;  %v3040_v38 = vld [vmem:[#allocation17 + $0x528] sm:$0xff] }
 0x861   : > { %3368 = vmatpush.msrb.mxu3 %v2980_v45 }
 0x862   : > { %3253 = vmatmul.f32.vlgmr.msra.gmra.mxu1 %v5001_v44  ;;  %3380 = vmatpush.msra.mxu0 %v3028_v41  ;;  %v3098_v41 = vld [vmem:[#allocation17 + $0x6f8] sm:$0xff] }
 0x863   : > { %v2740_v50 = vpop.f32.mrf.mxu0  ;;  %3397 = vmatpush.msra.mxu1 %v3066_v12  ;;  %3313 = vmatmul.f32.vlgmr.msrb.gmra.mxu0 %v4964_v40  ;;  %v2760_v56 = vpop.f32.mrf.mxu1  ;;  %v3020_v40 = vld [vmem:[#allocation17 + $0x488] sm:$0xff] }
 0x864   : > { %v2741_v47 = vadd.f32 %v2740_v50, %v2473_v43  ;;  %3381 = vmatpush.msra.mxu0 %v3026_v39  ;;  %3352 = vmatpush.msrb.mxu2 %v2940_v48  ;;  %v3038_v43 = vld [vmem:[#allocation17 + $0x518] sm:$0xff]  ;;  %v3096_v12 = vld [vmem:[#allocation17 + $0x6e8] sm:$0xff] }
 0x865   : > { %3398 = vmatpush.msra.mxu1 %v3064_v49  ;;  %3369 = vmatpush.msrb.mxu3 %v2978_v54  ;;  %v3036_v39 = vld [vmem:[#allocation17 + $0x508] sm:$0xff]  ;;  %v3094_v49 = vld [vmem:[#allocation17 + $0x6d8] sm:$0xff] }
 0x866   : > { %v5005_v60 = vadd.f32 %v2760_v56, %v2741_v47  ;;  %3382 = vmatpush.msra.mxu0 %v3024_v52  ;;  %v3092_v52 = vld [vmem:[#allocation17 + $0x6c8] sm:$0xff]  ;;  %v3090_v47 = vld [vmem:[#allocation17 + $0x6b8] sm:$0xff] }
 0x867   : > { %3399 = vmatpush.msra.mxu1 %v3062_v55  ;;  %3370 = vmatpush.msrb.mxu3 %v2976_v58  ;;  %v3128_v55 = vld [vmem:[#allocation17 + $0x7e8] sm:$0xff]  ;;  %v3086_v58 = vld [vmem:[#allocation17 + $0x698] sm:$0xff] }
 0x868   : > { %v2817_v4 = vmul.f32 0.044715, %v5005_v60  ;;  %3383 = vmatpush.msra.mxu0 %v3022_v57  ;;  %v2809_v36 = vmul.f32 0.5, %v5005_v60  ;;  %v3088_v56 = vld [vmem:[#allocation17 + $0x6a8] sm:$0xff]  ;;  %v3126_v57 = vld [vmem:[#allocation17 + $0x7d8] sm:$0xff] }
 0x869   : > { %3400 = vmatpush.msra.mxu1 %v3060_v1  ;;  %3371 = vmatpush.msrb.mxu3 %v2974_v27  ;;  %v3084_v1 = vld [vmem:[#allocation17 + $0x688] sm:$0xff] }
 0x86a   : > { %v2825_v26 = vmul.f32 %v2817_v4, %v5005_v60  ;;  %v2780_v53 = vpop.f32.mrf.mxu2  ;;  %3333 = vmatmul.f32.vlgmr.msrb.gmra.mxu1 %v4970_v0  ;;  %3384 = vmatpush.msra.mxu0 %v3020_v40  ;;  %v2800_v13 = vpop.f32.mrf.mxu3  ;;  %v3120_v40 = vld [vmem:[#allocation17 + $0x7a8] sm:$0xff] }
 0x86b   : > { %v2781_v11 = vadd.f32 %v2780_v53, %v2474_v3  ;;  %3401 = vmatpush.msra.mxu1 %v3058_v25  ;;  %3372 = vmatpush.msrb.mxu3 %v2972_v9  ;;  %v3122_v3 = vld [vmem:[#allocation17 + $0x7b8] sm:$0xff]  ;;  %v3080_v4 = vld [vmem:[#allocation17 + $0x668] sm:$0xff] }
 0x86c   : > { %v2833_v6 = vmul.f32 %v2825_v26, %v5005_v60  ;;  %3385 = vmatpush.msra.mxu0 %v3018_v59  ;;  %v3078_v25 = vld [vmem:[#allocation17 + $0x658] sm:$0xff]  ;;  %v3116_v27 = vld [vmem:[#allocation17 + $0x788] sm:$0xff] }
 0x86d   : > { %v2801_v15 = vadd.f32 %v2800_v13, %v2781_v11  ;;  %3402 = vmatpush.msra.mxu1 %v3056_v51  ;;  %v3076_v59 = vld [vmem:[#allocation17 + $0x648] sm:$0xff]  ;;  %v3114_v26 = vld [vmem:[#allocation17 + $0x778] sm:$0xff] }
 0x86e   : > { %3386 = vmatpush.msra.mxu0 %v3016_v28  ;;  %v2841_v0 = vadd.f32 %v2833_v6, %v5005_v60  ;;  %v3124_v60 = vld [vmem:[#allocation17 + $0x7c8] sm:$0xff]  ;;  %v3074_v53 = vld [vmem:[#allocation17 + $0x638] sm:$0xff] }
 0x86f   : > { %v2818_v17 = vmul.f32 0.044715, %v2801_v15  ;;  %3403 = vmatpush.msra.mxu1 %v3054_v18  ;;  %v2810_v48 = vmul.f32 0.5, %v2801_v15  ;;  %v3112_v51 = vld [vmem:[#allocation17 + $0x768] sm:$0xff]  ;;  %v3110_v9 = vld [vmem:[#allocation17 + $0x758] sm:$0xff] }
 0x870   : > { %3387 = vmatpush.msra.mxu0 %v3014_v10  ;;  %v2849_v20 = vmul.f32 0.7978846, %v2841_v0  ;;  %v3070_v11 = vld [vmem:[#allocation17 + $0x618] sm:$0xff]  ;;  %v3108_v28 = vld [vmem:[#allocation17 + $0x748] sm:$0xff] }
 0x871   : > { %v2826_v22 = vmul.f32 %v2818_v17, %v2801_v15  ;;  %3404 = vmatpush.msra.mxu1 %v3052_v16  ;;  %v3068_v6 = vld [vmem:[#allocation17 + $0x608] sm:$0xff]  ;;  %v3106_v13 = vld [vmem:[#allocation17 + $0x738] sm:$0xff] }
 0x872   : > { %3388 = vmatpush.msra.mxu0 %v3012_v19  ;;  %3968 = vtanh.f32 %v2849_v20  ;;  %v3104_v18 = vld [vmem:[#allocation17 + $0x728] sm:$0xff] }
 0x873   : > { %v2834_v7 = vmul.f32 %v2826_v22, %v2801_v15  ;;  %3405 = vmatpush.msra.mxu1 %v3050_v42  ;;  %v3100_v10 = vld [vmem:[#allocation17 + $0x708] sm:$0xff] }
 0x874   : > { %3389 = vmatpush.msra.mxu0 %v3010_v23 }
 0x875   : > { %3406 = vmatpush.msra.mxu1 %v3048_v24  ;;  %v2842_v2 = vadd.f32 %v2834_v7, %v2801_v15  ;;  %v3102_v15 = vld [vmem:[#allocation17 + $0x718] sm:$0xff]  ;;  %v3131_v24 = vld [vmem:[%s5113_s3] sm:$0x3] }
 0x876   : > { %3390 = vmatpush.msra.mxu0 %v3008_v32  ;;  %v3134_v7 = vperm.slane %v3131_v24, 1 }
 0x877   : > { %3407 = vmatpush.msra.mxu1 %v3046_v34  ;;  %v2850_v33 = vmul.f32 0.7978846, %v2842_v2  ;;  %v3133_v34 = vperm.slane %v3131_v24, 0 }
 0x878   : > { %v3969_v29 = vpop.eup %3968  ;;  %3391 = vmatpush.msra.mxu0 %v3006_v35 }
 0x879   : > { %3408 = vmatpush.msra.mxu1 %v3044_v61  ;;  %v2865_v37 = vadd.f32 1.0, %v3969_v29  ;;  %3970 = vtanh.f32 %v2850_v33 }
 0x87a   : > { %3392 = vmatpush.msra.mxu0 %v3004_v46 }
 0x87b   : > { %3409 = vmatpush.msra.mxu1 %v3042_v8  ;;  %v5014_v30 = vmul.f32 %v2865_v37, %v2809_v36  ;;  %3393 = vmatmul.f32.vlgmr.msra.gmra.mxu0 %v4996_v31  ;;  %v3130_v31 = vld [vmem:[#allocation17 + $0x7f8] sm:$0xff] }
 0x87d   : > { %3273 = vmatmul.f32.vlgmr.msra.gmra.mxu2 %v5014_v30  ;;  %3410 = vmatpush.msra.mxu1 %v3040_v38 }
 0x87e   : > { %3417 = vmatpush.msra.mxu2 %v3098_v41 }
 0x87f   : > { %v3971_v45 = vpop.eup %3970  ;;  %3411 = vmatpush.msra.mxu1 %v3038_v43 }
 0x880   : > { %3418 = vmatpush.msra.mxu2 %v3096_v12  ;;  %v2866_v50 = vadd.f32 1.0, %v3971_v45 }
 0x881   : > { %3412 = vmatpush.msra.mxu1 %v3036_v39 }
 0x882   : > { %3419 = vmatpush.msra.mxu2 %v3094_v49  ;;  %v2874_v54 = vmul.f32 %v2866_v50, %v2810_v48  ;;  %3413 = vmatmul.f32.vlgmr.msra.gmra.mxu1 %v5001_v44  ;;  %v3082_v44 = vld [vmem:[#allocation17 + $0x678] sm:$0xff] }
 0x884   : > { %3293 = vmatmul.f32.vlgmr.msra.gmra.mxu3 %v2874_v54  ;;  %3420 = vmatpush.msra.mxu2 %v3092_v52 }
 0x885   : > { %3437 = vmatpush.msra.mxu3 %v3130_v31  ;;  %3353 = vmatmul.f32.vlgmr.msrb.gmra.mxu2 %v4975_v5  ;;  %v3118_v5 = vld [vmem:[#allocation17 + $0x798] sm:$0xff] }
 0x886   : > { %3421 = vmatpush.msra.mxu2 %v3090_v47 }
 0x887   : > { %3438 = vmatpush.msra.mxu3 %v3128_v55 }
 0x888   : > { %3422 = vmatpush.msra.mxu2 %v3088_v56 }
 0x889   : > { %3439 = vmatpush.msra.mxu3 %v3126_v57 }
 0x88a   : > { %3423 = vmatpush.msra.mxu2 %v3086_v58 }
 0x88b   : > { %3440 = vmatpush.msra.mxu3 %v3124_v60 }
 0x88c   : > { %3373 = vmatmul.f32.vlgmr.msrb.gmra.mxu3 %v4983_v21  ;;  %3424 = vmatpush.msra.mxu2 %v3084_v1  ;;  %v3072_v21 = vld [vmem:[#allocation17 + $0x628] sm:$0xff] }
 0x88d   : > { %3441 = vmatpush.msra.mxu3 %v3122_v3 }
 0x88e   : > { %3425 = vmatpush.msra.mxu2 %v3082_v44 }
 0x88f   : > { %3442 = vmatpush.msra.mxu3 %v3120_v40 }
 0x890   : > { %3426 = vmatpush.msra.mxu2 %v3080_v4 }
 0x891   : > { %3443 = vmatpush.msra.mxu3 %v3118_v5 }
 0x892   : > { %3427 = vmatpush.msra.mxu2 %v3078_v25 }
 0x893   : > { %3444 = vmatpush.msra.mxu3 %v3116_v27 }
 0x894   : > { %3428 = vmatpush.msra.mxu2 %v3076_v59 }
 0x895   : > { %3445 = vmatpush.msra.mxu3 %v3114_v26 }
 0x896   : > { %3429 = vmatpush.msra.mxu2 %v3074_v53  ;;  %v3459_v53 = vld [vmem:[#allocation19] sm:$0x3] }
 0x897   : > { %3446 = vmatpush.msra.mxu3 %v3112_v51 }
 0x898   : > { %3430 = vmatpush.msra.mxu2 %v3072_v21 }
 0x899   : > { %3447 = vmatpush.msra.mxu3 %v3110_v9  ;;  %v3460_v9 = vld [vmem:[%s5114_s8] sm:$0x3] }
 0x89a   : > { %3431 = vmatpush.msra.mxu2 %v3070_v11  ;;  %v3487_v11 = vperm.slane %v3459_v53, 0 }
 0x89b   : > { %3448 = vmatpush.msra.mxu3 %v3108_v28  ;;  %v3488_v28 = vperm.slane %v3459_v53, 1 }
 0x89c   : > { %3432 = vmatpush.msra.mxu2 %v3068_v6 }
 0x89d   : > { %3449 = vmatpush.msra.mxu3 %v3106_v13  ;;  %3433 = vmatmul.f32.vlgmr.msra.gmra.mxu2 %v5014_v30 }
 0x89f   : > { %3450 = vmatpush.msra.mxu3 %v3104_v18  ;;  %v3494_v18 = vperm.slane %v3460_v9, 0 }
 0x8a1   : > { %3451 = vmatpush.msra.mxu3 %v3102_v15  ;;  %v3495_v15 = vperm.slane %v3460_v9, 1 }
 0x8a3   : > { %3452 = vmatpush.msra.mxu3 %v3100_v10 }
 0x8a4   : > { %3453 = vmatmul.f32.vlgmr.msra.gmra.mxu3 %v2874_v54 }
 0x8b4   : > { %v3154_v16 = vpop.f32.mrf.mxu0 }
 0x8b5   : > { %v3155_v46 = vadd.f32 %v3154_v16, %v3133_v34 }
 0x8bb   : > { %v3174_v0 = vpop.f32.mrf.mxu1 }
 0x8bc   : > { %v3175_v8 = vadd.f32 %v3174_v0, %v3155_v46 }
 0x8c4   : > { %v3194_v17 = vpop.f32.mrf.mxu2 }
 0x8c5   : > { %v3195_v37 = vadd.f32 %v3194_v17, %v3175_v8 }
 0x8cb   : > { %v3214_v19 = vpop.f32.mrf.mxu3 }
 0x8cc   : > { %v3215_v30 = vadd.f32 %v3214_v19, %v3195_v37 }
 0x8d8   : > { %v3234_v42 = vpop.f32.mrf.mxu0 }
 0x8d9   : > { %v3235_v43 = vadd.f32 %v3234_v42, %v3215_v30 }
 0x8df   : > { %v3254_v20 = vpop.f32.mrf.mxu1 }
 0x8e0   : > { %v3314_v32 = vpop.f32.mrf.mxu0  ;;  %v3255_v39 = vadd.f32 %v3254_v20, %v3235_v43 }
 0x8e1   : > { %v3315_v2 = vadd.f32 %v3314_v32, %v3134_v7 }
 0x8e7   : > { %v3334_v35 = vpop.f32.mrf.mxu1 }
 0x8e8   : > { %v3335_v33 = vadd.f32 %v3334_v35, %v3315_v2 }
 0x8f8   : > { %v3394_v41 = vpop.f32.mrf.mxu0 }
 0x8ff   : > { %v3414_v45 = vpop.f32.mrf.mxu1 }
 0x900   : > { %v3274_v22 = vpop.f32.mrf.mxu2 }
 0x901   : > { %v3275_v48 = vadd.f32 %v3274_v22, %v3255_v39 }
 0x907   : > { %v3294_v23 = vpop.f32.mrf.mxu3 }
 0x908   : > { %v3354_v61 = vpop.f32.mrf.mxu2  ;;  %v3295_v52 = vadd.f32 %v3294_v23, %v3275_v48 }
 0x909   : > { %v3355_v36 = vadd.f32 %v3354_v61, %v3335_v33 }
 0x90a   : > { %v3457_v55 = vadd.f32 %v3295_v52, %v4912_v62 }
 0x90f   : > { %v3374_v29 = vpop.f32.mrf.mxu3 }
 0x910   : > { %v3375_v38 = vadd.f32 %v3374_v29, %v3355_v36 }
 0x912   : > { %v3395_v12 = vadd.f32 %v3394_v41, %v3375_v38 }
 0x914   : > { %v3415_v50 = vadd.f32 %v3414_v45, %v3395_v12 }
 0x920   : > { %v3434_v49 = vpop.f32.mrf.mxu2 }
 0x921   : > { %v3435_v54 = vadd.f32 %v3434_v49, %v3415_v50 }
 0x927   : > { %v3454_v31 = vpop.f32.mrf.mxu3 }
 0x928   : > { %v3455_v47 = vadd.f32 %v3454_v31, %v3435_v54 }
 0x92a   : > { %v3458_v56 = vadd.f32 %v3455_v47, %v4914_v63 }
 0x92c   : > { %v3461_v57 = vadd.f32 %v3458_v56, %v3457_v55 }
 0x92e   : > { %3462 = vadd.xlane.f32.xlu1 %v3461_v57 }
 0x9a1   : > { %v3463_v58 = vpop.xlane.xlu1 %3462 }
 0x9a2   : > { %v3464_v60 = vmul.f32 %v3463_v58, %v4896_v14 }
 0x9a4   : > { %v3465_v1 = vsub.f32 %v3457_v55, %v3464_v60  ;;  %v3466_v3 = vsub.f32 %v3458_v56, %v3464_v60 }
 0x9a6   : > { %v3467_v44 = vmul.f32 %v3465_v1, %v3465_v1  ;;  %v3468_v40 = vmul.f32 %v3466_v3, %v3466_v3 }
 0x9a8   : > { %v3469_v4 = vadd.f32 %v3468_v40, %v3467_v44 }
 0x9aa   : > { %3470 = vadd.xlane.f32.xlu2 %v3469_v4 }
 0xa1d   : > { %v3471_v5 = vpop.xlane.xlu2 %3470 }
 0xa1e   : > { %v3472_v25 = vmul.f32 %v3471_v5, %v4896_v14 }
 0xa20   : > { %v3473_v27 = vadd.f32 1e-05, %v3472_v25 }
 0xa22   : > { %3972 = vrsqrt.f32 %v3473_v27  ;;  %vm3480_vm9 = vweird.f32 %v3473_v27 }
 0xa28   : > { %v3973_v62 = vpop.eup %3972 }
 0xa29   : > { %v3475_v59 = vmul.f32 %v3973_v62, %v3473_v27  ;;  %vm3481_vm8 = vweird.f32 %v3973_v62 }
 0xa2a   : > { %vm3482_vm10 = vmor %vm3480_vm9, %vm3481_vm8 }
 0xa2b   : > { %v3476_v63 = vmul.f32 %v3973_v62, %v3475_v59 }
 0xa2d   : > { %v3477_v26 = vmul.f32 0.5, %v3476_v63 }
 0xa2f   : > { %v3478_v51 = vsub.f32 1.5, %v3477_v26 }
 0xa31   : > { %v3479_v21 = vmul.f32 %v3973_v62, %v3478_v51 }
 0xa33   : > { %v3483_v14 = vsel %vm3482_vm10, %v3973_v62, %v3479_v21 }
 0xa34   : > { %v3484_v6 = vmul.f32 %v3483_v14, %v3465_v1  ;;  %v3485_v13 = vmul.f32 %v3483_v14, %v3466_v3 }
 0xa36   : > { %v3491_v10 = vmul.f32 %v3487_v11, %v3484_v6  ;;  %v3492_v16 = vmul.f32 %v3488_v28, %v3485_v13 }
 0xa38   : > { %v3498_v0 = vadd.f32 %v3494_v18, %v3491_v10  ;;  %v3499_v17 = vadd.f32 %v3495_v15, %v3492_v16 }
 0xa3a   : > { %3500 = vst [vmem:[%s658_s20] sm:$0xff] %v3498_v0 }
 0xa3b   : > { %3501 = vst [vmem:[%s658_s20 + $0x8] sm:$0xff] %v3499_v17 }
 0xa3c   : > { %4333 = shalt.err (!%p4330_p10)
}
 0xa3d   : > { %3807 = dma.vmem_to_hbm [thread:$0]  (%p4602_p0), %s3517_s28, 256, %s3519_s27, %s3503_s19  }
 0xa3e PF: > { %s3530_s4 = sand.u32 1, %s4384_s29   ;;  %p5116_p11 = scmp.ge.s32.totalorder %s4396_s16, 2 }
 0xa3f   : > { %s3531_s3 = scalar_lea.sflag [#allocation4], %s3530_s4 }
 0xa40   : > { %p3845_p5 = pnand %p5116_p11, %p4610_p6 }
 0xa42   : > { %p3846_p12 = pneg %p3845_p5 }
 0xa44   : > { %4379 = dma.done.wait (%p3846_p12), %s3531_s3, 256  }
 0xa45   : > { %4381 = vsyncadd (%p3846_p12), %s3531_s3, 4294967040  ;;  %p34_p2 = scmp.ge.s32.totalorder %s4578_s13, 4   ;;  %s5117_s29 = smov %s4388_s30 }
 0xa46   : > { %s5118_s30 = smov %s4392_s15  ;;  %s5119_s15 = smov %s4590_s11 }
 0xa47   : > { %s5120_s16 = smov %s4578_s13  ;;  %36 = sbr.rel (!%p34_p2) target bundleno = 25 (0x19), region = 170 }
 0xa4c   :  { %3537 = vsyncpa [#allocation3], 1 }
 0xa4d   :  { %3539 = vsyncpa [#allocation3 + $0x1], 1 }
 0xa4e   :  { %3540 = vsyncpa [#allocation6], 1 }
 0xa4f   :  { %3542 = vsyncpa [#allocation6 + $0x1], 1 }
 0xa50   :  { %3543 = vsyncpa [#allocation9], 1 }
 0xa51   :  { %3544 = vsyncpa [#allocation12], 1 }
 0xa52   :  { %3545 = vsyncpa [#allocation15], 1 }
 0xa53   :  { %3546 = vsyncpa [#allocation18], 1 }
 0xa54   :  { %3547 = vsyncpa [#allocation4], 1 }
 0xa55   :  { %3549 = vsyncpa [#allocation4 + $0x1], 1 }

</bundles_post_ra>
